<compile_context>
chip_gen: v6e
topology: v6e:2x2x1
jax: 0.10.0
libtpu: 0.0.40
codegen_flags: <defaults>
</compile_context>

<pallas_src>
import functools

import jax
import jax.numpy as jnp
from jax.experimental import pallas as pl
from jax.experimental.pallas import tpu as pltpu


# ----------------------------------------------------------------------------
# Helpers
# ----------------------------------------------------------------------------
def _vmem_limit_bytes(frac=0.8):
    cap = 128 * 1024 * 1024
    try:
        info = pltpu.get_tpu_info()
        cap = int(getattr(info, "vmem_capacity_bytes", cap))
    except Exception:
        pass
    return int(min(cap * frac, 96 * 1024 * 1024))


def _pick_tile(hw, cap=512, min_tiles=1):
    """Largest lane tile (multiple of 128) dividing hw, else the full hw."""
    t = min(cap, hw)
    t = (t // 128) * 128
    while t >= 128:
        if hw % t == 0 and hw // t >= min_tiles:
            return t
        t -= 128
    return hw


# ----------------------------------------------------------------------------
# Haar DWT / IDWT (pywt 'haar'; subband channel order [LL, LH, HL, HH]).
# Pure elementwise re-arrangement -> plain JAX glue (bf16), single pass.
# ----------------------------------------------------------------------------
def dwt_haar(x):
    a = x[:, :, 0::2, 0::2]
    b = x[:, :, 0::2, 1::2]
    c = x[:, :, 1::2, 0::2]
    d = x[:, :, 1::2, 1::2]
    ll = 0.5 * (a + b + c + d)
    lh = 0.5 * (a + b - c - d)
    hl = 0.5 * (a - b + c - d)
    hh = 0.5 * (a - b - c + d)
    return jnp.concatenate([ll, lh, hl, hh], axis=1)


def idwt_haar(x):
    C = x.shape[1] // 4
    ll, lh, hl, hh = x[:, :C], x[:, C:2 * C], x[:, 2 * C:3 * C], x[:, 3 * C:]
    a = 0.5 * (ll + lh + hl + hh)
    b = 0.5 * (ll + lh - hl - hh)
    c = 0.5 * (ll - lh + hl - hh)
    d = 0.5 * (ll - lh - hl + hh)
    Bb, Cc, h, w = ll.shape
    top = jnp.stack([a, b], axis=-1).reshape(Bb, Cc, h, 2 * w)
    bot = jnp.stack([c, d], axis=-1).reshape(Bb, Cc, h, 2 * w)
    return jnp.stack([top, bot], axis=-2).reshape(Bb, Cc, 2 * h, 2 * w)


# ----------------------------------------------------------------------------
# Pallas kernel 1: 3x3 conv (pad=1) + fused eval BatchNorm + ReLU, with the
# im2col folded into the kernel: 9 shifted bf16 matmuls, f32 accumulation.
#   Input layout : (B, Cin, (H+4)*W)  -- 2 zero rows padded top and bottom,
#                  spatial flattened row-major so every 3x3 tap is a constant
#                  lane offset s = (di+1)*W + dj - 1 of the same slab.
#   Output layout: (B, Cout, H*W) lane-dense.
# ----------------------------------------------------------------------------
def _conv_bn_relu_kernel(x_ref, w_ref, scale_ref, shift_ref, o_ref, *, H, W):
    HW = H * W
    x = x_ref[0]                                            # (Cin, (H+4)*W) bf16
    col = jax.lax.broadcasted_iota(jnp.int32, (1, HW), 1) % W
    mask_l = col != 0            # output column has a left neighbor
    mask_r = col != (W - 1)      # output column has a right neighbor

    tco = o_ref.shape[1]
    acc = jnp.zeros((tco, HW), jnp.float32)
    for di in range(3):
        for dj in range(3):
            s = (di + 1) * W + (dj - 1)                     # flat tap offset
            xs = x[:, s:s + HW]                             # (Cin, HW) bf16
            if dj == 0:
                xs = jnp.where(mask_l, xs, jnp.zeros_like(xs))
            elif dj == 2:
                xs = jnp.where(mask_r, xs, jnp.zeros_like(xs))
            acc = acc + jnp.dot(w_ref[di * 3 + dj], xs,
                                preferred_element_type=jnp.float32)

    y = acc * scale_ref[...] + shift_ref[...]
    o_ref[0] = jnp.maximum(y, 0.0).astype(o_ref.dtype)


def conv3x3_bn_relu(x, weight, bias, gamma, beta, mean, var, eps=1e-5,
                    out_dtype=jnp.bfloat16):
    """3x3 conv (pad=1, stride=1) + BatchNorm2d (eval) + ReLU.  x: (B,Cin,H,W)."""
    B, Cin, H, W = x.shape
    Cout = weight.shape[0]
    HW = H * W
    HWp = (H + 4) * W

    # Row-pad once (cheap) and flatten; input / weights in bf16.
    xpad = jnp.pad(x.astype(jnp.bfloat16),
                   ((0, 0), (0, 0), (2, 2), (0, 0))).reshape(B, Cin, HWp)
    w9 = jnp.transpose(weight, (2, 3, 0, 1)).reshape(9, Cout, Cin)
    w9 = w9.astype(jnp.bfloat16)

    scale_v = gamma / jnp.sqrt(var + eps)
    shift_v = (bias - mean) * scale_v + beta
    scale = scale_v.reshape(Cout, 1).astype(jnp.float32)
    shift = shift_v.reshape(Cout, 1).astype(jnp.float32)

    # Split Cout across two grid steps only when it is large enough; keeps the
    # (8,128) tiling rule satisfied and gives the 2nd TensorCore work at B=1.
    n_co = 2 if (Cout >= 64 and Cout % 16 == 0) else 1
    TCo = Cout // n_co

    kernel = functools.partial(_conv_bn_relu_kernel, H=H, W=W)
    out = pl.pallas_call(
        kernel,
        out_shape=jax.ShapeDtypeStruct((B, Cout, HW), out_dtype),
        grid=(B, n_co),
        in_specs=[
            pl.BlockSpec((1, Cin, HWp), lambda b, co: (b, 0, 0)),
            pl.BlockSpec((9, TCo, Cin), lambda b, co: (0, co, 0)),
            pl.BlockSpec((TCo, 1), lambda b, co: (co, 0)),
            pl.BlockSpec((TCo, 1), lambda b, co: (co, 0)),
        ],
        out_specs=pl.BlockSpec((1, TCo, HW), lambda b, co: (b, co, 0)),
        compiler_params=pltpu.CompilerParams(
            dimension_semantics=("parallel", "parallel"),
            vmem_limit_bytes=_vmem_limit_bytes()),
    )(xpad, w9, scale, shift)
    return out.reshape(B, Cout, H, W)


# ----------------------------------------------------------------------------
# Pallas kernel 2: fused K/V 1x1 projection.  Emits K as (B, Cp, HW) and V^T
# as (B, HW, Cp) (both bf16) so the attention kernel never transposes the
# large (TQ, HW) attention tile.  (Cp = C rounded up to a multiple of 8;
# padded rows/cols are zero.)
# ----------------------------------------------------------------------------
def _kv_proj_kernel(x_ref, wkv_ref, bkv_ref, k_ref, vt_ref):
    x = x_ref[0]                                            # (C, TN) bf16
    kv = jnp.dot(wkv_ref[...], x,
                 preferred_element_type=jnp.float32) + bkv_ref[...]  # (2Cp, TN)
    Cp = k_ref.shape[1]
    k_ref[0] = kv[:Cp].astype(k_ref.dtype)                  # (Cp, TN)
    vt_ref[0] = kv[Cp:].T.astype(vt_ref.dtype)              # (TN, Cp)


def kv_projection(x, wk, bk, wv, bv):
    B, C, HW = x.shape
    Cp = ((C + 7) // 8) * 8
    pad = ((0, Cp - C), (0, 0))
    wkv = jnp.concatenate([jnp.pad(wk.reshape(C, C), pad),
                           jnp.pad(wv.reshape(C, C), pad)],
                          axis=0).astype(jnp.bfloat16)
    bkv = jnp.concatenate([jnp.pad(bk.reshape(C, 1), pad),
                           jnp.pad(bv.reshape(C, 1), pad)],
                          axis=0).astype(jnp.float32)

    TN = _pick_tile(HW)
    grid = (B, HW // TN)
    k, vt = pl.pallas_call(
        _kv_proj_kernel,
        out_shape=(jax.ShapeDtypeStruct((B, Cp, HW), jnp.bfloat16),
                   jax.ShapeDtypeStruct((B, HW, Cp), jnp.bfloat16)),
        grid=grid,
        in_specs=[
            pl.BlockSpec((1, C, TN), lambda b, n: (b, 0, n)),
            pl.BlockSpec((2 * Cp, C), lambda b, n: (0, 0)),
            pl.BlockSpec((2 * Cp, 1), lambda b, n: (0, 0)),
        ],
        out_specs=(
            pl.BlockSpec((1, Cp, TN), lambda b, n: (b, 0, n)),
            # NOTE: V^T stores have lane width Cp < 128 (masked vst); the
            # traffic is tiny relative to the attention matmuls.
            pl.BlockSpec((1, TN, Cp), lambda b, n: (b, n, 0)),
        ),
        compiler_params=pltpu.CompilerParams(
            dimension_semantics=("parallel", "parallel"),
            vmem_limit_bytes=_vmem_limit_bytes()),
    )(x, wkv, bkv)
    return k, vt


# ----------------------------------------------------------------------------
# Pallas kernel 3: Q projection + spatial attention per query tile.
#   energy[i,j] = sum_c Q[c,i] K[c,j];  attn = softmax_j(energy)
#   out[c,i]    = sum_j V[c,j] attn[i,j]
# K (Cp, HW) and V^T (HW, Cp) are precomputed and stay resident across query
# tiles (constant block index); both grid axes are "parallel".
# ----------------------------------------------------------------------------
def _attention_kernel(xq_ref, wq_ref, bq_ref, k_ref, vt_ref, o_ref):
    C = o_ref.shape[1]

    xq = xq_ref[0]                                          # (C, TQ) bf16
    q = jnp.dot(wq_ref[...], xq,
                preferred_element_type=jnp.float32) + bq_ref[...]   # (Cp, TQ)

    k = k_ref[0]                                            # (Cp, HW) bf16
    energy = jax.lax.dot_general(
        q.astype(jnp.bfloat16), k, (((0,), (0,)), ((), ())),
        preferred_element_type=jnp.float32)                 # (TQ, HW) f32

    # Online-free exact softmax over the full row; exp in bf16 (argument <= 0),
    # row-sum and reciprocal in f32, normalization applied after the V matmul.
    m = jnp.max(energy, axis=-1, keepdims=True)
    p = jnp.exp((energy - m).astype(jnp.bfloat16))          # (TQ, HW) bf16
    l = jnp.sum(p.astype(jnp.float32), axis=-1, keepdims=True)   # (TQ, 1) f32

    vt = vt_ref[0]                                          # (HW, Cp) bf16
    out_t = jnp.dot(p, vt, preferred_element_type=jnp.float32)   # (TQ, Cp)
    out_t = out_t * pl.reciprocal(l, approx=True)

    o_ref[0] = out_t.T[:C, :].astype(o_ref.dtype)           # (C, TQ)


def spatial_attention(x_idwt, x, wq, bq, wk, bk, wv, bv):
    B, C, H, W = x.shape
    HW = H * W
    Cp = ((C + 7) // 8) * 8

    xq = x_idwt.reshape(B, C, HW).astype(jnp.bfloat16)
    xk = x.reshape(B, C, HW).astype(jnp.bfloat16)

    k, vt = kv_projection(xk, wk, bk, wv, bv)

    pad = ((0, Cp - C), (0, 0))
    wq_p = jnp.pad(wq.reshape(C, C), pad).astype(jnp.bfloat16)
    bq_p = jnp.pad(bq.reshape(C, 1), pad).astype(jnp.float32)

    TQ = _pick_tile(HW, min_tiles=2)
    nq = HW // TQ

    out = pl.pallas_call(
        _attention_kernel,
        out_shape=jax.ShapeDtypeStruct((B, C, HW), jnp.bfloat16),
        grid=(B, nq),
        in_specs=[
            pl.BlockSpec((1, C, TQ), lambda b, q: (b, 0, q)),
            pl.BlockSpec((Cp, C), lambda b, q: (0, 0)),
            pl.BlockSpec((Cp, 1), lambda b, q: (0, 0)),
            pl.BlockSpec((1, Cp, HW), lambda b, q: (b, 0, 0)),
            pl.BlockSpec((1, HW, Cp), lambda b, q: (b, 0, 0)),
        ],
        out_specs=pl.BlockSpec((1, C, TQ), lambda b, q: (b, 0, q)),
        compiler_params=pltpu.CompilerParams(
            dimension_semantics=("parallel", "parallel"),
            vmem_limit_bytes=_vmem_limit_bytes()),
    )(xq, wq_p, bq_p, k, vt)
    return out.reshape(B, C, H, W)


# ----------------------------------------------------------------------------
# WaveAttention3 forward
# ----------------------------------------------------------------------------
def wave_attention3_forward(params, x1, x2):
    x1b = x1.astype(jnp.bfloat16)
    x2b = x2.astype(jnp.bfloat16)

    # x = self.cat(cat([x1, x2], 1))
    x = conv3x3_bn_relu(jnp.concatenate([x1b, x2b], axis=1), *params["cat"])

    # wavelet branch
    x1_dwt = dwt_haar(x1b)
    x2_dwt = dwt_haar(x2b)
    x_dwt = conv3x3_bn_relu(jnp.concatenate([x1_dwt, x2_dwt], axis=1),
                            *params["cat2"])
    x_idwt = idwt_haar(x_dwt)

    # spatial attention (Q from idwt branch, K/V from x)
    out = spatial_attention(x_idwt, x, *params["qkv"])

    # outr = self.cat3(cat([out, x], 1))   (final output in f32)
    outr = conv3x3_bn_relu(jnp.concatenate([out, x], axis=1), *params["cat3"],
                           out_dtype=jnp.float32)
    return outr


# ----------------------------------------------------------------------------
# Deterministic parameter init (shapes per module __init__; dim=dim)
# NOTE: self.reduce / self.filter / self.Sigmoid / num_heads / scale are never
# used in the PyTorch forward(), so they are not materialized here.
# ----------------------------------------------------------------------------
def init_params(key, dim):
    def conv_bn(k, cin, cout):
        k1, k2, k3, k4, k5 = jax.random.split(k, 5)
        w = 0.1 * jax.random.normal(k1, (cout, cin, 3, 3), jnp.float32)
        b = 0.05 * jax.random.normal(k2, (cout,), jnp.float32)
        gamma = 1.0 + 0.1 * jax.random.normal(k3, (cout,), jnp.float32)
        beta = 0.05 * jax.random.normal(k4, (cout,), jnp.float32)
        mean = 0.05 * jax.random.normal(k5, (cout,), jnp.float32)
        var = jnp.ones((cout,), jnp.float32)
        return (w, b, gamma, beta, mean, var)

    def conv1x1(k, cin, cout):
        k1, k2 = jax.random.split(k)
        w = 0.1 * jax.random.normal(k1, (cout, cin, 1, 1), jnp.float32)
        b = 0.05 * jax.random.normal(k2, (cout,), jnp.float32)
        return w, b

    kc, kc2, kc3, kq, kk, kv = jax.random.split(key, 6)
    wq, bq = conv1x1(kq, dim, dim)
    wk, bk = conv1x1(kk, dim, dim)
    wv, bv = conv1x1(kv, dim, dim)
    return {
        "cat": conv_bn(kc, 2 * dim, dim),
        "cat2": conv_bn(kc2, 8 * dim, 4 * dim),
        "cat3": conv_bn(kc3, 2 * dim, dim),
        "qkv": (wq, bq, wk, bk, wv, bv),
    }


if __name__ == "__main__":
    key = jax.random.PRNGKey(0)
    dim, B, H, W = 4, 2, 16, 16
    kp, k1, k2 = jax.random.split(key, 3)
    params = init_params(kp, dim)
    x1 = jax.random.normal(k1, (B, dim, H, W), jnp.float32)
    x2 = jax.random.normal(k2, (B, dim, H, W), jnp.float32)

    fwd = jax.jit(wave_attention3_forward)
    out = fwd(params, x1, x2)
    out = jax.block_until_ready(out)
    assert out.shape == (B, dim, H, W), out.shape
    assert bool(jnp.all(jnp.isfinite(out)))
    print("KERNEL_OK")
</pallas_src>

<mosaic_0001>
module attributes {stable_mosaic.version = 11 : i64} {
  func.func @_conv_bn_relu_kernel(%arg0: i32, %arg1: i32, %arg2: memref<1x8x320xbf16, #tpu.memory_space<vmem>>, %arg3: memref<9x4x8xbf16, #tpu.memory_space<vmem>>, %arg4: memref<4x1xf32, #tpu.memory_space<vmem>>, %arg5: memref<4x1xf32, #tpu.memory_space<vmem>>, %arg6: memref<1x4x256xbf16, #tpu.memory_space<vmem>>) attributes {dimension_semantics = [#tpu.dimension_semantics<parallel>, #tpu.dimension_semantics<parallel>], iteration_bounds = array<i64: 2, 1>, scalar_prefetch = 0 : i64, scratch_operands = 0 : i64, tpu.core_type = #tpu.core_type<tc>, window_params = [{transform_indices = @transform_0, window_bounds = array<i64: 1, 8, 320>}, {transform_indices = @transform_1, window_bounds = array<i64: 9, 4, 8>}, {transform_indices = @transform_2, window_bounds = array<i64: 4, 1>}, {transform_indices = @transform_3, window_bounds = array<i64: 4, 1>}, {transform_indices = @transform_4, window_bounds = array<i64: 1, 4, 256>}]} {
    %c0 = arith.constant 0 : index
    %c0_0 = arith.constant 0 : index
    %c0_1 = arith.constant 0 : index
    %0 = vector.load %arg2[%c0, %c0_0, %c0_1] : memref<1x8x320xbf16, #tpu.memory_space<vmem>>, vector<1x8x320xbf16>
    %1 = vector.shape_cast %0 : vector<1x8x320xbf16> to vector<8x320xbf16>
    %2 = tpu.iota {dimensions = array<i32: 1>} : vector<1x256xi32>
    %c16_i32 = arith.constant 16 : i32
    %c0_i32 = arith.constant 0 : i32
    %3 = arith.cmpi eq, %c16_i32, %c0_i32 : i32
    %c1_i32 = arith.constant 1 : i32
    %4 = arith.select %3, %c1_i32, %c16_i32 : i32
    %5 = vector.broadcast %4 : i32 to vector<1x256xi32>
    %6 = arith.remsi %2, %5 : vector<1x256xi32>
    %c0_i32_2 = arith.constant 0 : i32
    %7 = vector.broadcast %c0_i32_2 : i32 to vector<1x256xi32>
    %8 = arith.cmpi ne, %6, %7 : vector<1x256xi32>
    %c0_i32_3 = arith.constant 0 : i32
    %9 = vector.broadcast %c0_i32_3 : i32 to vector<1x256xi32>
    %10 = arith.cmpi slt, %6, %9 : vector<1x256xi32>
    %c0_i32_4 = arith.constant 0 : i32
    %11 = arith.cmpi slt, %4, %c0_i32_4 : i32
    %12 = vector.broadcast %11 : i1 to vector<1x256xi1>
    %13 = vector.broadcast %12 : vector<1x256xi1> to vector<1x256xi1>
    %14 = arith.xori %10, %13 : vector<1x256xi1>
    %15 = arith.andi %14, %8 : vector<1x256xi1>
    %16 = vector.broadcast %4 : i32 to vector<1x256xi32>
    %17 = arith.addi %6, %16 : vector<1x256xi32>
    %18 = arith.select %15, %17, %6 : vector<1x256xi1>, vector<1x256xi32>
    %c0_i32_5 = arith.constant 0 : i32
    %19 = vector.broadcast %c0_i32_5 : i32 to vector<1x256xi32>
    %20 = arith.cmpi ne, %18, %19 : vector<1x256xi32>
    %c15_i32 = arith.constant 15 : i32
    %21 = vector.broadcast %c15_i32 : i32 to vector<1x256xi32>
    %22 = arith.cmpi ne, %18, %21 : vector<1x256xi32>
    %cst = arith.constant 0.000000e+00 : f32
    %23 = vector.broadcast %cst : f32 to vector<4x256xf32>
    %24 = vector.extract_strided_slice %1 {offsets = [0, 15], sizes = [8, 256], strides = [1, 1]} : vector<8x320xbf16> to vector<8x256xbf16>
    %cst_6 = arith.constant 0.000000e+00 : bf16
    %25 = vector.broadcast %cst_6 : bf16 to vector<8x256xbf16>
    %26 = vector.shape_cast %20 : vector<1x256xi1> to vector<1x256xi1>
    %27 = vector.broadcast %26 : vector<1x256xi1> to vector<8x256xi1>
    %28 = arith.select %27, %24, %25 : vector<8x256xi1>, vector<8x256xbf16>
    %c0_7 = arith.constant 0 : index
    %c0_8 = arith.constant 0 : index
    %c0_9 = arith.constant 0 : index
    %29 = vector.load %arg3[%c0_7, %c0_8, %c0_9] : memref<9x4x8xbf16, #tpu.memory_space<vmem>>, vector<1x4x8xbf16>
    %30 = vector.shape_cast %29 : vector<1x4x8xbf16> to vector<4x8xbf16>
    %cst_10 = arith.constant dense<0.000000e+00> : vector<4x256xf32>
    %31 = tpu.matmul %30, %28, %cst_10 {dimension_numbers = #tpu.dot_dimension_numbers<[1], [0], [0], [1], [0, 0, 1, 1], [], []>} : vector<4x8xbf16>, vector<8x256xbf16>, vector<4x256xf32> -> vector<4x256xf32>
    %32 = arith.addf %23, %31 : vector<4x256xf32>
    %33 = vector.extract_strided_slice %1 {offsets = [0, 16], sizes = [8, 256], strides = [1, 1]} : vector<8x320xbf16> to vector<8x256xbf16>
    %c1 = arith.constant 1 : index
    %c0_11 = arith.constant 0 : index
    %c0_12 = arith.constant 0 : index
    %34 = vector.load %arg3[%c1, %c0_11, %c0_12] : memref<9x4x8xbf16, #tpu.memory_space<vmem>>, vector<1x4x8xbf16>
    %35 = vector.shape_cast %34 : vector<1x4x8xbf16> to vector<4x8xbf16>
    %cst_13 = arith.constant dense<0.000000e+00> : vector<4x256xf32>
    %36 = tpu.matmul %35, %33, %cst_13 {dimension_numbers = #tpu.dot_dimension_numbers<[1], [0], [0], [1], [0, 0, 1, 1], [], []>} : vector<4x8xbf16>, vector<8x256xbf16>, vector<4x256xf32> -> vector<4x256xf32>
    %37 = arith.addf %32, %36 : vector<4x256xf32>
    %38 = vector.extract_strided_slice %1 {offsets = [0, 17], sizes = [8, 256], strides = [1, 1]} : vector<8x320xbf16> to vector<8x256xbf16>
    %cst_14 = arith.constant 0.000000e+00 : bf16
    %39 = vector.broadcast %cst_14 : bf16 to vector<8x256xbf16>
    %40 = vector.shape_cast %22 : vector<1x256xi1> to vector<1x256xi1>
    %41 = vector.broadcast %40 : vector<1x256xi1> to vector<8x256xi1>
    %42 = arith.select %41, %38, %39 : vector<8x256xi1>, vector<8x256xbf16>
    %c2 = arith.constant 2 : index
    %c0_15 = arith.constant 0 : index
    %c0_16 = arith.constant 0 : index
    %43 = vector.load %arg3[%c2, %c0_15, %c0_16] : memref<9x4x8xbf16, #tpu.memory_space<vmem>>, vector<1x4x8xbf16>
    %44 = vector.shape_cast %43 : vector<1x4x8xbf16> to vector<4x8xbf16>
    %cst_17 = arith.constant dense<0.000000e+00> : vector<4x256xf32>
    %45 = tpu.matmul %44, %42, %cst_17 {dimension_numbers = #tpu.dot_dimension_numbers<[1], [0], [0], [1], [0, 0, 1, 1], [], []>} : vector<4x8xbf16>, vector<8x256xbf16>, vector<4x256xf32> -> vector<4x256xf32>
    %46 = arith.addf %37, %45 : vector<4x256xf32>
    %47 = vector.extract_strided_slice %1 {offsets = [0, 31], sizes = [8, 256], strides = [1, 1]} : vector<8x320xbf16> to vector<8x256xbf16>
    %cst_18 = arith.constant 0.000000e+00 : bf16
    %48 = vector.broadcast %cst_18 : bf16 to vector<8x256xbf16>
    %49 = vector.shape_cast %20 : vector<1x256xi1> to vector<1x256xi1>
    %50 = vector.broadcast %49 : vector<1x256xi1> to vector<8x256xi1>
    %51 = arith.select %50, %47, %48 : vector<8x256xi1>, vector<8x256xbf16>
    %c3 = arith.constant 3 : index
    %c0_19 = arith.constant 0 : index
    %c0_20 = arith.constant 0 : index
    %52 = vector.load %arg3[%c3, %c0_19, %c0_20] : memref<9x4x8xbf16, #tpu.memory_space<vmem>>, vector<1x4x8xbf16>
    %53 = vector.shape_cast %52 : vector<1x4x8xbf16> to vector<4x8xbf16>
    %cst_21 = arith.constant dense<0.000000e+00> : vector<4x256xf32>
    %54 = tpu.matmul %53, %51, %cst_21 {dimension_numbers = #tpu.dot_dimension_numbers<[1], [0], [0], [1], [0, 0, 1, 1], [], []>} : vector<4x8xbf16>, vector<8x256xbf16>, vector<4x256xf32> -> vector<4x256xf32>
    %55 = arith.addf %46, %54 : vector<4x256xf32>
    %56 = vector.extract_strided_slice %1 {offsets = [0, 32], sizes = [8, 256], strides = [1, 1]} : vector<8x320xbf16> to vector<8x256xbf16>
    %c4 = arith.constant 4 : index
    %c0_22 = arith.constant 0 : index
    %c0_23 = arith.constant 0 : index
    %57 = vector.load %arg3[%c4, %c0_22, %c0_23] : memref<9x4x8xbf16, #tpu.memory_space<vmem>>, vector<1x4x8xbf16>
    %58 = vector.shape_cast %57 : vector<1x4x8xbf16> to vector<4x8xbf16>
    %cst_24 = arith.constant dense<0.000000e+00> : vector<4x256xf32>
    %59 = tpu.matmul %58, %56, %cst_24 {dimension_numbers = #tpu.dot_dimension_numbers<[1], [0], [0], [1], [0, 0, 1, 1], [], []>} : vector<4x8xbf16>, vector<8x256xbf16>, vector<4x256xf32> -> vector<4x256xf32>
    %60 = arith.addf %55, %59 : vector<4x256xf32>
    %61 = vector.extract_strided_slice %1 {offsets = [0, 33], sizes = [8, 256], strides = [1, 1]} : vector<8x320xbf16> to vector<8x256xbf16>
    %cst_25 = arith.constant 0.000000e+00 : bf16
    %62 = vector.broadcast %cst_25 : bf16 to vector<8x256xbf16>
    %63 = vector.shape_cast %22 : vector<1x256xi1> to vector<1x256xi1>
    %64 = vector.broadcast %63 : vector<1x256xi1> to vector<8x256xi1>
    %65 = arith.select %64, %61, %62 : vector<8x256xi1>, vector<8x256xbf16>
    %c5 = arith.constant 5 : index
    %c0_26 = arith.constant 0 : index
    %c0_27 = arith.constant 0 : index
    %66 = vector.load %arg3[%c5, %c0_26, %c0_27] : memref<9x4x8xbf16, #tpu.memory_space<vmem>>, vector<1x4x8xbf16>
    %67 = vector.shape_cast %66 : vector<1x4x8xbf16> to vector<4x8xbf16>
    %cst_28 = arith.constant dense<0.000000e+00> : vector<4x256xf32>
    %68 = tpu.matmul %67, %65, %cst_28 {dimension_numbers = #tpu.dot_dimension_numbers<[1], [0], [0], [1], [0, 0, 1, 1], [], []>} : vector<4x8xbf16>, vector<8x256xbf16>, vector<4x256xf32> -> vector<4x256xf32>
    %69 = arith.addf %60, %68 : vector<4x256xf32>
    %70 = vector.extract_strided_slice %1 {offsets = [0, 47], sizes = [8, 256], strides = [1, 1]} : vector<8x320xbf16> to vector<8x256xbf16>
    %cst_29 = arith.constant 0.000000e+00 : bf16
    %71 = vector.broadcast %cst_29 : bf16 to vector<8x256xbf16>
    %72 = vector.shape_cast %20 : vector<1x256xi1> to vector<1x256xi1>
    %73 = vector.broadcast %72 : vector<1x256xi1> to vector<8x256xi1>
    %74 = arith.select %73, %70, %71 : vector<8x256xi1>, vector<8x256xbf16>
    %c6 = arith.constant 6 : index
    %c0_30 = arith.constant 0 : index
    %c0_31 = arith.constant 0 : index
    %75 = vector.load %arg3[%c6, %c0_30, %c0_31] : memref<9x4x8xbf16, #tpu.memory_space<vmem>>, vector<1x4x8xbf16>
    %76 = vector.shape_cast %75 : vector<1x4x8xbf16> to vector<4x8xbf16>
    %cst_32 = arith.constant dense<0.000000e+00> : vector<4x256xf32>
    %77 = tpu.matmul %76, %74, %cst_32 {dimension_numbers = #tpu.dot_dimension_numbers<[1], [0], [0], [1], [0, 0, 1, 1], [], []>} : vector<4x8xbf16>, vector<8x256xbf16>, vector<4x256xf32> -> vector<4x256xf32>
    %78 = arith.addf %69, %77 : vector<4x256xf32>
    %79 = vector.extract_strided_slice %1 {offsets = [0, 48], sizes = [8, 256], strides = [1, 1]} : vector<8x320xbf16> to vector<8x256xbf16>
    %c7 = arith.constant 7 : index
    %c0_33 = arith.constant 0 : index
    %c0_34 = arith.constant 0 : index
    %80 = vector.load %arg3[%c7, %c0_33, %c0_34] : memref<9x4x8xbf16, #tpu.memory_space<vmem>>, vector<1x4x8xbf16>
    %81 = vector.shape_cast %80 : vector<1x4x8xbf16> to vector<4x8xbf16>
    %cst_35 = arith.constant dense<0.000000e+00> : vector<4x256xf32>
    %82 = tpu.matmul %81, %79, %cst_35 {dimension_numbers = #tpu.dot_dimension_numbers<[1], [0], [0], [1], [0, 0, 1, 1], [], []>} : vector<4x8xbf16>, vector<8x256xbf16>, vector<4x256xf32> -> vector<4x256xf32>
    %83 = arith.addf %78, %82 : vector<4x256xf32>
    %84 = vector.extract_strided_slice %1 {offsets = [0, 49], sizes = [8, 256], strides = [1, 1]} : vector<8x320xbf16> to vector<8x256xbf16>
    %cst_36 = arith.constant 0.000000e+00 : bf16
    %85 = vector.broadcast %cst_36 : bf16 to vector<8x256xbf16>
    %86 = vector.shape_cast %22 : vector<1x256xi1> to vector<1x256xi1>
    %87 = vector.broadcast %86 : vector<1x256xi1> to vector<8x256xi1>
    %88 = arith.select %87, %84, %85 : vector<8x256xi1>, vector<8x256xbf16>
    %c8 = arith.constant 8 : index
    %c0_37 = arith.constant 0 : index
    %c0_38 = arith.constant 0 : index
    %89 = vector.load %arg3[%c8, %c0_37, %c0_38] : memref<9x4x8xbf16, #tpu.memory_space<vmem>>, vector<1x4x8xbf16>
    %90 = vector.shape_cast %89 : vector<1x4x8xbf16> to vector<4x8xbf16>
    %cst_39 = arith.constant dense<0.000000e+00> : vector<4x256xf32>
    %91 = tpu.matmul %90, %88, %cst_39 {dimension_numbers = #tpu.dot_dimension_numbers<[1], [0], [0], [1], [0, 0, 1, 1], [], []>} : vector<4x8xbf16>, vector<8x256xbf16>, vector<4x256xf32> -> vector<4x256xf32>
    %92 = arith.addf %83, %91 : vector<4x256xf32>
    %c0_40 = arith.constant 0 : index
    %c0_41 = arith.constant 0 : index
    %93 = vector.load %arg4[%c0_40, %c0_41] : memref<4x1xf32, #tpu.memory_space<vmem>>, vector<4x1xf32>
    %94 = vector.broadcast %93 : vector<4x1xf32> to vector<4x256xf32>
    %95 = arith.mulf %92, %94 : vector<4x256xf32>
    %c0_42 = arith.constant 0 : index
    %c0_43 = arith.constant 0 : index
    %96 = vector.load %arg5[%c0_42, %c0_43] : memref<4x1xf32, #tpu.memory_space<vmem>>, vector<4x1xf32>
    %97 = vector.broadcast %96 : vector<4x1xf32> to vector<4x256xf32>
    %98 = arith.addf %95, %97 : vector<4x256xf32>
    %cst_44 = arith.constant 0.000000e+00 : f32
    %99 = vector.broadcast %cst_44 : f32 to vector<4x256xf32>
    %100 = arith.maximumf %98, %99 : vector<4x256xf32>
    %101 = arith.truncf %100 : vector<4x256xf32> to vector<4x256xbf16>
    %c0_45 = arith.constant 0 : index
    %c0_46 = arith.constant 0 : index
    %c0_47 = arith.constant 0 : index
    %102 = vector.load %arg6[%c0_45, %c0_46, %c0_47] : memref<1x4x256xbf16, #tpu.memory_space<vmem>>, vector<1x4x256xbf16>
    %103 = vector.shape_cast %102 : vector<1x4x256xbf16> to vector<4x256xbf16>
    %104 = vector.shape_cast %101 : vector<4x256xbf16> to vector<1x4x256xbf16>
    tpu.vector_store %arg6[%c0_45, %c0_46, %c0_47], %104 {strides = array<i32>} : memref<1x4x256xbf16, #tpu.memory_space<vmem>>, vector<1x4x256xbf16>,
    return
  }
  func.func @transform_0(%arg0: i32, %arg1: i32) -> (i32, i32, i32) {
    %c0_i32 = arith.constant 0 : i32
    %c0_i32_0 = arith.constant 0 : i32
    %c0_i32_1 = arith.constant 0 : i32
    return %arg0, %c0_i32, %c0_i32_0 : i32, i32, i32
  }
  func.func @transform_1(%arg0: i32, %arg1: i32) -> (i32, i32, i32) {
    %c0_i32 = arith.constant 0 : i32
    %c0_i32_0 = arith.constant 0 : i32
    %c0_i32_1 = arith.constant 0 : i32
    return %c0_i32, %arg1, %c0_i32_0 : i32, i32, i32
  }
  func.func @transform_2(%arg0: i32, %arg1: i32) -> (i32, i32) {
    %c0_i32 = arith.constant 0 : i32
    %c0_i32_0 = arith.constant 0 : i32
    return %arg1, %c0_i32 : i32, i32
  }
  func.func @transform_3(%arg0: i32, %arg1: i32) -> (i32, i32) {
    %c0_i32 = arith.constant 0 : i32
    %c0_i32_0 = arith.constant 0 : i32
    return %arg1, %c0_i32 : i32, i32
  }
  func.func @transform_4(%arg0: i32, %arg1: i32) -> (i32, i32, i32) {
    %c0_i32 = arith.constant 0 : i32
    %c0_i32_0 = arith.constant 0 : i32
    return %arg0, %arg1, %c0_i32 : i32, i32, i32
  }
}

module attributes {stable_mosaic.version = 11 : i64} {
  func.func @_conv_bn_relu_kernel(%arg0: i32, %arg1: i32, %arg2: memref<1x32x96xbf16, #tpu.memory_space<vmem>>, %arg3: memref<9x16x32xbf16, #tpu.memory_space<vmem>>, %arg4: memref<16x1xf32, #tpu.memory_space<vmem>>, %arg5: memref<16x1xf32, #tpu.memory_space<vmem>>, %arg6: memref<1x16x64xbf16, #tpu.memory_space<vmem>>) attributes {dimension_semantics = [#tpu.dimension_semantics<parallel>, #tpu.dimension_semantics<parallel>], iteration_bounds = array<i64: 2, 1>, scalar_prefetch = 0 : i64, scratch_operands = 0 : i64, tpu.core_type = #tpu.core_type<tc>, window_params = [{transform_indices = @transform_0, window_bounds = array<i64: 1, 32, 96>}, {transform_indices = @transform_1, window_bounds = array<i64: 9, 16, 32>}, {transform_indices = @transform_2, window_bounds = array<i64: 16, 1>}, {transform_indices = @transform_3, window_bounds = array<i64: 16, 1>}, {transform_indices = @transform_4, window_bounds = array<i64: 1, 16, 64>}]} {
    %c0 = arith.constant 0 : index
    %c0_0 = arith.constant 0 : index
    %c0_1 = arith.constant 0 : index
    %0 = vector.load %arg2[%c0, %c0_0, %c0_1] : memref<1x32x96xbf16, #tpu.memory_space<vmem>>, vector<1x32x96xbf16>
    %1 = vector.shape_cast %0 : vector<1x32x96xbf16> to vector<32x96xbf16>
    %2 = tpu.iota {dimensions = array<i32: 1>} : vector<1x64xi32>
    %c8_i32 = arith.constant 8 : i32
    %c0_i32 = arith.constant 0 : i32
    %3 = arith.cmpi eq, %c8_i32, %c0_i32 : i32
    %c1_i32 = arith.constant 1 : i32
    %4 = arith.select %3, %c1_i32, %c8_i32 : i32
    %5 = vector.broadcast %4 : i32 to vector<1x64xi32>
    %6 = arith.remsi %2, %5 : vector<1x64xi32>
    %c0_i32_2 = arith.constant 0 : i32
    %7 = vector.broadcast %c0_i32_2 : i32 to vector<1x64xi32>
    %8 = arith.cmpi ne, %6, %7 : vector<1x64xi32>
    %c0_i32_3 = arith.constant 0 : i32
    %9 = vector.broadcast %c0_i32_3 : i32 to vector<1x64xi32>
    %10 = arith.cmpi slt, %6, %9 : vector<1x64xi32>
    %c0_i32_4 = arith.constant 0 : i32
    %11 = arith.cmpi slt, %4, %c0_i32_4 : i32
    %12 = vector.broadcast %11 : i1 to vector<1x64xi1>
    %13 = vector.broadcast %12 : vector<1x64xi1> to vector<1x64xi1>
    %14 = arith.xori %10, %13 : vector<1x64xi1>
    %15 = arith.andi %14, %8 : vector<1x64xi1>
    %16 = vector.broadcast %4 : i32 to vector<1x64xi32>
    %17 = arith.addi %6, %16 : vector<1x64xi32>
    %18 = arith.select %15, %17, %6 : vector<1x64xi1>, vector<1x64xi32>
    %c0_i32_5 = arith.constant 0 : i32
    %19 = vector.broadcast %c0_i32_5 : i32 to vector<1x64xi32>
    %20 = arith.cmpi ne, %18, %19 : vector<1x64xi32>
    %c7_i32 = arith.constant 7 : i32
    %21 = vector.broadcast %c7_i32 : i32 to vector<1x64xi32>
    %22 = arith.cmpi ne, %18, %21 : vector<1x64xi32>
    %cst = arith.constant 0.000000e+00 : f32
    %23 = vector.broadcast %cst : f32 to vector<16x64xf32>
    %24 = vector.extract_strided_slice %1 {offsets = [0, 7], sizes = [32, 64], strides = [1, 1]} : vector<32x96xbf16> to vector<32x64xbf16>
    %cst_6 = arith.constant 0.000000e+00 : bf16
    %25 = vector.broadcast %cst_6 : bf16 to vector<32x64xbf16>
    %26 = vector.shape_cast %20 : vector<1x64xi1> to vector<1x64xi1>
    %27 = vector.broadcast %26 : vector<1x64xi1> to vector<32x64xi1>
    %28 = arith.select %27, %24, %25 : vector<32x64xi1>, vector<32x64xbf16>
    %c0_7 = arith.constant 0 : index
    %c0_8 = arith.constant 0 : index
    %c0_9 = arith.constant 0 : index
    %29 = vector.load %arg3[%c0_7, %c0_8, %c0_9] : memref<9x16x32xbf16, #tpu.memory_space<vmem>>, vector<1x16x32xbf16>
    %30 = vector.shape_cast %29 : vector<1x16x32xbf16> to vector<16x32xbf16>
    %cst_10 = arith.constant dense<0.000000e+00> : vector<16x64xf32>
    %31 = tpu.matmul %30, %28, %cst_10 {dimension_numbers = #tpu.dot_dimension_numbers<[1], [0], [0], [1], [0, 0, 1, 1], [], []>} : vector<16x32xbf16>, vector<32x64xbf16>, vector<16x64xf32> -> vector<16x64xf32>
    %32 = arith.addf %23, %31 : vector<16x64xf32>
    %33 = vector.extract_strided_slice %1 {offsets = [0, 8], sizes = [32, 64], strides = [1, 1]} : vector<32x96xbf16> to vector<32x64xbf16>
    %c1 = arith.constant 1 : index
    %c0_11 = arith.constant 0 : index
    %c0_12 = arith.constant 0 : index
    %34 = vector.load %arg3[%c1, %c0_11, %c0_12] : memref<9x16x32xbf16, #tpu.memory_space<vmem>>, vector<1x16x32xbf16>
    %35 = vector.shape_cast %34 : vector<1x16x32xbf16> to vector<16x32xbf16>
    %cst_13 = arith.constant dense<0.000000e+00> : vector<16x64xf32>
    %36 = tpu.matmul %35, %33, %cst_13 {dimension_numbers = #tpu.dot_dimension_numbers<[1], [0], [0], [1], [0, 0, 1, 1], [], []>} : vector<16x32xbf16>, vector<32x64xbf16>, vector<16x64xf32> -> vector<16x64xf32>
    %37 = arith.addf %32, %36 : vector<16x64xf32>
    %38 = vector.extract_strided_slice %1 {offsets = [0, 9], sizes = [32, 64], strides = [1, 1]} : vector<32x96xbf16> to vector<32x64xbf16>
    %cst_14 = arith.constant 0.000000e+00 : bf16
    %39 = vector.broadcast %cst_14 : bf16 to vector<32x64xbf16>
    %40 = vector.shape_cast %22 : vector<1x64xi1> to vector<1x64xi1>
    %41 = vector.broadcast %40 : vector<1x64xi1> to vector<32x64xi1>
    %42 = arith.select %41, %38, %39 : vector<32x64xi1>, vector<32x64xbf16>
    %c2 = arith.constant 2 : index
    %c0_15 = arith.constant 0 : index
    %c0_16 = arith.constant 0 : index
    %43 = vector.load %arg3[%c2, %c0_15, %c0_16] : memref<9x16x32xbf16, #tpu.memory_space<vmem>>, vector<1x16x32xbf16>
    %44 = vector.shape_cast %43 : vector<1x16x32xbf16> to vector<16x32xbf16>
    %cst_17 = arith.constant dense<0.000000e+00> : vector<16x64xf32>
    %45 = tpu.matmul %44, %42, %cst_17 {dimension_numbers = #tpu.dot_dimension_numbers<[1], [0], [0], [1], [0, 0, 1, 1], [], []>} : vector<16x32xbf16>, vector<32x64xbf16>, vector<16x64xf32> -> vector<16x64xf32>
    %46 = arith.addf %37, %45 : vector<16x64xf32>
    %47 = vector.extract_strided_slice %1 {offsets = [0, 15], sizes = [32, 64], strides = [1, 1]} : vector<32x96xbf16> to vector<32x64xbf16>
    %cst_18 = arith.constant 0.000000e+00 : bf16
    %48 = vector.broadcast %cst_18 : bf16 to vector<32x64xbf16>
    %49 = vector.shape_cast %20 : vector<1x64xi1> to vector<1x64xi1>
    %50 = vector.broadcast %49 : vector<1x64xi1> to vector<32x64xi1>
    %51 = arith.select %50, %47, %48 : vector<32x64xi1>, vector<32x64xbf16>
    %c3 = arith.constant 3 : index
    %c0_19 = arith.constant 0 : index
    %c0_20 = arith.constant 0 : index
    %52 = vector.load %arg3[%c3, %c0_19, %c0_20] : memref<9x16x32xbf16, #tpu.memory_space<vmem>>, vector<1x16x32xbf16>
    %53 = vector.shape_cast %52 : vector<1x16x32xbf16> to vector<16x32xbf16>
    %cst_21 = arith.constant dense<0.000000e+00> : vector<16x64xf32>
    %54 = tpu.matmul %53, %51, %cst_21 {dimension_numbers = #tpu.dot_dimension_numbers<[1], [0], [0], [1], [0, 0, 1, 1], [], []>} : vector<16x32xbf16>, vector<32x64xbf16>, vector<16x64xf32> -> vector<16x64xf32>
    %55 = arith.addf %46, %54 : vector<16x64xf32>
    %56 = vector.extract_strided_slice %1 {offsets = [0, 16], sizes = [32, 64], strides = [1, 1]} : vector<32x96xbf16> to vector<32x64xbf16>
    %c4 = arith.constant 4 : index
    %c0_22 = arith.constant 0 : index
    %c0_23 = arith.constant 0 : index
    %57 = vector.load %arg3[%c4, %c0_22, %c0_23] : memref<9x16x32xbf16, #tpu.memory_space<vmem>>, vector<1x16x32xbf16>
    %58 = vector.shape_cast %57 : vector<1x16x32xbf16> to vector<16x32xbf16>
    %cst_24 = arith.constant dense<0.000000e+00> : vector<16x64xf32>
    %59 = tpu.matmul %58, %56, %cst_24 {dimension_numbers = #tpu.dot_dimension_numbers<[1], [0], [0], [1], [0, 0, 1, 1], [], []>} : vector<16x32xbf16>, vector<32x64xbf16>, vector<16x64xf32> -> vector<16x64xf32>
    %60 = arith.addf %55, %59 : vector<16x64xf32>
    %61 = vector.extract_strided_slice %1 {offsets = [0, 17], sizes = [32, 64], strides = [1, 1]} : vector<32x96xbf16> to vector<32x64xbf16>
    %cst_25 = arith.constant 0.000000e+00 : bf16
    %62 = vector.broadcast %cst_25 : bf16 to vector<32x64xbf16>
    %63 = vector.shape_cast %22 : vector<1x64xi1> to vector<1x64xi1>
    %64 = vector.broadcast %63 : vector<1x64xi1> to vector<32x64xi1>
    %65 = arith.select %64, %61, %62 : vector<32x64xi1>, vector<32x64xbf16>
    %c5 = arith.constant 5 : index
    %c0_26 = arith.constant 0 : index
    %c0_27 = arith.constant 0 : index
    %66 = vector.load %arg3[%c5, %c0_26, %c0_27] : memref<9x16x32xbf16, #tpu.memory_space<vmem>>, vector<1x16x32xbf16>
    %67 = vector.shape_cast %66 : vector<1x16x32xbf16> to vector<16x32xbf16>
    %cst_28 = arith.constant dense<0.000000e+00> : vector<16x64xf32>
    %68 = tpu.matmul %67, %65, %cst_28 {dimension_numbers = #tpu.dot_dimension_numbers<[1], [0], [0], [1], [0, 0, 1, 1], [], []>} : vector<16x32xbf16>, vector<32x64xbf16>, vector<16x64xf32> -> vector<16x64xf32>
    %69 = arith.addf %60, %68 : vector<16x64xf32>
    %70 = vector.extract_strided_slice %1 {offsets = [0, 23], sizes = [32, 64], strides = [1, 1]} : vector<32x96xbf16> to vector<32x64xbf16>
    %cst_29 = arith.constant 0.000000e+00 : bf16
    %71 = vector.broadcast %cst_29 : bf16 to vector<32x64xbf16>
    %72 = vector.shape_cast %20 : vector<1x64xi1> to vector<1x64xi1>
    %73 = vector.broadcast %72 : vector<1x64xi1> to vector<32x64xi1>
    %74 = arith.select %73, %70, %71 : vector<32x64xi1>, vector<32x64xbf16>
    %c6 = arith.constant 6 : index
    %c0_30 = arith.constant 0 : index
    %c0_31 = arith.constant 0 : index
    %75 = vector.load %arg3[%c6, %c0_30, %c0_31] : memref<9x16x32xbf16, #tpu.memory_space<vmem>>, vector<1x16x32xbf16>
    %76 = vector.shape_cast %75 : vector<1x16x32xbf16> to vector<16x32xbf16>
    %cst_32 = arith.constant dense<0.000000e+00> : vector<16x64xf32>
    %77 = tpu.matmul %76, %74, %cst_32 {dimension_numbers = #tpu.dot_dimension_numbers<[1], [0], [0], [1], [0, 0, 1, 1], [], []>} : vector<16x32xbf16>, vector<32x64xbf16>, vector<16x64xf32> -> vector<16x64xf32>
    %78 = arith.addf %69, %77 : vector<16x64xf32>
    %79 = vector.extract_strided_slice %1 {offsets = [0, 24], sizes = [32, 64], strides = [1, 1]} : vector<32x96xbf16> to vector<32x64xbf16>
    %c7 = arith.constant 7 : index
    %c0_33 = arith.constant 0 : index
    %c0_34 = arith.constant 0 : index
    %80 = vector.load %arg3[%c7, %c0_33, %c0_34] : memref<9x16x32xbf16, #tpu.memory_space<vmem>>, vector<1x16x32xbf16>
    %81 = vector.shape_cast %80 : vector<1x16x32xbf16> to vector<16x32xbf16>
    %cst_35 = arith.constant dense<0.000000e+00> : vector<16x64xf32>
    %82 = tpu.matmul %81, %79, %cst_35 {dimension_numbers = #tpu.dot_dimension_numbers<[1], [0], [0], [1], [0, 0, 1, 1], [], []>} : vector<16x32xbf16>, vector<32x64xbf16>, vector<16x64xf32> -> vector<16x64xf32>
    %83 = arith.addf %78, %82 : vector<16x64xf32>
    %84 = vector.extract_strided_slice %1 {offsets = [0, 25], sizes = [32, 64], strides = [1, 1]} : vector<32x96xbf16> to vector<32x64xbf16>
    %cst_36 = arith.constant 0.000000e+00 : bf16
    %85 = vector.broadcast %cst_36 : bf16 to vector<32x64xbf16>
    %86 = vector.shape_cast %22 : vector<1x64xi1> to vector<1x64xi1>
    %87 = vector.broadcast %86 : vector<1x64xi1> to vector<32x64xi1>
    %88 = arith.select %87, %84, %85 : vector<32x64xi1>, vector<32x64xbf16>
    %c8 = arith.constant 8 : index
    %c0_37 = arith.constant 0 : index
    %c0_38 = arith.constant 0 : index
    %89 = vector.load %arg3[%c8, %c0_37, %c0_38] : memref<9x16x32xbf16, #tpu.memory_space<vmem>>, vector<1x16x32xbf16>
    %90 = vector.shape_cast %89 : vector<1x16x32xbf16> to vector<16x32xbf16>
    %cst_39 = arith.constant dense<0.000000e+00> : vector<16x64xf32>
    %91 = tpu.matmul %90, %88, %cst_39 {dimension_numbers = #tpu.dot_dimension_numbers<[1], [0], [0], [1], [0, 0, 1, 1], [], []>} : vector<16x32xbf16>, vector<32x64xbf16>, vector<16x64xf32> -> vector<16x64xf32>
    %92 = arith.addf %83, %91 : vector<16x64xf32>
    %c0_40 = arith.constant 0 : index
    %c0_41 = arith.constant 0 : index
    %93 = vector.load %arg4[%c0_40, %c0_41] : memref<16x1xf32, #tpu.memory_space<vmem>>, vector<16x1xf32>
    %94 = vector.broadcast %93 : vector<16x1xf32> to vector<16x64xf32>
    %95 = arith.mulf %92, %94 : vector<16x64xf32>
    %c0_42 = arith.constant 0 : index
    %c0_43 = arith.constant 0 : index
    %96 = vector.load %arg5[%c0_42, %c0_43] : memref<16x1xf32, #tpu.memory_space<vmem>>, vector<16x1xf32>
    %97 = vector.broadcast %96 : vector<16x1xf32> to vector<16x64xf32>
    %98 = arith.addf %95, %97 : vector<16x64xf32>
    %cst_44 = arith.constant 0.000000e+00 : f32
    %99 = vector.broadcast %cst_44 : f32 to vector<16x64xf32>
    %100 = arith.maximumf %98, %99 : vector<16x64xf32>
    %101 = arith.truncf %100 : vector<16x64xf32> to vector<16x64xbf16>
    %c0_45 = arith.constant 0 : index
    %c0_46 = arith.constant 0 : index
    %c0_47 = arith.constant 0 : index
    %102 = vector.load %arg6[%c0_45, %c0_46, %c0_47] : memref<1x16x64xbf16, #tpu.memory_space<vmem>>, vector<1x16x64xbf16>
    %103 = vector.shape_cast %102 : vector<1x16x64xbf16> to vector<16x64xbf16>
    %104 = vector.shape_cast %101 : vector<16x64xbf16> to vector<1x16x64xbf16>
    tpu.vector_store %arg6[%c0_45, %c0_46, %c0_47], %104 {strides = array<i32>} : memref<1x16x64xbf16, #tpu.memory_space<vmem>>, vector<1x16x64xbf16>,
    return
  }
  func.func @transform_0(%arg0: i32, %arg1: i32) -> (i32, i32, i32) {
    %c0_i32 = arith.constant 0 : i32
    %c0_i32_0 = arith.constant 0 : i32
    %c0_i32_1 = arith.constant 0 : i32
    return %arg0, %c0_i32, %c0_i32_0 : i32, i32, i32
  }
  func.func @transform_1(%arg0: i32, %arg1: i32) -> (i32, i32, i32) {
    %c0_i32 = arith.constant 0 : i32
    %c0_i32_0 = arith.constant 0 : i32
    %c0_i32_1 = arith.constant 0 : i32
    return %c0_i32, %arg1, %c0_i32_0 : i32, i32, i32
  }
  func.func @transform_2(%arg0: i32, %arg1: i32) -> (i32, i32) {
    %c0_i32 = arith.constant 0 : i32
    %c0_i32_0 = arith.constant 0 : i32
    return %arg1, %c0_i32 : i32, i32
  }
  func.func @transform_3(%arg0: i32, %arg1: i32) -> (i32, i32) {
    %c0_i32 = arith.constant 0 : i32
    %c0_i32_0 = arith.constant 0 : i32
    return %arg1, %c0_i32 : i32, i32
  }
  func.func @transform_4(%arg0: i32, %arg1: i32) -> (i32, i32, i32) {
    %c0_i32 = arith.constant 0 : i32
    %c0_i32_0 = arith.constant 0 : i32
    return %arg0, %arg1, %c0_i32 : i32, i32, i32
  }
}

module attributes {stable_mosaic.version = 11 : i64} {
  func.func @_kv_proj_kernel(%arg0: i32, %arg1: i32, %arg2: memref<1x4x256xbf16, #tpu.memory_space<vmem>>, %arg3: memref<16x4xbf16, #tpu.memory_space<vmem>>, %arg4: memref<16x1xf32, #tpu.memory_space<vmem>>, %arg5: memref<1x8x256xbf16, #tpu.memory_space<vmem>>, %arg6: memref<1x256x8xbf16, #tpu.memory_space<vmem>>) attributes {dimension_semantics = [#tpu.dimension_semantics<parallel>, #tpu.dimension_semantics<parallel>], iteration_bounds = array<i64: 2, 1>, scalar_prefetch = 0 : i64, scratch_operands = 0 : i64, tpu.core_type = #tpu.core_type<tc>, window_params = [{transform_indices = @transform_0, window_bounds = array<i64: 1, 4, 256>}, {pipeline_mode = #tpu.pipeline_mode<synchronous>, transform_indices = @transform_1, window_bounds = array<i64: 16, 4>}, {pipeline_mode = #tpu.pipeline_mode<synchronous>, transform_indices = @transform_2, window_bounds = array<i64: 16, 1>}, {transform_indices = @transform_3, window_bounds = array<i64: 1, 8, 256>}, {transform_indices = @transform_4, window_bounds = array<i64: 1, 256, 8>}]} {
    %c0 = arith.constant 0 : index
    %c0_0 = arith.constant 0 : index
    %c0_1 = arith.constant 0 : index
    %0 = vector.load %arg2[%c0, %c0_0, %c0_1] : memref<1x4x256xbf16, #tpu.memory_space<vmem>>, vector<1x4x256xbf16>
    %1 = vector.shape_cast %0 : vector<1x4x256xbf16> to vector<4x256xbf16>
    %c0_2 = arith.constant 0 : index
    %c0_3 = arith.constant 0 : index
    %2 = vector.load %arg3[%c0_2, %c0_3] : memref<16x4xbf16, #tpu.memory_space<vmem>>, vector<16x4xbf16>
    %cst = arith.constant dense<0.000000e+00> : vector<16x256xf32>
    %3 = tpu.matmul %2, %1, %cst {dimension_numbers = #tpu.dot_dimension_numbers<[1], [0], [0], [1], [0, 0, 1, 1], [], []>} : vector<16x4xbf16>, vector<4x256xbf16>, vector<16x256xf32> -> vector<16x256xf32>
    %c0_4 = arith.constant 0 : index
    %c0_5 = arith.constant 0 : index
    %4 = vector.load %arg4[%c0_4, %c0_5] : memref<16x1xf32, #tpu.memory_space<vmem>>, vector<16x1xf32>
    %5 = vector.broadcast %4 : vector<16x1xf32> to vector<16x256xf32>
    %6 = arith.addf %3, %5 : vector<16x256xf32>
    %7 = vector.extract_strided_slice %6 {offsets = [0, 0], sizes = [8, 256], strides = [1, 1]} : vector<16x256xf32> to vector<8x256xf32>
    %8 = arith.truncf %7 : vector<8x256xf32> to vector<8x256xbf16>
    %c0_6 = arith.constant 0 : index
    %c0_7 = arith.constant 0 : index
    %c0_8 = arith.constant 0 : index
    %9 = vector.load %arg5[%c0_6, %c0_7, %c0_8] : memref<1x8x256xbf16, #tpu.memory_space<vmem>>, vector<1x8x256xbf16>
    %10 = vector.shape_cast %9 : vector<1x8x256xbf16> to vector<8x256xbf16>
    %11 = vector.shape_cast %8 : vector<8x256xbf16> to vector<1x8x256xbf16>
    tpu.vector_store %arg5[%c0_6, %c0_7, %c0_8], %11 {strides = array<i32>} : memref<1x8x256xbf16, #tpu.memory_space<vmem>>, vector<1x8x256xbf16>,
    %12 = vector.extract_strided_slice %6 {offsets = [8, 0], sizes = [8, 256], strides = [1, 1]} : vector<16x256xf32> to vector<8x256xf32>
    %13 = tpu.transpose %12, [1, 0] : vector<8x256xf32> -> vector<256x8xf32>
    %14 = arith.truncf %13 : vector<256x8xf32> to vector<256x8xbf16>
    %c0_9 = arith.constant 0 : index
    %c0_10 = arith.constant 0 : index
    %c0_11 = arith.constant 0 : index
    %15 = vector.load %arg6[%c0_9, %c0_10, %c0_11] : memref<1x256x8xbf16, #tpu.memory_space<vmem>>, vector<1x256x8xbf16>
    %16 = vector.shape_cast %15 : vector<1x256x8xbf16> to vector<256x8xbf16>
    %17 = vector.shape_cast %14 : vector<256x8xbf16> to vector<1x256x8xbf16>
    tpu.vector_store %arg6[%c0_9, %c0_10, %c0_11], %17 {strides = array<i32>} : memref<1x256x8xbf16, #tpu.memory_space<vmem>>, vector<1x256x8xbf16>,
    return
  }
  func.func @transform_0(%arg0: i32, %arg1: i32) -> (i32, i32, i32) {
    %c0_i32 = arith.constant 0 : i32
    %c0_i32_0 = arith.constant 0 : i32
    return %arg0, %c0_i32, %arg1 : i32, i32, i32
  }
  func.func @transform_1(%arg0: i32, %arg1: i32) -> (i32, i32) {
    %c0_i32 = arith.constant 0 : i32
    %c0_i32_0 = arith.constant 0 : i32
    %c0_i32_1 = arith.constant 0 : i32
    return %c0_i32, %c0_i32_0 : i32, i32
  }
  func.func @transform_2(%arg0: i32, %arg1: i32) -> (i32, i32) {
    %c0_i32 = arith.constant 0 : i32
    %c0_i32_0 = arith.constant 0 : i32
    %c0_i32_1 = arith.constant 0 : i32
    return %c0_i32, %c0_i32_0 : i32, i32
  }
  func.func @transform_3(%arg0: i32, %arg1: i32) -> (i32, i32, i32) {
    %c0_i32 = arith.constant 0 : i32
    %c0_i32_0 = arith.constant 0 : i32
    return %arg0, %c0_i32, %arg1 : i32, i32, i32
  }
  func.func @transform_4(%arg0: i32, %arg1: i32) -> (i32, i32, i32) {
    %c0_i32 = arith.constant 0 : i32
    %c0_i32_0 = arith.constant 0 : i32
    return %arg0, %arg1, %c0_i32 : i32, i32, i32
  }
}

module attributes {stable_mosaic.version = 11 : i64} {
  func.func @_attention_kernel(%arg0: i32, %arg1: i32, %arg2: memref<1x4x128xbf16, #tpu.memory_space<vmem>>, %arg3: memref<8x4xbf16, #tpu.memory_space<vmem>>, %arg4: memref<8x1xf32, #tpu.memory_space<vmem>>, %arg5: memref<1x8x256xbf16, #tpu.memory_space<vmem>>, %arg6: memref<1x256x8xbf16, #tpu.memory_space<vmem>>, %arg7: memref<1x4x128xbf16, #tpu.memory_space<vmem>>) attributes {dimension_semantics = [#tpu.dimension_semantics<parallel>, #tpu.dimension_semantics<parallel>], iteration_bounds = array<i64: 2, 2>, scalar_prefetch = 0 : i64, scratch_operands = 0 : i64, tpu.core_type = #tpu.core_type<tc>, window_params = [{transform_indices = @transform_0, window_bounds = array<i64: 1, 4, 128>}, {pipeline_mode = #tpu.pipeline_mode<synchronous>, transform_indices = @transform_1, window_bounds = array<i64: 8, 4>}, {pipeline_mode = #tpu.pipeline_mode<synchronous>, transform_indices = @transform_2, window_bounds = array<i64: 8, 1>}, {transform_indices = @transform_3, window_bounds = array<i64: 1, 8, 256>}, {transform_indices = @transform_4, window_bounds = array<i64: 1, 256, 8>}, {transform_indices = @transform_5, window_bounds = array<i64: 1, 4, 128>}]} {
    %c0 = arith.constant 0 : index
    %c0_0 = arith.constant 0 : index
    %c0_1 = arith.constant 0 : index
    %0 = vector.load %arg2[%c0, %c0_0, %c0_1] : memref<1x4x128xbf16, #tpu.memory_space<vmem>>, vector<1x4x128xbf16>
    %1 = vector.shape_cast %0 : vector<1x4x128xbf16> to vector<4x128xbf16>
    %c0_2 = arith.constant 0 : index
    %c0_3 = arith.constant 0 : index
    %2 = vector.load %arg3[%c0_2, %c0_3] : memref<8x4xbf16, #tpu.memory_space<vmem>>, vector<8x4xbf16>
    %cst = arith.constant dense<0.000000e+00> : vector<8x128xf32>
    %3 = tpu.matmul %2, %1, %cst {dimension_numbers = #tpu.dot_dimension_numbers<[1], [0], [0], [1], [0, 0, 1, 1], [], []>} : vector<8x4xbf16>, vector<4x128xbf16>, vector<8x128xf32> -> vector<8x128xf32>
    %c0_4 = arith.constant 0 : index
    %c0_5 = arith.constant 0 : index
    %4 = vector.load %arg4[%c0_4, %c0_5] : memref<8x1xf32, #tpu.memory_space<vmem>>, vector<8x1xf32>
    %5 = vector.broadcast %4 : vector<8x1xf32> to vector<8x128xf32>
    %6 = arith.addf %3, %5 : vector<8x128xf32>
    %c0_6 = arith.constant 0 : index
    %c0_7 = arith.constant 0 : index
    %c0_8 = arith.constant 0 : index
    %7 = vector.load %arg5[%c0_6, %c0_7, %c0_8] : memref<1x8x256xbf16, #tpu.memory_space<vmem>>, vector<1x8x256xbf16>
    %8 = vector.shape_cast %7 : vector<1x8x256xbf16> to vector<8x256xbf16>
    %9 = arith.truncf %6 : vector<8x128xf32> to vector<8x128xbf16>
    %cst_9 = arith.constant dense<0.000000e+00> : vector<128x256xf32>
    %10 = tpu.matmul %9, %8, %cst_9 {dimension_numbers = #tpu.dot_dimension_numbers<[0], [0], [1], [1], [0, 1, 1, 1], [], []>} : vector<8x128xbf16>, vector<8x256xbf16>, vector<128x256xf32> -> vector<128x256xf32>
    %cst_10 = arith.constant dense<0xFF800000> : vector<128xf32>
    %11 = vector.multi_reduction <maximumf>, %10, %cst_10 [1] : vector<128x256xf32> to vector<128xf32>
    %12 = vector.shape_cast %11 : vector<128xf32> to vector<128x1xf32>
    %13 = vector.broadcast %12 : vector<128x1xf32> to vector<128x256xf32>
    %14 = arith.subf %10, %13 : vector<128x256xf32>
    %15 = arith.truncf %14 : vector<128x256xf32> to vector<128x256xbf16>
    %16 = math.exp %15 : vector<128x256xbf16>
    %17 = arith.extf %16 : vector<128x256xbf16> to vector<128x256xf32>
    %cst_11 = arith.constant dense<0.000000e+00> : vector<128xf32>
    %18 = vector.multi_reduction <add>, %17, %cst_11 [1] : vector<128x256xf32> to vector<128xf32>
    %19 = vector.shape_cast %18 : vector<128xf32> to vector<128x1xf32>
    %c0_12 = arith.constant 0 : index
    %c0_13 = arith.constant 0 : index
    %c0_14 = arith.constant 0 : index
    %20 = vector.load %arg6[%c0_12, %c0_13, %c0_14] : memref<1x256x8xbf16, #tpu.memory_space<vmem>>, vector<1x256x8xbf16>
    %21 = vector.shape_cast %20 : vector<1x256x8xbf16> to vector<256x8xbf16>
    %cst_15 = arith.constant dense<0.000000e+00> : vector<128x8xf32>
    %22 = tpu.matmul %16, %21, %cst_15 {dimension_numbers = #tpu.dot_dimension_numbers<[1], [0], [0], [1], [0, 0, 1, 1], [], []>} : vector<128x256xbf16>, vector<256x8xbf16>, vector<128x8xf32> -> vector<128x8xf32>
    %23 = tpu.reciprocal %19 {approx = true} : vector<128x1xf32> -> vector<128x1xf32>
    %24 = vector.broadcast %23 : vector<128x1xf32> to vector<128x8xf32>
    %25 = arith.mulf %22, %24 : vector<128x8xf32>
    %26 = tpu.transpose %25, [1, 0] : vector<128x8xf32> -> vector<8x128xf32>
    %27 = vector.extract_strided_slice %26 {offsets = [0, 0], sizes = [4, 128], strides = [1, 1]} : vector<8x128xf32> to vector<4x128xf32>
    %28 = arith.truncf %27 : vector<4x128xf32> to vector<4x128xbf16>
    %c0_16 = arith.constant 0 : index
    %c0_17 = arith.constant 0 : index
    %c0_18 = arith.constant 0 : index
    %29 = vector.load %arg7[%c0_16, %c0_17, %c0_18] : memref<1x4x128xbf16, #tpu.memory_space<vmem>>, vector<1x4x128xbf16>
    %30 = vector.shape_cast %29 : vector<1x4x128xbf16> to vector<4x128xbf16>
    %31 = vector.shape_cast %28 : vector<4x128xbf16> to vector<1x4x128xbf16>
    tpu.vector_store %arg7[%c0_16, %c0_17, %c0_18], %31 {strides = array<i32>} : memref<1x4x128xbf16, #tpu.memory_space<vmem>>, vector<1x4x128xbf16>,
    return
  }
  func.func @transform_0(%arg0: i32, %arg1: i32) -> (i32, i32, i32) {
    %c0_i32 = arith.constant 0 : i32
    %c0_i32_0 = arith.constant 0 : i32
    return %arg0, %c0_i32, %arg1 : i32, i32, i32
  }
  func.func @transform_1(%arg0: i32, %arg1: i32) -> (i32, i32) {
    %c0_i32 = arith.constant 0 : i32
    %c0_i32_0 = arith.constant 0 : i32
    %c0_i32_1 = arith.constant 0 : i32
    return %c0_i32, %c0_i32_0 : i32, i32
  }
  func.func @transform_2(%arg0: i32, %arg1: i32) -> (i32, i32) {
    %c0_i32 = arith.constant 0 : i32
    %c0_i32_0 = arith.constant 0 : i32
    %c0_i32_1 = arith.constant 0 : i32
    return %c0_i32, %c0_i32_0 : i32, i32
  }
  func.func @transform_3(%arg0: i32, %arg1: i32) -> (i32, i32, i32) {
    %c0_i32 = arith.constant 0 : i32
    %c0_i32_0 = arith.constant 0 : i32
    %c0_i32_1 = arith.constant 0 : i32
    return %arg0, %c0_i32, %c0_i32_0 : i32, i32, i32
  }
  func.func @transform_4(%arg0: i32, %arg1: i32) -> (i32, i32, i32) {
    %c0_i32 = arith.constant 0 : i32
    %c0_i32_0 = arith.constant 0 : i32
    %c0_i32_1 = arith.constant 0 : i32
    return %arg0, %c0_i32, %c0_i32_0 : i32, i32, i32
  }
  func.func @transform_5(%arg0: i32, %arg1: i32) -> (i32, i32, i32) {
    %c0_i32 = arith.constant 0 : i32
    %c0_i32_0 = arith.constant 0 : i32
    return %arg0, %c0_i32, %arg1 : i32, i32, i32
  }
}

module attributes {stable_mosaic.version = 11 : i64} {
  func.func @_conv_bn_relu_kernel(%arg0: i32, %arg1: i32, %arg2: memref<1x8x320xbf16, #tpu.memory_space<vmem>>, %arg3: memref<9x4x8xbf16, #tpu.memory_space<vmem>>, %arg4: memref<4x1xf32, #tpu.memory_space<vmem>>, %arg5: memref<4x1xf32, #tpu.memory_space<vmem>>, %arg6: memref<1x4x256xf32, #tpu.memory_space<vmem>>) attributes {dimension_semantics = [#tpu.dimension_semantics<parallel>, #tpu.dimension_semantics<parallel>], iteration_bounds = array<i64: 2, 1>, scalar_prefetch = 0 : i64, scratch_operands = 0 : i64, tpu.core_type = #tpu.core_type<tc>, window_params = [{transform_indices = @transform_0, window_bounds = array<i64: 1, 8, 320>}, {transform_indices = @transform_1, window_bounds = array<i64: 9, 4, 8>}, {transform_indices = @transform_2, window_bounds = array<i64: 4, 1>}, {transform_indices = @transform_3, window_bounds = array<i64: 4, 1>}, {transform_indices = @transform_4, window_bounds = array<i64: 1, 4, 256>}]} {
    %c0 = arith.constant 0 : index
    %c0_0 = arith.constant 0 : index
    %c0_1 = arith.constant 0 : index
    %0 = vector.load %arg2[%c0, %c0_0, %c0_1] : memref<1x8x320xbf16, #tpu.memory_space<vmem>>, vector<1x8x320xbf16>
    %1 = vector.shape_cast %0 : vector<1x8x320xbf16> to vector<8x320xbf16>
    %2 = tpu.iota {dimensions = array<i32: 1>} : vector<1x256xi32>
    %c16_i32 = arith.constant 16 : i32
    %c0_i32 = arith.constant 0 : i32
    %3 = arith.cmpi eq, %c16_i32, %c0_i32 : i32
    %c1_i32 = arith.constant 1 : i32
    %4 = arith.select %3, %c1_i32, %c16_i32 : i32
    %5 = vector.broadcast %4 : i32 to vector<1x256xi32>
    %6 = arith.remsi %2, %5 : vector<1x256xi32>
    %c0_i32_2 = arith.constant 0 : i32
    %7 = vector.broadcast %c0_i32_2 : i32 to vector<1x256xi32>
    %8 = arith.cmpi ne, %6, %7 : vector<1x256xi32>
    %c0_i32_3 = arith.constant 0 : i32
    %9 = vector.broadcast %c0_i32_3 : i32 to vector<1x256xi32>
    %10 = arith.cmpi slt, %6, %9 : vector<1x256xi32>
    %c0_i32_4 = arith.constant 0 : i32
    %11 = arith.cmpi slt, %4, %c0_i32_4 : i32
    %12 = vector.broadcast %11 : i1 to vector<1x256xi1>
    %13 = vector.broadcast %12 : vector<1x256xi1> to vector<1x256xi1>
    %14 = arith.xori %10, %13 : vector<1x256xi1>
    %15 = arith.andi %14, %8 : vector<1x256xi1>
    %16 = vector.broadcast %4 : i32 to vector<1x256xi32>
    %17 = arith.addi %6, %16 : vector<1x256xi32>
    %18 = arith.select %15, %17, %6 : vector<1x256xi1>, vector<1x256xi32>
    %c0_i32_5 = arith.constant 0 : i32
    %19 = vector.broadcast %c0_i32_5 : i32 to vector<1x256xi32>
    %20 = arith.cmpi ne, %18, %19 : vector<1x256xi32>
    %c15_i32 = arith.constant 15 : i32
    %21 = vector.broadcast %c15_i32 : i32 to vector<1x256xi32>
    %22 = arith.cmpi ne, %18, %21 : vector<1x256xi32>
    %cst = arith.constant 0.000000e+00 : f32
    %23 = vector.broadcast %cst : f32 to vector<4x256xf32>
    %24 = vector.extract_strided_slice %1 {offsets = [0, 15], sizes = [8, 256], strides = [1, 1]} : vector<8x320xbf16> to vector<8x256xbf16>
    %cst_6 = arith.constant 0.000000e+00 : bf16
    %25 = vector.broadcast %cst_6 : bf16 to vector<8x256xbf16>
    %26 = vector.shape_cast %20 : vector<1x256xi1> to vector<1x256xi1>
    %27 = vector.broadcast %26 : vector<1x256xi1> to vector<8x256xi1>
    %28 = arith.select %27, %24, %25 : vector<8x256xi1>, vector<8x256xbf16>
    %c0_7 = arith.constant 0 : index
    %c0_8 = arith.constant 0 : index
    %c0_9 = arith.constant 0 : index
    %29 = vector.load %arg3[%c0_7, %c0_8, %c0_9] : memref<9x4x8xbf16, #tpu.memory_space<vmem>>, vector<1x4x8xbf16>
    %30 = vector.shape_cast %29 : vector<1x4x8xbf16> to vector<4x8xbf16>
    %cst_10 = arith.constant dense<0.000000e+00> : vector<4x256xf32>
    %31 = tpu.matmul %30, %28, %cst_10 {dimension_numbers = #tpu.dot_dimension_numbers<[1], [0], [0], [1], [0, 0, 1, 1], [], []>} : vector<4x8xbf16>, vector<8x256xbf16>, vector<4x256xf32> -> vector<4x256xf32>
    %32 = arith.addf %23, %31 : vector<4x256xf32>
    %33 = vector.extract_strided_slice %1 {offsets = [0, 16], sizes = [8, 256], strides = [1, 1]} : vector<8x320xbf16> to vector<8x256xbf16>
    %c1 = arith.constant 1 : index
    %c0_11 = arith.constant 0 : index
    %c0_12 = arith.constant 0 : index
    %34 = vector.load %arg3[%c1, %c0_11, %c0_12] : memref<9x4x8xbf16, #tpu.memory_space<vmem>>, vector<1x4x8xbf16>
    %35 = vector.shape_cast %34 : vector<1x4x8xbf16> to vector<4x8xbf16>
    %cst_13 = arith.constant dense<0.000000e+00> : vector<4x256xf32>
    %36 = tpu.matmul %35, %33, %cst_13 {dimension_numbers = #tpu.dot_dimension_numbers<[1], [0], [0], [1], [0, 0, 1, 1], [], []>} : vector<4x8xbf16>, vector<8x256xbf16>, vector<4x256xf32> -> vector<4x256xf32>
    %37 = arith.addf %32, %36 : vector<4x256xf32>
    %38 = vector.extract_strided_slice %1 {offsets = [0, 17], sizes = [8, 256], strides = [1, 1]} : vector<8x320xbf16> to vector<8x256xbf16>
    %cst_14 = arith.constant 0.000000e+00 : bf16
    %39 = vector.broadcast %cst_14 : bf16 to vector<8x256xbf16>
    %40 = vector.shape_cast %22 : vector<1x256xi1> to vector<1x256xi1>
    %41 = vector.broadcast %40 : vector<1x256xi1> to vector<8x256xi1>
    %42 = arith.select %41, %38, %39 : vector<8x256xi1>, vector<8x256xbf16>
    %c2 = arith.constant 2 : index
    %c0_15 = arith.constant 0 : index
    %c0_16 = arith.constant 0 : index
    %43 = vector.load %arg3[%c2, %c0_15, %c0_16] : memref<9x4x8xbf16, #tpu.memory_space<vmem>>, vector<1x4x8xbf16>
    %44 = vector.shape_cast %43 : vector<1x4x8xbf16> to vector<4x8xbf16>
    %cst_17 = arith.constant dense<0.000000e+00> : vector<4x256xf32>
    %45 = tpu.matmul %44, %42, %cst_17 {dimension_numbers = #tpu.dot_dimension_numbers<[1], [0], [0], [1], [0, 0, 1, 1], [], []>} : vector<4x8xbf16>, vector<8x256xbf16>, vector<4x256xf32> -> vector<4x256xf32>
    %46 = arith.addf %37, %45 : vector<4x256xf32>
    %47 = vector.extract_strided_slice %1 {offsets = [0, 31], sizes = [8, 256], strides = [1, 1]} : vector<8x320xbf16> to vector<8x256xbf16>
    %cst_18 = arith.constant 0.000000e+00 : bf16
    %48 = vector.broadcast %cst_18 : bf16 to vector<8x256xbf16>
    %49 = vector.shape_cast %20 : vector<1x256xi1> to vector<1x256xi1>
    %50 = vector.broadcast %49 : vector<1x256xi1> to vector<8x256xi1>
    %51 = arith.select %50, %47, %48 : vector<8x256xi1>, vector<8x256xbf16>
    %c3 = arith.constant 3 : index
    %c0_19 = arith.constant 0 : index
    %c0_20 = arith.constant 0 : index
    %52 = vector.load %arg3[%c3, %c0_19, %c0_20] : memref<9x4x8xbf16, #tpu.memory_space<vmem>>, vector<1x4x8xbf16>
    %53 = vector.shape_cast %52 : vector<1x4x8xbf16> to vector<4x8xbf16>
    %cst_21 = arith.constant dense<0.000000e+00> : vector<4x256xf32>
    %54 = tpu.matmul %53, %51, %cst_21 {dimension_numbers = #tpu.dot_dimension_numbers<[1], [0], [0], [1], [0, 0, 1, 1], [], []>} : vector<4x8xbf16>, vector<8x256xbf16>, vector<4x256xf32> -> vector<4x256xf32>
    %55 = arith.addf %46, %54 : vector<4x256xf32>
    %56 = vector.extract_strided_slice %1 {offsets = [0, 32], sizes = [8, 256], strides = [1, 1]} : vector<8x320xbf16> to vector<8x256xbf16>
    %c4 = arith.constant 4 : index
    %c0_22 = arith.constant 0 : index
    %c0_23 = arith.constant 0 : index
    %57 = vector.load %arg3[%c4, %c0_22, %c0_23] : memref<9x4x8xbf16, #tpu.memory_space<vmem>>, vector<1x4x8xbf16>
    %58 = vector.shape_cast %57 : vector<1x4x8xbf16> to vector<4x8xbf16>
    %cst_24 = arith.constant dense<0.000000e+00> : vector<4x256xf32>
    %59 = tpu.matmul %58, %56, %cst_24 {dimension_numbers = #tpu.dot_dimension_numbers<[1], [0], [0], [1], [0, 0, 1, 1], [], []>} : vector<4x8xbf16>, vector<8x256xbf16>, vector<4x256xf32> -> vector<4x256xf32>
    %60 = arith.addf %55, %59 : vector<4x256xf32>
    %61 = vector.extract_strided_slice %1 {offsets = [0, 33], sizes = [8, 256], strides = [1, 1]} : vector<8x320xbf16> to vector<8x256xbf16>
    %cst_25 = arith.constant 0.000000e+00 : bf16
    %62 = vector.broadcast %cst_25 : bf16 to vector<8x256xbf16>
    %63 = vector.shape_cast %22 : vector<1x256xi1> to vector<1x256xi1>
    %64 = vector.broadcast %63 : vector<1x256xi1> to vector<8x256xi1>
    %65 = arith.select %64, %61, %62 : vector<8x256xi1>, vector<8x256xbf16>
    %c5 = arith.constant 5 : index
    %c0_26 = arith.constant 0 : index
    %c0_27 = arith.constant 0 : index
    %66 = vector.load %arg3[%c5, %c0_26, %c0_27] : memref<9x4x8xbf16, #tpu.memory_space<vmem>>, vector<1x4x8xbf16>
    %67 = vector.shape_cast %66 : vector<1x4x8xbf16> to vector<4x8xbf16>
    %cst_28 = arith.constant dense<0.000000e+00> : vector<4x256xf32>
    %68 = tpu.matmul %67, %65, %cst_28 {dimension_numbers = #tpu.dot_dimension_numbers<[1], [0], [0], [1], [0, 0, 1, 1], [], []>} : vector<4x8xbf16>, vector<8x256xbf16>, vector<4x256xf32> -> vector<4x256xf32>
    %69 = arith.addf %60, %68 : vector<4x256xf32>
    %70 = vector.extract_strided_slice %1 {offsets = [0, 47], sizes = [8, 256], strides = [1, 1]} : vector<8x320xbf16> to vector<8x256xbf16>
    %cst_29 = arith.constant 0.000000e+00 : bf16
    %71 = vector.broadcast %cst_29 : bf16 to vector<8x256xbf16>
    %72 = vector.shape_cast %20 : vector<1x256xi1> to vector<1x256xi1>
    %73 = vector.broadcast %72 : vector<1x256xi1> to vector<8x256xi1>
    %74 = arith.select %73, %70, %71 : vector<8x256xi1>, vector<8x256xbf16>
    %c6 = arith.constant 6 : index
    %c0_30 = arith.constant 0 : index
    %c0_31 = arith.constant 0 : index
    %75 = vector.load %arg3[%c6, %c0_30, %c0_31] : memref<9x4x8xbf16, #tpu.memory_space<vmem>>, vector<1x4x8xbf16>
    %76 = vector.shape_cast %75 : vector<1x4x8xbf16> to vector<4x8xbf16>
    %cst_32 = arith.constant dense<0.000000e+00> : vector<4x256xf32>
    %77 = tpu.matmul %76, %74, %cst_32 {dimension_numbers = #tpu.dot_dimension_numbers<[1], [0], [0], [1], [0, 0, 1, 1], [], []>} : vector<4x8xbf16>, vector<8x256xbf16>, vector<4x256xf32> -> vector<4x256xf32>
    %78 = arith.addf %69, %77 : vector<4x256xf32>
    %79 = vector.extract_strided_slice %1 {offsets = [0, 48], sizes = [8, 256], strides = [1, 1]} : vector<8x320xbf16> to vector<8x256xbf16>
    %c7 = arith.constant 7 : index
    %c0_33 = arith.constant 0 : index
    %c0_34 = arith.constant 0 : index
    %80 = vector.load %arg3[%c7, %c0_33, %c0_34] : memref<9x4x8xbf16, #tpu.memory_space<vmem>>, vector<1x4x8xbf16>
    %81 = vector.shape_cast %80 : vector<1x4x8xbf16> to vector<4x8xbf16>
    %cst_35 = arith.constant dense<0.000000e+00> : vector<4x256xf32>
    %82 = tpu.matmul %81, %79, %cst_35 {dimension_numbers = #tpu.dot_dimension_numbers<[1], [0], [0], [1], [0, 0, 1, 1], [], []>} : vector<4x8xbf16>, vector<8x256xbf16>, vector<4x256xf32> -> vector<4x256xf32>
    %83 = arith.addf %78, %82 : vector<4x256xf32>
    %84 = vector.extract_strided_slice %1 {offsets = [0, 49], sizes = [8, 256], strides = [1, 1]} : vector<8x320xbf16> to vector<8x256xbf16>
    %cst_36 = arith.constant 0.000000e+00 : bf16
    %85 = vector.broadcast %cst_36 : bf16 to vector<8x256xbf16>
    %86 = vector.shape_cast %22 : vector<1x256xi1> to vector<1x256xi1>
    %87 = vector.broadcast %86 : vector<1x256xi1> to vector<8x256xi1>
    %88 = arith.select %87, %84, %85 : vector<8x256xi1>, vector<8x256xbf16>
    %c8 = arith.constant 8 : index
    %c0_37 = arith.constant 0 : index
    %c0_38 = arith.constant 0 : index
    %89 = vector.load %arg3[%c8, %c0_37, %c0_38] : memref<9x4x8xbf16, #tpu.memory_space<vmem>>, vector<1x4x8xbf16>
    %90 = vector.shape_cast %89 : vector<1x4x8xbf16> to vector<4x8xbf16>
    %cst_39 = arith.constant dense<0.000000e+00> : vector<4x256xf32>
    %91 = tpu.matmul %90, %88, %cst_39 {dimension_numbers = #tpu.dot_dimension_numbers<[1], [0], [0], [1], [0, 0, 1, 1], [], []>} : vector<4x8xbf16>, vector<8x256xbf16>, vector<4x256xf32> -> vector<4x256xf32>
    %92 = arith.addf %83, %91 : vector<4x256xf32>
    %c0_40 = arith.constant 0 : index
    %c0_41 = arith.constant 0 : index
    %93 = vector.load %arg4[%c0_40, %c0_41] : memref<4x1xf32, #tpu.memory_space<vmem>>, vector<4x1xf32>
    %94 = vector.broadcast %93 : vector<4x1xf32> to vector<4x256xf32>
    %95 = arith.mulf %92, %94 : vector<4x256xf32>
    %c0_42 = arith.constant 0 : index
    %c0_43 = arith.constant 0 : index
    %96 = vector.load %arg5[%c0_42, %c0_43] : memref<4x1xf32, #tpu.memory_space<vmem>>, vector<4x1xf32>
    %97 = vector.broadcast %96 : vector<4x1xf32> to vector<4x256xf32>
    %98 = arith.addf %95, %97 : vector<4x256xf32>
    %cst_44 = arith.constant 0.000000e+00 : f32
    %99 = vector.broadcast %cst_44 : f32 to vector<4x256xf32>
    %100 = arith.maximumf %98, %99 : vector<4x256xf32>
    %c0_45 = arith.constant 0 : index
    %c0_46 = arith.constant 0 : index
    %c0_47 = arith.constant 0 : index
    %101 = vector.load %arg6[%c0_45, %c0_46, %c0_47] : memref<1x4x256xf32, #tpu.memory_space<vmem>>, vector<1x4x256xf32>
    %102 = vector.shape_cast %101 : vector<1x4x256xf32> to vector<4x256xf32>
    %103 = vector.shape_cast %100 : vector<4x256xf32> to vector<1x4x256xf32>
    tpu.vector_store %arg6[%c0_45, %c0_46, %c0_47], %103 {strides = array<i32>} : memref<1x4x256xf32, #tpu.memory_space<vmem>>, vector<1x4x256xf32>,
    return
  }
  func.func @transform_0(%arg0: i32, %arg1: i32) -> (i32, i32, i32) {
    %c0_i32 = arith.constant 0 : i32
    %c0_i32_0 = arith.constant 0 : i32
    %c0_i32_1 = arith.constant 0 : i32
    return %arg0, %c0_i32, %c0_i32_0 : i32, i32, i32
  }
  func.func @transform_1(%arg0: i32, %arg1: i32) -> (i32, i32, i32) {
    %c0_i32 = arith.constant 0 : i32
    %c0_i32_0 = arith.constant 0 : i32
    %c0_i32_1 = arith.constant 0 : i32
    return %c0_i32, %arg1, %c0_i32_0 : i32, i32, i32
  }
  func.func @transform_2(%arg0: i32, %arg1: i32) -> (i32, i32) {
    %c0_i32 = arith.constant 0 : i32
    %c0_i32_0 = arith.constant 0 : i32
    return %arg1, %c0_i32 : i32, i32
  }
  func.func @transform_3(%arg0: i32, %arg1: i32) -> (i32, i32) {
    %c0_i32 = arith.constant 0 : i32
    %c0_i32_0 = arith.constant 0 : i32
    return %arg1, %c0_i32 : i32, i32
  }
  func.func @transform_4(%arg0: i32, %arg1: i32) -> (i32, i32, i32) {
    %c0_i32 = arith.constant 0 : i32
    %c0_i32_0 = arith.constant 0 : i32
    return %arg0, %arg1, %c0_i32 : i32, i32, i32
  }
}

</mosaic_0001>

<bundles_post_ra>
// kernel: wave_attention3_forward.5
= control target key start
LH: loop header
LB: loop body
LE: loop exit
PB: predicated region body
PF: predicated region fallthrough
CT: control target
= control target key end

     0   :  { %s1328_s15 = smov 0   ;;  %s1330_s16 = smov 0   ;;  %s1498_s0 = inlined_call_operand.vmem [shape: bf16[2,8,320], index: 0, kind: input, shape index: {}]   ;;  %s1499_s1 = inlined_call_operand.vmem [shape: bf16[9,4,8], index: 1, kind: input, shape index: {}]   ;;  %s1500_s2 = inlined_call_operand.vmem [shape: f32[4,1], index: 2, kind: input, shape index: {}]   ;;  %s1501_s3 = inlined_call_operand.vmem [shape: f32[4,1], index: 3, kind: input, shape index: {}]   ;;  %s1502_s4 = inlined_call_operand.vmem [shape: bf16[2,4,256], index: 4, kind: output, shape index: {}]  }
   0x1   :  { %s1332_s17 = smov 0  }
   0x2 LB: > { %s26_s18 = sadd.s32 1, %s1281_s16  ;;  %p1161_p0 = scmp.ge.s32.totalorder %s1285_s17, 1  ;;  %s1285_s17 = sphi %s1332_s17, %s14_s17   ;;  %s1281_s16 = sphi %s1330_s16, %s1504_s16   ;;  %s1277_s15 = sphi %s1328_s15, %s1503_s15  }
   0x3   : > { %p28_p1 = scmp.ge.s32.totalorder %s26_s18, 2  ;;  %p203_p2 = scmp.lt.s32.totalorder %s1285_s17, 3 }
   0x5   : > { %s1506_s18 = smov (%p28_p1, %s26_s18), 0  ;;  %p204_p3 = pnand %p1161_p0, %p203_p2 }
   0x6   : > { %p245_p4 = scmp.lt.s32.totalorder (!%p204_p3), %s1277_s15, 1  ;;  %s1288_s20 = smov (!%p204_p3), 15  }
   0x7   : > { %207 = sbr.rel (%p204_p3) target bundleno = 511 (0x1ff), region = 36  ;;  %s1289_s21 = smov (!%p204_p3), 31  }
   0x8   : > { %s1290_s25 = smov (!%p204_p3), 17   ;;  %s1291_s26 = smov (!%p204_p3), 33  }
   0x9   : > { %s1292_s27 = smov (!%p204_p3), 47   ;;  %s1293_s28 = smov (!%p204_p3), 49  }
   0xa   : > { %s1294_s29 = smov (!%p204_p3), 112   ;;  %s1295_s30 = smov (!%p204_p3), 96  }
   0xb   : > { %s1296_s5 = smov (!%p204_p3), 113   ;;  %s1297_s6 = smov (!%p204_p3), 111  }
   0xc   : > { %v276_v0 = vlaneseq  ;;  %v1287_v1 = vmov 0   ;;  %s1508_s15 = smov (!%p245_p4, %s1277_s15), 1  ;;  %vm316_vm8 = vcmask 121856   ;;  %vm470_vm11 = vcmask 138240   ;;  %s1298_s7 = smov 97  }
   0xd   : > { %385 = vmatprep.mubr.bf16.mxu0 %v1287_v1  ;;  %452 = vmatprep.mubr.bf16.mxu1 %v1287_v1  ;;  %s1217_s19 = smul.u32 12, %s1508_s15  ;;  %vm339_vm14 = vcmask 916480   ;;  %vm550_vm15 = vcmask 252928   ;;  %s1299_s8 = smov 81   ;;  %v1165_v47 = vld [vmem:[%s1499_s1 + $0x2] sm:$0x3] }
   0xe   : > { %v277_v2 = vand.u32 127, %v276_v0  ;;  %1258 = vset.pattern.permute.xlu1 %v1287_v1  ;;  %1259 = vset.pattern.permute.xlu0 %v1287_v1  ;;  %s1300_s9 = smov 95   ;;  %s1301_s12 = smov 80  }
   0xf   : > { %s249_s24 = scalar_lea.vmem %s1498_s0, %s1217_s19  ;;  %s1302_s13 = smov 79  }
  0x10   : > { %v278_v3 = vadd.s32 128, %v277_v2  ;;  %v283_v4 = vand.u32 15, %v277_v2  ;;  %v1358_v8 = vld [vmem:[%s249_s24] sm:$0xff]  ;;  %v1368_v11 = vld [vmem:[%s249_s24 + $0x8] sm:$0xf] }
  0x11   : > { %v1362_v9 = vcombine.low %v1358_v8, %v1358_v8  ;;  %v1366_v10 = vcombine.high %v1358_v8, %v1358_v8  ;;  %v1374_v12 = vcombine.low %v1368_v11, %v1368_v11 }
  0x12   : > { %v290_v5 = vand.u32 15, %v278_v3  ;;  %vm303_vm0 = vcmp.ne.s32.totalorder %v283_v4, 0  ;;  %vm305_vm1 = vcmp.ne.s32.totalorder %v283_v4, 15 }
  0x14   : > { %vm304_vm2 = vcmp.ne.s32.totalorder %v290_v5, 0  ;;  %vm306_vm3 = vcmp.ne.s32.totalorder %v290_v5, 15  ;;  %v1001_v5 = vld [vmem:[%s1501_s3] sm:$0xf] }
  0x15   : > { %vm311_vm4 = vmpackc.low %vm304_vm2, %vm303_vm0  ;;  %vm346_vm0 = vcmask 1043456  }
  0x16   : > { %v312_v6 = vsel %vm311_vm4, 65537, %v1287_v1  ;;  %vm465_vm5 = vmpackc.low %vm306_vm3, %vm305_vm1  ;;  %vm342_vm3 = vcmask 64512   ;;  %vm693_vm4 = vcmask 269312  }
  0x17   : > { %313 = vrot.lane.b32.xlu0 %v312_v6, %s1288_s20  ;;  %547 = vrot.lane.b32.xlu1 %v312_v6, %s1289_s21  ;;  %v466_v7 = vsel %vm465_vm5, 65537, %v1287_v1  ;;  %vm773_vm5 = vcmask 384000  }
  0x1b   : > { %467 = vrot.lane.b32.xlu0 %v466_v7, %s1290_s25  ;;  %690 = vrot.lane.b32.xlu1 %v466_v7, %s1291_s26 }
  0x1f   : > { %770 = vrot.lane.b32.xlu0 %v312_v6, %s1292_s27  ;;  %913 = vrot.lane.b32.xlu1 %v466_v7, %s1293_s28  ;;  %v993_v6 = vld [vmem:[%s1500_s2] sm:$0xf] }
  0x23   : > { %333 = vrot.lane.b32.xlu0 %v1362_v9, %s1294_s29  ;;  %335 = vrot.lane.b32.xlu1 %v1366_v10, %s1294_s29 }
  0x27   : > { %337 = vrot.lane.b32.xlu0 %v1374_v12, %s1294_s29  ;;  %631 = vrot.lane.b32.xlu1 %v1366_v10, %s1295_s30 }
  0x2b   : > { %629 = vrot.lane.b32.xlu0 %v1362_v9, %s1295_s30 }
  0x2f   : > { %633 = vrot.lane.b32.xlu0 %v1374_v12, %s1295_s30 }
  0x89   : > { %v314_v13 = vpop.permute.xlu0 %313  ;;  %v548_v14 = vpop.permute.xlu1 %547 }
  0x8a   : > { %v315_v15 = vrot.slane %v314_v13, 4  ;;  %v549_v16 = vrot.slane %v548_v14, 4 }
  0x8c   : > { %vm319_vm6 = vcmp.ne.s16.totalorder %v315_v15, 0  ;;  %vm553_vm7 = vcmp.ne.s16.totalorder %v549_v16, 0  ;;  %v317_v24 = vsel %vm316_vm8, %v315_v15, %v314_v13  ;;  %v551_v40 = vsel %vm550_vm15, %v549_v16, %v548_v14 }
  0x8d   : > { %v468_v17 = vpop.permute.xlu0 %467  ;;  %v1380_v18 = vpop.permute.xlu1 %690  ;;  %v321_v19 = vsel %vm319_vm6, %v1368_v11, 0  ;;  %v555_v22 = vsel %vm553_vm7, %v1368_v11, 0  ;;  %vm318_vm12 = vcmp.ne.s16.totalorder %v317_v24, 0  ;;  %vm552_vm2 = vcmp.ne.s16.totalorder %v551_v40, 0 }
  0x8e   : > { %v469_v20 = vrot.slane %v468_v17, 4  ;;  %v692_v21 = vrot.slane %v1380_v18, 4  ;;  %v1173_v23 = vcombine.low %v321_v19, %v321_v19  ;;  %v1185_v26 = vcombine.low %v555_v22, %v555_v22 }
  0x8f   : > { %v320_v38 = vsel %vm318_vm12, %v1358_v8, 0  ;;  %v554_v49 = vsel %vm552_vm2, %v1358_v8, 0  ;;  %vm916_vm7 = vcmask 400384   ;;  %vm492_vm12 = vcmask 908288  }
  0x90   : > { %vm473_vm9 = vcmp.ne.s16.totalorder %v469_v20, 0  ;;  %vm696_vm10 = vcmp.ne.s16.totalorder %v692_v21, 0  ;;  %406 = vrot.lane.b32.xlu1 %v1173_v23, %s1296_s5  ;;  %v471_v32 = vsel %vm470_vm11, %v469_v20, %v468_v17  ;;  %v1172_v43 = vcombine.high %v320_v38, %v320_v38 }
  0x91   : > { %v771_v25 = vpop.permute.xlu0 %770  ;;  %v475_v27 = vsel %vm473_vm9, %v1368_v11, 0  ;;  %v1387_v28 = vpop.permute.xlu1 %913  ;;  %v698_v31 = vsel %vm696_vm10, %v1368_v11, 0  ;;  %vm472_vm1 = vcmp.ne.s16.totalorder %v471_v32, 0  ;;  %v1171_v46 = vcombine.low %v320_v38, %v320_v38 }
  0x92   : > { %v772_v29 = vrot.slane %v771_v25, 4  ;;  %v1179_v30 = vcombine.low %v475_v27, %v475_v27  ;;  %v1194_v33 = vcombine.low %v698_v31, %v698_v31  ;;  %v474_v45 = vsel %vm472_vm1, %v1358_v8, 0 }
  0x93   : > { %v1177_v48 = vcombine.low %v474_v45, %v474_v45  ;;  %v1178_v50 = vcombine.high %v474_v45, %v474_v45  ;;  %v694_v51 = vsel %vm693_vm4, %v692_v21, %v1380_v18  ;;  %v1184_v52 = vcombine.high %v554_v49, %v554_v49  ;;  %v322_v21 = vld [vmem:[%s1499_s1] sm:$0x3]  ;;  %v1191_v45 = vld [vmem:[%s1499_s1 + $0xa] sm:$0x3] }
  0x94   : > { %vm776_vm13 = vcmp.ne.s16.totalorder %v772_v29, 0  ;;  %490 = vrot.lane.b32.xlu0 %v1179_v30, %s1297_s6  ;;  %570 = vrot.lane.b32.xlu1 %v1185_v26, %s1298_s7  ;;  %v1183_v53 = vcombine.low %v554_v49, %v554_v49  ;;  %vm695_vm6 = vcmp.ne.s16.totalorder %v694_v51, 0  ;;  %v774_v54 = vsel %vm773_vm5, %v772_v29, %v771_v25  ;;  %v1176_v29 = vld [vmem:[%s1499_s1 + $0x4] sm:$0x3] }
  0x95   : > { %v778_v34 = vsel %vm776_vm13, %v1368_v11, 0  ;;  %v334_v35 = vpop.permute.xlu0 %333  ;;  %v336_v36 = vpop.permute.xlu1 %335  ;;  %v915_v55 = vrot.slane %v1387_v28, 4  ;;  %v697_v56 = vsel %vm695_vm6, %v1358_v8, 0  ;;  %vm775_vm8 = vcmp.ne.s16.totalorder %v774_v54, 0 }
  0x96   : > { %v1200_v37 = vcombine.low %v778_v34, %v778_v34  ;;  %v340_v39 = vsel %vm339_vm14, %v334_v35, %v336_v36  ;;  %v1193_v58 = vcombine.high %v697_v56, %v697_v56  ;;  %v777_v59 = vsel %vm775_vm8, %v1358_v8, 0 }
  0x97   : > { %v348_v42 = vsel %vm346_vm0, %v340_v39, 0  ;;  %v917_v57 = vsel %vm916_vm7, %v915_v55, %v1387_v28  ;;  %v1192_v60 = vcombine.low %v697_v56, %v697_v56  ;;  %v1198_v61 = vcombine.low %v777_v59, %v777_v59  ;;  %v1188_v39 = vld [vmem:[%s1499_s1 + $0x8] sm:$0x3] }
  0x98   : > { %793 = vrot.lane.b32.xlu0 %v1200_v37, %s1299_s8  ;;  %713 = vrot.lane.b32.xlu1 %v1194_v33, %s1300_s9  ;;  %vm918_vm9 = vcmp.ne.s16.totalorder %v917_v57, 0  ;;  %v1199_v63 = vcombine.high %v777_v59, %v777_v59  ;;  %vm919_vm10 = vcmp.ne.s16.totalorder %v915_v55, 0  ;;  %vm408_vm11 = vcmask 924672   ;;  %v1203_v57 = vld [vmem:[%s1499_s1 + $0xe] sm:$0x3] }
  0x99   : > { %v338_v41 = vpop.permute.xlu0 %337  ;;  %v920_v62 = vsel %vm918_vm9, %v1358_v8, 0  ;;  %v921_v2 = vsel %vm919_vm10, %v1368_v11, 0  ;;  %v632_v8 = vpop.permute.xlu1 %631  ;;  %vm635_vm13 = vcmask 785408   ;;  %vm715_vm15 = vcmask 777216  }
  0x9a   : > { %v341_v44 = vsel %vm339_vm14, %v336_v36, %v338_v41  ;;  %v1207_v0 = vcombine.low %v920_v62, %v920_v62  ;;  %v1209_v3 = vcombine.low %v921_v2, %v921_v2  ;;  %v1208_v4 = vcombine.high %v920_v62, %v920_v62  ;;  %v1182_v36 = vld [vmem:[%s1499_s1 + $0x6] sm:$0x3]  ;;  %v1206_v62 = vld [vmem:[%s1499_s1 + $0x10] sm:$0x3] }
  0x9b   : > { %1169 = vmatprep.subr.msk.bf16.mxu0 %vm346_vm0, %v341_v44  ;;  %vm572_vm14 = vcmask 793600   ;;  %vm795_vm1 = vcmask 662528   ;;  %vm858_vm2 = vcmask 654336   ;;  %vm938_vm4 = vcmask 646144  }
  0x9c   : > { %404 = vrot.lane.b32.xlu0 %v1172_v43, %s1296_s5  ;;  %368 = vmatpush1.bf16.msra.mxu0 %v348_v42 }
  0x9d   : > { %402 = vrot.lane.b32.xlu1 %v1171_v46, %s1296_s5  ;;  %v630_v7 = vpop.permute.xlu0 %629 }
  0x9e   : > { %v636_v26 = vsel %vm635_vm13, %v630_v7, %v632_v8 }
  0x9f   : > { %1170 = vmatmul.mubr.msk.bf16.vlgmr.msra.gmra.mxu0 %vm342_vm3, %v1165_v47  ;;  %v642_v33 = vsel %vm346_vm0, %v636_v26, 0 }
  0xa0   : > { %486 = vrot.lane.b32.xlu0 %v1177_v48, %s1297_s6  ;;  %536 = vmatprep.mubr.bf16.mxu0 %v1287_v1 }
  0xa1   : > { %488 = vrot.lane.b32.xlu1 %v1178_v50, %s1297_s6 }
  0xa4   : > { %568 = vrot.lane.b32.xlu0 %v1184_v52, %s1298_s7  ;;  %v1197_v52 = vld [vmem:[%s1499_s1 + $0xc] sm:$0x3] }
  0xa5   : > { %566 = vrot.lane.b32.xlu1 %v1183_v53, %s1298_s7 }
  0xa8   : > { %854 = vrot.lane.b32.xlu0 %v1366_v10, %s1301_s12 }
  0xa9   : > { %852 = vrot.lane.b32.xlu1 %v1362_v9, %s1301_s12  ;;  %v634_v9 = vpop.permute.xlu0 %633 }
  0xaa   : > { %v637_v27 = vsel %vm635_vm13, %v632_v8, %v634_v9 }
  0xac   : > { %711 = vrot.lane.b32.xlu0 %v1193_v58, %s1300_s9 }
  0xad   : > { %709 = vrot.lane.b32.xlu1 %v1192_v60, %s1300_s9 }
  0xb0   : > { %789 = vrot.lane.b32.xlu0 %v1198_v61, %s1299_s8 }
  0xb1   : > { %791 = vrot.lane.b32.xlu1 %v1199_v63, %s1299_s8 }
  0xb4   : > { %932 = vrot.lane.b32.xlu0 %v1207_v0, %s1302_s13 }
  0xb5   : > { %856 = vrot.lane.b32.xlu1 %v1374_v12, %s1301_s12  ;;  %s1216_s12 = sshll.u32 %s1508_s15, 2 }
  0xb6   : > { %s270_s19 = scalar_lea.vmem %s1502_s4, %s1216_s12 }
  0xb8   : > { %936 = vrot.lane.b32.xlu0 %v1209_v3, %s1302_s13 }
  0xb9   : > { %934 = vrot.lane.b32.xlu1 %v1208_v4, %s1302_s13 }
  0xbc   : > { %1004 = vperm.xlu0 %1259, %v1001_v5  }
  0xbd   : > { %996 = vperm.xlu1 %1258, %v993_v6  }
 0x102   : > { %v407_v10 = vpop.permute.xlu1 %406 }
 0x106   : > { %v491_v11 = vpop.permute.xlu0 %490  ;;  %v571_v12 = vpop.permute.xlu1 %570 }
 0x10a   : > { %v794_v13 = vpop.permute.xlu0 %793  ;;  %v714_v14 = vpop.permute.xlu1 %713 }
 0x10e   : > { %v405_v15 = vpop.permute.xlu0 %404 }
 0x10f   : > { %v403_v16 = vpop.permute.xlu1 %402  ;;  %v410_v17 = vsel %vm408_vm11, %v405_v15, %v407_v10 }
 0x110   : > { %1174 = vmatprep.subr.msk.bf16.mxu1 %vm346_vm0, %v410_v17  ;;  %v409_v18 = vsel %vm408_vm11, %v403_v16, %v405_v15 }
 0x111   : > { %v415_v19 = vsel %vm346_vm0, %v409_v18, 0 }
 0x112   : > { %435 = vmatpush1.bf16.msra.mxu1 %v415_v19  ;;  %v487_v20 = vpop.permute.xlu0 %486 }
 0x113   : > { %v489_v22 = vpop.permute.xlu1 %488 }
 0x114   : > { %v493_v23 = vsel %vm492_vm12, %v487_v20, %v489_v22  ;;  %v494_v24 = vsel %vm492_vm12, %v489_v22, %v491_v11 }
 0x115   : > { %v499_v25 = vsel %vm346_vm0, %v493_v23, 0  ;;  %1175 = vmatmul.mubr.msk.bf16.vlgmr.msra.gmra.mxu1 %vm342_vm3, %v322_v21  ;;  %1180 = vmatprep.subr.msk.bf16.mxu0 %vm346_vm0, %v494_v24 }
 0x116   : > { %519 = vmatpush1.bf16.msra.mxu0 %v499_v25  ;;  %v569_v28 = vpop.permute.xlu0 %568  ;;  %616 = vmatprep.mubr.bf16.mxu1 %v1287_v1 }
 0x117   : > { %v574_v30 = vsel %vm572_vm14, %v569_v28, %v571_v12  ;;  %1189 = vmatprep.subr.msk.bf16.mxu0 %vm346_vm0, %v637_v27  ;;  %v567_v31 = vpop.permute.xlu1 %566 }
 0x118   : > { %v573_v32 = vsel %vm572_vm14, %v567_v31, %v569_v28  ;;  %1186 = vmatprep.subr.msk.bf16.mxu1 %vm346_vm0, %v574_v30 }
 0x119   : > { %v579_v34 = vsel %vm346_vm0, %v573_v32, 0  ;;  %1181 = vmatmul.mubr.msk.bf16.vlgmr.msra.gmra.mxu0 %vm342_vm3, %v1176_v29 }
 0x11a   : > { %599 = vmatpush1.bf16.msra.mxu1 %v579_v34  ;;  %662 = vmatpush1.bf16.msra.mxu0 %v642_v33  ;;  %v855_v35 = vpop.permute.xlu0 %854 }
 0x11b   : > { %v853_v37 = vpop.permute.xlu1 %852  ;;  %679 = vmatprep.mubr.bf16.mxu0 %v1287_v1 }
 0x11c   : > { %v859_v50 = vsel %vm858_vm2, %v853_v37, %v855_v35 }
 0x11d   : > { %1187 = vmatmul.mubr.msk.bf16.vlgmr.msra.gmra.mxu1 %vm342_vm3, %v1182_v36  ;;  %v865_v55 = vsel %vm346_vm0, %v859_v50, 0 }
 0x11e   : > { %v712_v38 = vpop.permute.xlu0 %711  ;;  %759 = vmatprep.mubr.bf16.mxu1 %v1287_v1 }
 0x11f   : > { %v717_v40 = vsel %vm715_vm15, %v712_v38, %v714_v14  ;;  %v710_v41 = vpop.permute.xlu1 %709 }
 0x120   : > { %v716_v42 = vsel %vm715_vm15, %v710_v41, %v712_v38  ;;  %1195 = vmatprep.subr.msk.bf16.mxu1 %vm346_vm0, %v717_v40 }
 0x121   : > { %v722_v43 = vsel %vm346_vm0, %v716_v42, 0  ;;  %1190 = vmatmul.mubr.msk.bf16.vlgmr.msra.gmra.mxu0 %vm342_vm3, %v1188_v39 }
 0x122   : > { %742 = vmatpush1.bf16.msra.mxu1 %v722_v43  ;;  %v790_v44 = vpop.permute.xlu0 %789  ;;  %839 = vmatprep.mubr.bf16.mxu0 %v1287_v1 }
 0x123   : > { %v792_v46 = vpop.permute.xlu1 %791 }
 0x124   : > { %v796_v47 = vsel %vm795_vm1, %v790_v44, %v792_v46  ;;  %v797_v48 = vsel %vm795_vm1, %v792_v46, %v794_v13 }
 0x125   : > { %v802_v49 = vsel %vm346_vm0, %v796_v47, 0  ;;  %1196 = vmatmul.mubr.msk.bf16.vlgmr.msra.gmra.mxu1 %vm342_vm3, %v1191_v45  ;;  %1201 = vmatprep.subr.msk.bf16.mxu0 %vm346_vm0, %v797_v48 }
 0x126   : > { %822 = vmatpush1.bf16.msra.mxu0 %v802_v49  ;;  %v933_v51 = vpop.permute.xlu0 %932  ;;  %902 = vmatprep.mubr.bf16.mxu1 %v1287_v1 }
 0x127   : > { %v857_v53 = vpop.permute.xlu1 %856 }
 0x128   : > { %v860_v54 = vsel %vm858_vm2, %v855_v35, %v857_v53 }
 0x129   : > { %1202 = vmatmul.mubr.msk.bf16.vlgmr.msra.gmra.mxu0 %vm342_vm3, %v1197_v52  ;;  %1204 = vmatprep.subr.msk.bf16.mxu1 %vm346_vm0, %v860_v54 }
 0x12a   : > { %885 = vmatpush1.bf16.msra.mxu1 %v865_v55  ;;  %v937_v56 = vpop.permute.xlu0 %936  ;;  %982 = vmatprep.mubr.bf16.mxu0 %v1287_v1 }
 0x12b   : > { %v935_v58 = vpop.permute.xlu1 %934 }
 0x12c   : > { %v939_v59 = vsel %vm938_vm4, %v933_v51, %v935_v58  ;;  %v940_v60 = vsel %vm938_vm4, %v935_v58, %v937_v56 }
 0x12d   : > { %v945_v61 = vsel %vm346_vm0, %v939_v59, 0  ;;  %1205 = vmatmul.mubr.msk.bf16.vlgmr.msra.gmra.mxu1 %vm342_vm3, %v1203_v57  ;;  %1210 = vmatprep.subr.msk.bf16.mxu0 %vm346_vm0, %v940_v60 }
 0x12e   : > { %965 = vmatpush1.bf16.msra.mxu0 %v945_v61 }
 0x131   : > { %1211 = vmatmul.mubr.msk.bf16.vlgmr.msra.gmra.mxu0 %vm342_vm3, %v1206_v62 }
 0x137   : > { %v1005_v47 = vpop.permute.xlu0 %1004 }
 0x138   : > { %v997_v42 = vpop.permute.xlu1 %996 }
 0x15f   : > { %v387_v63 = vpop.f32.mrf.mxu0 }
 0x161   : > { %v389_v0 = vpop.f32.mrf.mxu0 }
 0x163   : > { %v391_v2 = vpop.f32.mrf.mxu0 }
 0x165   : > { %v392_v1 = vpop.f32.mrf.mxu0 }
 0x1d5   : > { %v454_v3 = vpop.f32.mrf.mxu1 }
 0x1d6   : > { %v455_v17 = vadd.f32 %v454_v3, %v387_v63 }
 0x1d7   : > { %v456_v4 = vpop.f32.mrf.mxu1 }
 0x1d8   : > { %v457_v20 = vadd.f32 %v456_v4, %v389_v0 }
 0x1d9   : > { %v458_v5 = vpop.f32.mrf.mxu1  ;;  %v538_v6 = vpop.f32.mrf.mxu0 }
 0x1da   : > { %v545_v21 = vadd.f32 %v538_v6, %v455_v17 }
 0x1db   : > { %v459_v7 = vpop.f32.mrf.mxu1  ;;  %v540_v8 = vpop.f32.mrf.mxu0 }
 0x1dc   : > { %v546_v24 = vadd.f32 %v540_v8, %v457_v20 }
 0x1dd   : > { %v542_v9 = vpop.f32.mrf.mxu0  ;;  %v618_v10 = vpop.f32.mrf.mxu1 }
 0x1de   : > { %v625_v25 = vadd.f32 %v618_v10, %v545_v21 }
 0x1df   : > { %v543_v11 = vpop.f32.mrf.mxu0  ;;  %v620_v12 = vpop.f32.mrf.mxu1 }
 0x1e0   : > { %v626_v28 = vadd.f32 %v620_v12, %v546_v24 }
 0x1e1   : > { %v622_v13 = vpop.f32.mrf.mxu1  ;;  %v681_v14 = vpop.f32.mrf.mxu0 }
 0x1e2   : > { %v688_v29 = vadd.f32 %v681_v14, %v625_v25 }
 0x1e3   : > { %v623_v15 = vpop.f32.mrf.mxu1  ;;  %v683_v16 = vpop.f32.mrf.mxu0 }
 0x1e4   : > { %v689_v32 = vadd.f32 %v683_v16, %v626_v28 }
 0x1e5   : > { %v685_v18 = vpop.f32.mrf.mxu0  ;;  %v761_v19 = vpop.f32.mrf.mxu1 }
 0x1e6   : > { %v768_v33 = vadd.f32 %v761_v19, %v688_v29 }
 0x1e7   : > { %v686_v22 = vpop.f32.mrf.mxu0  ;;  %v763_v23 = vpop.f32.mrf.mxu1 }
 0x1e8   : > { %v769_v36 = vadd.f32 %v763_v23, %v689_v32 }
 0x1e9   : > { %v765_v26 = vpop.f32.mrf.mxu1  ;;  %v841_v27 = vpop.f32.mrf.mxu0 }
 0x1ea   : > { %v848_v37 = vadd.f32 %v841_v27, %v768_v33 }
 0x1eb   : > { %v766_v30 = vpop.f32.mrf.mxu1  ;;  %v843_v31 = vpop.f32.mrf.mxu0 }
 0x1ec   : > { %v849_v40 = vadd.f32 %v843_v31, %v769_v36 }
 0x1ed   : > { %v845_v34 = vpop.f32.mrf.mxu0  ;;  %v904_v35 = vpop.f32.mrf.mxu1 }
 0x1ee   : > { %v911_v41 = vadd.f32 %v904_v35, %v848_v37 }
 0x1ef   : > { %v846_v38 = vpop.f32.mrf.mxu0  ;;  %v906_v39 = vpop.f32.mrf.mxu1 }
 0x1f0   : > { %v912_v45 = vadd.f32 %v906_v39, %v849_v40 }
 0x1f1   : > { %v984_v43 = vpop.f32.mrf.mxu0  ;;  %v908_v44 = vpop.f32.mrf.mxu1 }
 0x1f2   : > { %v991_v46 = vadd.f32 %v984_v43, %v911_v41 }
 0x1f3   : > { %v986_v48 = vpop.f32.mrf.mxu0  ;;  %v909_v49 = vpop.f32.mrf.mxu1 }
 0x1f4   : > { %v992_v50 = vadd.f32 %v986_v48, %v912_v45  ;;  %v999_v51 = vmul.f32 %v997_v42, %v991_v46 }
 0x1f5   : > { %v988_v52 = vpop.f32.mrf.mxu0 }
 0x1f6   : > { %v1000_v53 = vmul.f32 %v997_v42, %v992_v50  ;;  %v1007_v54 = vadd.f32 %v1005_v47, %v999_v51 }
 0x1f7   : > { %v989_v55 = vpop.f32.mrf.mxu0 }
 0x1f8   : > { %v1008_v56 = vadd.f32 %v1005_v47, %v1000_v53  ;;  %v1009_v57 = vmax.f32 %v1007_v54, 0.0 }
 0x1fa   : > { %v1010_v58 = vmax.f32 %v1008_v56, 0.0 }
 0x1fc   : > { %v1212_v59 = vpack.c.bf16 %v1010_v58, %v1009_v57 }
 0x1fe   : > { %1213 = vst.sshfl [vmem:[%s270_s19] sm:$0x33 pattern:$0x76325410] %v1212_v59 }
 0x1ff PF: > { %s14_s17 = sadd.s32 1, %s1285_s17   ;;  %s1503_s15 = smov %s1281_s16 }
 0x200   : > { %p11_p5 = scmp.ge.s32.totalorder %s14_s17, 4   ;;  %s1504_s16 = smov %s1506_s18 }
 0x202   :  { %13 = sbr.rel (!%p11_p5) target bundleno = 2 (0x2), region = 83 }

// kernel: wave_attention3_forward.6
= control target key start
LH: loop header
LB: loop body
LE: loop exit
PB: predicated region body
PF: predicated region fallthrough
CT: control target
= control target key end

     0   :  { %s1422_s15 = smov 0   ;;  %s1424_s16 = smov 0   ;;  %s1601_s0 = inlined_call_operand.vmem [shape: bf16[2,32,96], index: 0, kind: input, shape index: {}]   ;;  %s1602_s1 = inlined_call_operand.vmem [shape: bf16[9,16,32], index: 1, kind: input, shape index: {}]   ;;  %s1603_s2 = inlined_call_operand.vmem [shape: f32[16,1], index: 2, kind: input, shape index: {}]   ;;  %s1604_s3 = inlined_call_operand.vmem [shape: f32[16,1], index: 3, kind: input, shape index: {}]   ;;  %s1605_s4 = inlined_call_operand.vmem [shape: bf16[2,16,64], index: 4, kind: output, shape index: {}]  }
   0x1   :  { %s1426_s17 = smov 0  }
   0x2 LB: > { %s26_s18 = sadd.s32 1, %s1373_s16  ;;  %p1140_p0 = scmp.ge.s32.totalorder %s1377_s17, 1  ;;  %s1377_s17 = sphi %s1426_s17, %s14_s17   ;;  %s1373_s16 = sphi %s1424_s16, %s1607_s16   ;;  %s1369_s15 = sphi %s1422_s15, %s1606_s15  }
   0x3   : > { %p28_p1 = scmp.ge.s32.totalorder %s26_s18, 2  ;;  %p209_p2 = scmp.lt.s32.totalorder %s1377_s17, 3 }
   0x5   : > { %s1609_s18 = smov (%p28_p1, %s26_s18), 0  ;;  %p210_p3 = pnand %p1140_p0, %p209_p2 }
   0x6   : > { %p254_p4 = scmp.lt.s32.totalorder (!%p210_p3), %s1369_s15, 1  ;;  %s1380_s20 = smov (!%p210_p3), 7  }
   0x7   : > { %213 = sbr.rel (%p210_p3) target bundleno = 498 (0x1f2), region = 36  ;;  %s1381_s21 = smov (!%p210_p3), 15  }
   0x8   : > { %s1382_s25 = smov (!%p210_p3), 9   ;;  %s1383_s26 = smov (!%p210_p3), 17  }
   0x9   : > { %s1384_s27 = smov (!%p210_p3), 23   ;;  %s1385_s28 = smov (!%p210_p3), 25  }
   0xa   : > { %s1386_s29 = smov (!%p210_p3), 120   ;;  %s1389_s30 = smov (!%p210_p3), 121  }
   0xb   : > { %s1390_s5 = smov (!%p210_p3), 119   ;;  %s1391_s6 = smov (!%p210_p3), 113  }
   0xc   : > { %v294_v0 = vlaneseq  ;;  %v1379_v1 = vmov 0   ;;  %s1611_s15 = smov (!%p254_p4, %s1369_s15), 1  ;;  %v1387_v12 = vmov 0.0   ;;  %vm1388_vm4 = vmmov 0   ;;  %s1392_s7 = smov 112   ;;  %v1346_v44 = vld [vmem:[%s1602_s1 + $0x8] sm:$0xff]  }
   0xd   : > { %1343 = vset.pattern.permute.xlu1 %v1379_v1  ;;  %1342 = vset.pattern.permute.xlu0 %v1379_v1  ;;  %s1197_s19 = sshll.u32 %s1611_s15, 4  ;;  %vm347_vm10 = vcmask 261120   ;;  %s1393_s10 = smov 111   ;;  %v966_v57 = vld [vmem:[%s1603_s2] sm:$0xff]  ;;  %v967_v59 = vld [vmem:[%s1603_s2 + $0x8] sm:$0xff]  ;;  %vm1004_vm12 = vcmask 519168  }
   0xe   : > { %v295_v2 = vand.u32 127, %v294_v0  ;;  %s258_s24 = scalar_lea.vmem %s1601_s0, %s1197_s19  ;;  %1228 = vmatprep.subr.bf16.mxu0 %v1387_v12  ;;  %1232 = vmatprep.mubr.msk.bf16.mxu0 %vm1388_vm4, %v1387_v12  ;;  %s1394_s11 = smov 105   ;;  %v981_v60 = vld [vmem:[%s1604_s3 + $0x8] sm:$0xff]  ;;  %v980_v61 = vld [vmem:[%s1604_s3] sm:$0xff] }
   0xf   : > { %v1446_v6 = vld [vmem:[%s258_s24 + $0x8] sm:$0xf]  ;;  %v1448_v7 = vld [vmem:[%s258_s24 + $0xc] sm:$0xf]  ;;  %v1450_v8 = vld [vmem:[%s258_s24] sm:$0xf]  ;;  %1236 = vmatprep.subr.bf16.mxu1 %v1387_v12  ;;  %1240 = vmatprep.mubr.msk.bf16.mxu1 %vm1388_vm4, %v1387_v12 }
  0x10   : > { %v300_v3 = vand.u32 7, %v295_v2  ;;  %v1452_v9 = vld [vmem:[%s258_s24 + $0x4] sm:$0xf]  ;;  %v1456_v10 = vcombine.low %v1446_v6, %v1448_v7  ;;  %s1395_s12 = smov 104   ;;  %s1396_s13 = smov 103  }
  0x11   : > { %v1460_v11 = vcombine.low %v1450_v8, %v1452_v9 }
  0x12   : > { %vm308_vm0 = vcmp.ne.s32.totalorder %v300_v3, 0  ;;  %vm309_vm1 = vcmp.ne.s32.totalorder %v300_v3, 7 }
  0x13   : > { %vm312_vm2 = vmpackc.low %vm308_vm0, %vm308_vm0 }
  0x14   : > { %v313_v4 = vsel %vm312_vm2, 65537, %v1379_v1  ;;  %vm459_vm3 = vmpackc.low %vm309_vm1, %vm309_vm1 }
  0x15   : > { %314 = vrot.lane.b32.xlu0 %v313_v4, %s1380_s20  ;;  %538 = vrot.lane.b32.xlu1 %v313_v4, %s1381_s21  ;;  %v460_v5 = vsel %vm459_vm3, 65537, %v1379_v1  ;;  %v1347_v1 = vld [vmem:[%s1602_s1] sm:$0xff]   ;;  %s1198_s20 = sshll.u32 %s1611_s15, 3 }
  0x16   : > { %s285_s23 = scalar_lea.vmem %s1605_s4, %s1198_s20 }
  0x19   : > { %461 = vrot.lane.b32.xlu0 %v460_v5, %s1382_s25  ;;  %675 = vrot.lane.b32.xlu1 %v460_v5, %s1383_s26 }
  0x1d   : > { %752 = vrot.lane.b32.xlu0 %v313_v4, %s1384_s27  ;;  %889 = vrot.lane.b32.xlu1 %v460_v5, %s1385_s28  ;;  %v1348_v4 = vld [vmem:[%s1602_s1 + $0x10] sm:$0xff]  }
  0x21   : > { %343 = vrot.lane.b32.xlu0 %v1456_v10, %s1386_s29  ;;  %341 = vrot.lane.b32.xlu1 %v1460_v11, %s1386_s29 }
  0x87   : > { %v315_v13 = vpop.permute.xlu0 %314  ;;  %v539_v14 = vpop.permute.xlu1 %538 }
  0x88   : > { %vm316_vm5 = vcmp.ne.s16.totalorder %v315_v13, 0  ;;  %vm540_vm6 = vcmp.ne.s16.totalorder %v539_v14, 0  ;;  %v1351_v14 = vld [vmem:[%s1602_s1 + $0x28] sm:$0xff]  }
  0x89   : > { %v319_v15 = vsel %vm316_vm5, %v1446_v6, 0  ;;  %v320_v16 = vsel %vm316_vm5, %v1448_v7, 0  ;;  %v317_v18 = vsel %vm316_vm5, %v1450_v8, 0  ;;  %v318_v19 = vsel %vm316_vm5, %v1452_v9, 0 }
  0x8a   : > { %v1153_v17 = vcombine.low %v319_v15, %v320_v16  ;;  %v543_v23 = vsel %vm540_vm6, %v1446_v6, 0  ;;  %v544_v24 = vsel %vm540_vm6, %v1448_v7, 0  ;;  %v1152_v26 = vcombine.low %v317_v18, %v318_v19 }
  0x8b   : > { %v462_v20 = vpop.permute.xlu0 %461  ;;  %v676_v27 = vpop.permute.xlu1 %675  ;;  %v1165_v31 = vcombine.low %v543_v23, %v544_v24  ;;  %v541_v34 = vsel %vm540_vm6, %v1450_v8, 0  ;;  %v542_v35 = vsel %vm540_vm6, %v1452_v9, 0 }
  0x8c   : > { %vm463_vm7 = vcmp.ne.s16.totalorder %v462_v20, 0  ;;  %409 = vrot.lane.b32.xlu0 %v1153_v17, %s1389_s30  ;;  %vm677_vm8 = vcmp.ne.s16.totalorder %v676_v27, 0  ;;  %v1164_v39 = vcombine.low %v541_v34, %v542_v35  ;;  %v1352_v17 = vld [vmem:[%s1602_s1 + $0x30] sm:$0xff]   ;;  %v1353_v20 = vld [vmem:[%s1602_s1 + $0x38] sm:$0xff]  }
  0x8d   : > { %v466_v21 = vsel %vm463_vm7, %v1446_v6, 0  ;;  %v467_v22 = vsel %vm463_vm7, %v1448_v7, 0  ;;  %v464_v28 = vsel %vm463_vm7, %v1450_v8, 0  ;;  %v465_v29 = vsel %vm463_vm7, %v1452_v9, 0 }
  0x8e   : > { %v1159_v25 = vcombine.low %v466_v21, %v467_v22  ;;  %v1158_v32 = vcombine.low %v464_v28, %v465_v29  ;;  %v680_v37 = vsel %vm677_vm8, %v1446_v6, 0  ;;  %v681_v38 = vsel %vm677_vm8, %v1448_v7, 0  ;;  %v1354_v22 = vld [vmem:[%s1602_s1 + $0x40] sm:$0xff]  }
  0x8f   : > { %v753_v30 = vpop.permute.xlu0 %752  ;;  %v890_v33 = vpop.permute.xlu1 %889  ;;  %v1175_v41 = vcombine.low %v680_v37, %v681_v38  ;;  %v678_v45 = vsel %vm677_vm8, %v1450_v8, 0  ;;  %v679_v46 = vsel %vm677_vm8, %v1452_v9, 0 }
  0x90   : > { %488 = vrot.lane.b32.xlu1 %v1159_v25, %s1390_s5  ;;  %407 = vrot.lane.b32.xlu0 %v1152_v26, %s1389_s30  ;;  %vm754_vm9 = vcmp.ne.s16.totalorder %v753_v30, 0  ;;  %v1174_v48 = vcombine.low %v678_v45, %v679_v46  ;;  %vm891_vm11 = vcmp.ne.s16.totalorder %v890_v33, 0 }
  0x91   : > { %v757_v42 = vsel %vm754_vm9, %v1446_v6, 0  ;;  %v758_v43 = vsel %vm754_vm9, %v1448_v7, 0  ;;  %v755_v49 = vsel %vm754_vm9, %v1450_v8, 0  ;;  %v756_v50 = vsel %vm754_vm9, %v1452_v9, 0 }
  0x92   : > { %v1181_v47 = vcombine.low %v757_v42, %v758_v43  ;;  %v894_v51 = vsel %vm891_vm11, %v1446_v6, 0  ;;  %v895_v52 = vsel %vm891_vm11, %v1448_v7, 0  ;;  %v1180_v53 = vcombine.low %v755_v49, %v756_v50  ;;  %v1349_v7 = vld [vmem:[%s1602_s1 + $0x18] sm:$0xff]  }
  0x93   : > { %v344_v36 = vpop.permute.xlu0 %343  ;;  %v342_v40 = vpop.permute.xlu1 %341  ;;  %v1191_v54 = vcombine.low %v894_v51, %v895_v52  ;;  %v892_v55 = vsel %vm891_vm11, %v1450_v8, 0  ;;  %v893_v56 = vsel %vm891_vm11, %v1452_v9, 0 }
  0x94   : > { %486 = vrot.lane.b32.xlu1 %v1158_v32, %s1390_s5  ;;  %565 = vrot.lane.b32.xlu0 %v1165_v31, %s1391_s6  ;;  %v1190_v58 = vcombine.low %v892_v55, %v893_v56 }
  0x95   : > { %1229 = vmatpush3.bf16.msra.mxu0 %v344_v36 }
  0x96   : > { %1230 = vmatprep.subr.bf16.mxu0 %v1387_v12 }
  0x98   : > { %625 = vrot.lane.b32.xlu1 %v1456_v10, %s1392_s7  ;;  %563 = vrot.lane.b32.xlu0 %v1164_v39, %s1391_s6 }
  0x99   : > { %1231 = vmatpush3.bf16.msra.mxu0 %v342_v40 }
  0x9a   : > { %1244 = vmatprep.subr.bf16.mxu0 %v1387_v12 }
  0x9c   : > { %623 = vrot.lane.b32.xlu1 %v1460_v11, %s1392_s7  ;;  %702 = vrot.lane.b32.xlu0 %v1175_v41, %s1393_s10 }
  0x9d   : > { %1233 = vmatmul.mubr.msk.bf16.vlgmr.msra.gmra.mxu0 %vm347_vm10, %v1346_v44 }
  0x9e   : > { %1248 = vmatprep.mubr.msk.bf16.mxu0 %vm1388_vm4, %v1387_v12 }
  0xa0   : > { %779 = vrot.lane.b32.xlu1 %v1181_v47, %s1394_s11  ;;  %700 = vrot.lane.b32.xlu0 %v1174_v48, %s1393_s10 }
  0xa4   : > { %777 = vrot.lane.b32.xlu1 %v1180_v53, %s1394_s11  ;;  %839 = vrot.lane.b32.xlu0 %v1456_v10, %s1395_s12  ;;  %v1350_v10 = vld [vmem:[%s1602_s1 + $0x20] sm:$0xff]  }
  0xa8   : > { %916 = vrot.lane.b32.xlu1 %v1191_v54, %s1396_s13  ;;  %837 = vrot.lane.b32.xlu0 %v1460_v11, %s1395_s12 }
  0xac   : > { %914 = vrot.lane.b32.xlu1 %v1190_v58, %s1396_s13  ;;  %970 = vperm.xlu0 %1342, %v966_v57  }
  0xb0   : > { %975 = vperm.xlu1 %1343, %v967_v59   ;;  %989 = vperm.xlu0 %1342, %v981_v60  }
  0xb4   : > { %984 = vperm.xlu1 %1343, %v980_v61  }
  0xfe   : > { %v410_v62 = vpop.permute.xlu0 %409 }
  0xff   : > { %1237 = vmatpush3.bf16.msra.mxu1 %v410_v62 }
 0x100   : > { %1238 = vmatprep.subr.bf16.mxu1 %v1387_v12 }
 0x102   : > { %v489_v63 = vpop.permute.xlu1 %488  ;;  %v408_v0 = vpop.permute.xlu0 %407 }
 0x103   : > { %1239 = vmatpush3.bf16.msra.mxu1 %v408_v0  ;;  %1245 = vmatpush3.bf16.msra.mxu0 %v489_v63 }
 0x104   : > { %1246 = vmatprep.subr.bf16.mxu0 %v1387_v12  ;;  %1252 = vmatprep.subr.bf16.mxu1 %v1387_v12 }
 0x106   : > { %v487_v2 = vpop.permute.xlu1 %486  ;;  %1241 = vmatmul.mubr.msk.bf16.vlgmr.msra.gmra.mxu1 %vm347_vm10, %v1347_v1  ;;  %v566_v3 = vpop.permute.xlu0 %565 }
 0x107   : > { %1247 = vmatpush3.bf16.msra.mxu0 %v487_v2  ;;  %1253 = vmatpush3.bf16.msra.mxu1 %v566_v3 }
 0x108   : > { %1260 = vmatprep.subr.bf16.mxu0 %v1387_v12  ;;  %1254 = vmatprep.subr.bf16.mxu1 %v1387_v12 }
 0x109   : > { %1256 = vmatprep.mubr.msk.bf16.mxu1 %vm1388_vm4, %v1387_v12 }
 0x10a   : > { %1249 = vmatmul.mubr.msk.bf16.vlgmr.msra.gmra.mxu0 %vm347_vm10, %v1348_v4  ;;  %v626_v5 = vpop.permute.xlu1 %625  ;;  %v564_v6 = vpop.permute.xlu0 %563 }
 0x10b   : > { %1255 = vmatpush3.bf16.msra.mxu1 %v564_v6  ;;  %1261 = vmatpush3.bf16.msra.mxu0 %v626_v5 }
 0x10c   : > { %1262 = vmatprep.subr.bf16.mxu0 %v1387_v12  ;;  %1268 = vmatprep.subr.bf16.mxu1 %v1387_v12 }
 0x10d   : > { %1264 = vmatprep.mubr.msk.bf16.mxu0 %vm1388_vm4, %v1387_v12 }
 0x10e   : > { %v624_v8 = vpop.permute.xlu1 %623  ;;  %1257 = vmatmul.mubr.msk.bf16.vlgmr.msra.gmra.mxu1 %vm347_vm10, %v1349_v7  ;;  %v703_v9 = vpop.permute.xlu0 %702 }
 0x10f   : > { %1263 = vmatpush3.bf16.msra.mxu0 %v624_v8  ;;  %1269 = vmatpush3.bf16.msra.mxu1 %v703_v9 }
 0x110   : > { %1276 = vmatprep.subr.bf16.mxu0 %v1387_v12  ;;  %1270 = vmatprep.subr.bf16.mxu1 %v1387_v12 }
 0x111   : > { %1272 = vmatprep.mubr.msk.bf16.mxu1 %vm1388_vm4, %v1387_v12 }
 0x112   : > { %1265 = vmatmul.mubr.msk.bf16.vlgmr.msra.gmra.mxu0 %vm347_vm10, %v1350_v10  ;;  %v780_v11 = vpop.permute.xlu1 %779  ;;  %v701_v13 = vpop.permute.xlu0 %700 }
 0x113   : > { %1271 = vmatpush3.bf16.msra.mxu1 %v701_v13  ;;  %1277 = vmatpush3.bf16.msra.mxu0 %v780_v11 }
 0x114   : > { %1278 = vmatprep.subr.bf16.mxu0 %v1387_v12  ;;  %1284 = vmatprep.subr.bf16.mxu1 %v1387_v12 }
 0x115   : > { %1280 = vmatprep.mubr.msk.bf16.mxu0 %vm1388_vm4, %v1387_v12 }
 0x116   : > { %v778_v15 = vpop.permute.xlu1 %777  ;;  %1273 = vmatmul.mubr.msk.bf16.vlgmr.msra.gmra.mxu1 %vm347_vm10, %v1351_v14  ;;  %v840_v16 = vpop.permute.xlu0 %839 }
 0x117   : > { %1279 = vmatpush3.bf16.msra.mxu0 %v778_v15  ;;  %1285 = vmatpush3.bf16.msra.mxu1 %v840_v16 }
 0x118   : > { %1292 = vmatprep.subr.bf16.mxu0 %v1387_v12  ;;  %1286 = vmatprep.subr.bf16.mxu1 %v1387_v12 }
 0x119   : > { %1288 = vmatprep.mubr.msk.bf16.mxu1 %vm1388_vm4, %v1387_v12 }
 0x11a   : > { %1281 = vmatmul.mubr.msk.bf16.vlgmr.msra.gmra.mxu0 %vm347_vm10, %v1352_v17  ;;  %v917_v18 = vpop.permute.xlu1 %916  ;;  %v838_v19 = vpop.permute.xlu0 %837 }
 0x11b   : > { %1287 = vmatpush3.bf16.msra.mxu1 %v838_v19  ;;  %1293 = vmatpush3.bf16.msra.mxu0 %v917_v18 }
 0x11c   : > { %1294 = vmatprep.subr.bf16.mxu0 %v1387_v12  ;;  %1296 = vmatprep.mubr.msk.bf16.mxu0 %vm1388_vm4, %v1387_v12 }
 0x11e   : > { %v915_v21 = vpop.permute.xlu1 %914  ;;  %1289 = vmatmul.mubr.msk.bf16.vlgmr.msra.gmra.mxu1 %vm347_vm10, %v1353_v20 }
 0x11f   : > { %1295 = vmatpush3.bf16.msra.mxu0 %v915_v21 }
 0x122   : > { %1297 = vmatmul.mubr.msk.bf16.vlgmr.msra.gmra.mxu0 %vm347_vm10, %v1354_v22 }
 0x127   : > { %v971_v5 = vpop.permute.xlu0 %970 }
 0x12b   : > { %v976_v56 = vpop.permute.xlu1 %975  ;;  %v990_v18 = vpop.permute.xlu0 %989 }
 0x12f   : > { %v985_v6 = vpop.permute.xlu1 %984 }
 0x15d   : > { %v385_v23 = vpop.f32.mrf.mxu0 }
 0x15f   : > { %v1234_v24 = vpop.f32.mrf.mxu0 }
 0x161   : > { %v388_v25 = vpop.f32.mrf.mxu0 }
 0x163   : > { %v1235_v26 = vpop.f32.mrf.mxu0 }
 0x1c6   : > { %v450_v27 = vpop.f32.mrf.mxu1 }
 0x1c7   : > { %v451_v40 = vadd.f32 %v450_v27, %v385_v23 }
 0x1c8   : > { %v1242_v28 = vpop.f32.mrf.mxu1 }
 0x1ca   : > { %v453_v29 = vpop.f32.mrf.mxu1  ;;  %v529_v30 = vpop.f32.mrf.mxu0 }
 0x1cb   : > { %v536_v43 = vadd.f32 %v529_v30, %v451_v40  ;;  %v454_v46 = vadd.f32 %v453_v29, %v388_v25 }
 0x1cc   : > { %v1243_v31 = vpop.f32.mrf.mxu1  ;;  %v1250_v12 = vpop.f32.mrf.mxu0 }
 0x1ce   : > { %v532_v32 = vpop.f32.mrf.mxu0  ;;  %v606_v33 = vpop.f32.mrf.mxu1 }
 0x1cf   : > { %v613_v47 = vadd.f32 %v606_v33, %v536_v43  ;;  %v537_v50 = vadd.f32 %v532_v32, %v454_v46 }
 0x1d0   : > { %v1251_v34 = vpop.f32.mrf.mxu0  ;;  %v1258_v35 = vpop.f32.mrf.mxu1 }
 0x1d2   : > { %v609_v36 = vpop.f32.mrf.mxu1  ;;  %v666_v37 = vpop.f32.mrf.mxu0 }
 0x1d3   : > { %v673_v51 = vadd.f32 %v666_v37, %v613_v47  ;;  %v614_v54 = vadd.f32 %v609_v36, %v537_v50 }
 0x1d4   : > { %v1259_v38 = vpop.f32.mrf.mxu1  ;;  %v1266_v39 = vpop.f32.mrf.mxu0 }
 0x1d6   : > { %v669_v41 = vpop.f32.mrf.mxu0  ;;  %v743_v42 = vpop.f32.mrf.mxu1 }
 0x1d7   : > { %v750_v55 = vadd.f32 %v743_v42, %v673_v51  ;;  %v674_v59 = vadd.f32 %v669_v41, %v614_v54 }
 0x1d8   : > { %v1267_v44 = vpop.f32.mrf.mxu0  ;;  %v1274_v45 = vpop.f32.mrf.mxu1 }
 0x1da   : > { %v746_v48 = vpop.f32.mrf.mxu1  ;;  %v820_v49 = vpop.f32.mrf.mxu0 }
 0x1db   : > { %v827_v60 = vadd.f32 %v820_v49, %v750_v55  ;;  %v751_v63 = vadd.f32 %v746_v48, %v674_v59 }
 0x1dc   : > { %v1275_v52 = vpop.f32.mrf.mxu1  ;;  %v1282_v53 = vpop.f32.mrf.mxu0 }
 0x1de   : > { %v823_v57 = vpop.f32.mrf.mxu0  ;;  %v880_v58 = vpop.f32.mrf.mxu1 }
 0x1df   : > { %v887_v0 = vadd.f32 %v880_v58, %v827_v60  ;;  %v828_v3 = vadd.f32 %v823_v57, %v751_v63 }
 0x1e0   : > { %v1283_v61 = vpop.f32.mrf.mxu0  ;;  %v1290_v62 = vpop.f32.mrf.mxu1 }
 0x1e2   : > { %v957_v1 = vpop.f32.mrf.mxu0  ;;  %v883_v2 = vpop.f32.mrf.mxu1 }
 0x1e3   : > { %v964_v4 = vadd.f32 %v957_v1, %v887_v0  ;;  %v888_v9 = vadd.f32 %v883_v2, %v828_v3 }
 0x1e4   : > { %v1291_v7 = vpop.f32.mrf.mxu1  ;;  %v1298_v8 = vpop.f32.mrf.mxu0 }
 0x1e5   : > { %v978_v10 = vmul.f32 %v971_v5, %v964_v4 }
 0x1e6   : > { %v960_v11 = vpop.f32.mrf.mxu0 }
 0x1e7   : > { %v965_v13 = vadd.f32 %v960_v11, %v888_v9  ;;  %v992_v14 = vadd.f32 %v985_v6, %v978_v10 }
 0x1e8   : > { %v1299_v15 = vpop.f32.mrf.mxu0 }
 0x1e9   : > { %v994_v16 = vmax.f32 %v992_v14, 0.0  ;;  %v979_v17 = vmul.f32 %v976_v56, %v965_v13 }
 0x1eb   : > { %v1199_v19 = vpack.c.bf16 %v994_v16, %v994_v16  ;;  %v993_v20 = vadd.f32 %v990_v18, %v979_v17 }
 0x1ed   : > { %1005 = vst.msk [vmem:[%s285_s23] sm:$0xf] %vm1004_vm12, %v1199_v19  ;;  %v995_v21 = vmax.f32 %v993_v20, 0.0 }
 0x1ef   : > { %v1200_v22 = vpack.c.bf16 %v995_v21, %v995_v21 }
 0x1f1   : > { %1006 = vst.msk [vmem:[%s285_s23 + $0x4] sm:$0xf] %vm1004_vm12, %v1200_v22 }
 0x1f2 PF: > { %s14_s17 = sadd.s32 1, %s1377_s17   ;;  %s1606_s15 = smov %s1373_s16 }
 0x1f3   : > { %p11_p5 = scmp.ge.s32.totalorder %s14_s17, 4   ;;  %s1607_s16 = smov %s1609_s18 }
 0x1f5   :  { %13 = sbr.rel (!%p11_p5) target bundleno = 2 (0x2), region = 83 }

// kernel: wave_attention3_forward.7
= control target key start
LH: loop header
LB: loop body
LE: loop exit
PB: predicated region body
PF: predicated region fallthrough
CT: control target
= control target key end

     0   :  { %s962_s15 = smov 0   ;;  %s964_s16 = smov 0   ;;  %s1078_s0 = inlined_call_operand.vmem [shape: bf16[2,4,256], index: 0, kind: input, shape index: {}]   ;;  %s1079_s1 = inlined_call_operand.vmem [shape: bf16[16,4], index: 1, kind: input, shape index: {}]   ;;  %s1080_s2 = inlined_call_operand.vmem [shape: f32[16,1], index: 2, kind: input, shape index: {}]   ;;  %s1081_s3 = inlined_call_operand.vmem [shape: bf16[2,8,256], index: 3, kind: output, shape index: {0}]   ;;  %s1082_s4 = inlined_call_operand.vmem [shape: bf16[2,256,8], index: 4, kind: output, shape index: {1}]  }
   0x1   :  { %s966_s17 = smov 0  }
   0x2 LB: > { %s27_s18 = sadd.s32 1, %s930_s16  ;;  %p720_p0 = scmp.ge.s32.totalorder %s934_s17, 1  ;;  %s934_s17 = sphi %s966_s17, %s15_s17   ;;  %s930_s16 = sphi %s964_s16, %s1084_s16   ;;  %s926_s15 = sphi %s962_s15, %s1083_s15  }
   0x3   : > { %p29_p1 = scmp.ge.s32.totalorder %s27_s18, 2  ;;  %p188_p2 = scmp.lt.s32.totalorder %s934_s17, 3 }
   0x5   : > { %s1086_s18 = smov (%p29_p1, %s27_s18), 0  ;;  %p189_p3 = pnand %p720_p0, %p188_p2 }
   0x6   : > { %p232_p4 = scmp.lt.s32.totalorder (!%p189_p3), %s926_s15, 1 }
   0x7   : > { %192 = sbr.rel (%p189_p3) target bundleno = 415 (0x19f), region = 32 }
   0xc   : > { %v936_v0 = vmov 0   ;;  %v266_v1 = vld [vmem:[%s1080_s2 + $0x8] sm:$0xff]  ;;  %s1088_s15 = smov (!%p232_p4, %s926_s15), 1  ;;  %v265_v2 = vld [vmem:[%s1080_s2] sm:$0xff]  ;;  %vm295_vm0 = vcmask 1041408   ;;  %vm291_vm1 = vcmask 31744  }
   0xd   : > { %334 = vmatprep.mubr.bf16.mxu0 %v936_v0  ;;  %828 = vset.pattern.permute.xlu0 %v936_v0  ;;  %s766_s23 = sshll.u32 %s1088_s15, 2  ;;  %v911_v6 = vld [vmem:[%s1079_s1] sm:$0xff]   ;;  %s767_s29 = sshll.u32 %s1088_s15, 3  ;;  %vm546_vm2 = vcmask 60416  }
   0xe   : > { %274 = vperm.xlu0 %828, %v266_v1   ;;  %s239_s26 = scalar_lea.vmem %s1078_s0, %s766_s23  ;;  %s249_s6 = scalar_lea.vmem %s1081_s3, %s767_s29 }
   0xf   : > { %v728_v3 = vld.sshfl [vmem:[%s239_s26] sm:$0x33 pattern:$0x76325410]  ;;  %s768_s7 = sshll.u32 %s1088_s15, 7 }
  0x10   : > { %v290_v4 = vcombine.high %v728_v3, %v728_v3  ;;  %v297_v5 = vsel %vm295_vm0, %v728_v3, 0  ;;  %s1003_s10 = scalar_lea.vmem %s1082_s4, %s768_s7 }
  0x12   : > { %269 = vperm.xlu0 %828, %v265_v2   ;;  %729 = vmatprep.subr.msk.bf16.mxu0 %vm295_vm0, %v290_v4 }
  0x13   : > { %317 = vmatpush1.bf16.msra.mxu0 %v297_v5 }
  0x16   : > { %730 = vmatmul.mubr.msk.bf16.vlgmr.msra.gmra.mxu0 %vm291_vm1, %v911_v6 }
  0x89   : > { %v275_v7 = vpop.permute.xlu0 %274 }
  0x8d   : > { %v270_v8 = vpop.permute.xlu0 %269 }
  0xd6   : > { %v336_v9 = vpop.f32.mrf.mxu0 }
  0xd7   : > { %v337_v11 = vadd.f32 %v336_v9, %v270_v8 }
  0xd8   : > { %v338_v10 = vpop.f32.mrf.mxu0 }
  0xd9   : > { %v339_v12 = vadd.f32 %v338_v10, %v270_v8 }
  0xda   : > { %v340_v13 = vpop.f32.mrf.mxu0 }
  0xdb   : > { %v769_v14 = vpack.c.bf16 %v339_v12, %v337_v11  ;;  %v341_v16 = vadd.f32 %v340_v13, %v275_v7 }
  0xdc   : > { %v342_v15 = vpop.f32.mrf.mxu0 }
  0xdd   : > { %353 = vst [vmem:[%s249_s6] sm:$0xff] %v769_v14  ;;  %v343_v17 = vadd.f32 %v342_v15, %v275_v7 }
  0xdf   : > { %v829_v18 = vpack.i.bf16 %v343_v17, %v341_v16 }
  0xe1   : > { %830 = vxpose.xlu1.b32.start.end [1/1] (short) %v829_v18, 128 }
 0x15d   : > { %v831_v19 = vpop.trf.xlu1 }
 0x15e   : > { %v835_v20 = vunpack.i.h.bf16 %v831_v19  ;;  %v832_v21 = vunpack.i.l.bf16 %v831_v19 }
 0x160   : > { %v786_v22 = vpack.c.bf16 %v835_v20, %v835_v20  ;;  %v770_v23 = vpack.c.bf16 %v832_v21, %v832_v21 }
 0x161   : > { %v836_v24 = vpop.trf.xlu1 }
 0x162   : > { %563 = vst.msk [vmem:[%s1003_s10 + $0x40] sm:$0xf] %vm546_vm2, %v786_v22  ;;  %547 = vst.msk [vmem:[%s1003_s10] sm:$0xf] %vm546_vm2, %v770_v23  ;;  %v840_v25 = vunpack.i.h.bf16 %v836_v24  ;;  %v837_v26 = vunpack.i.l.bf16 %v836_v24 }
 0x164   : > { %v787_v27 = vpack.c.bf16 %v840_v25, %v840_v25  ;;  %v771_v28 = vpack.c.bf16 %v837_v26, %v837_v26 }
 0x165   : > { %v841_v29 = vpop.trf.xlu1 }
 0x166   : > { %564 = vst.msk [vmem:[%s1003_s10 + $0x44] sm:$0xf] %vm546_vm2, %v787_v27  ;;  %548 = vst.msk [vmem:[%s1003_s10 + $0x4] sm:$0xf] %vm546_vm2, %v771_v28  ;;  %v845_v30 = vunpack.i.h.bf16 %v841_v29  ;;  %v842_v31 = vunpack.i.l.bf16 %v841_v29 }
 0x168   : > { %v788_v32 = vpack.c.bf16 %v845_v30, %v845_v30  ;;  %v772_v33 = vpack.c.bf16 %v842_v31, %v842_v31 }
 0x169   : > { %v846_v34 = vpop.trf.xlu1 }
 0x16a   : > { %565 = vst.msk [vmem:[%s1003_s10 + $0x48] sm:$0xf] %vm546_vm2, %v788_v32  ;;  %549 = vst.msk [vmem:[%s1003_s10 + $0x8] sm:$0xf] %vm546_vm2, %v772_v33  ;;  %v850_v35 = vunpack.i.h.bf16 %v846_v34  ;;  %v847_v36 = vunpack.i.l.bf16 %v846_v34 }
 0x16c   : > { %v789_v37 = vpack.c.bf16 %v850_v35, %v850_v35  ;;  %v773_v38 = vpack.c.bf16 %v847_v36, %v847_v36 }
 0x16d   : > { %v851_v39 = vpop.trf.xlu1 }
 0x16e   : > { %566 = vst.msk [vmem:[%s1003_s10 + $0x4c] sm:$0xf] %vm546_vm2, %v789_v37  ;;  %550 = vst.msk [vmem:[%s1003_s10 + $0xc] sm:$0xf] %vm546_vm2, %v773_v38  ;;  %v855_v40 = vunpack.i.h.bf16 %v851_v39  ;;  %v852_v41 = vunpack.i.l.bf16 %v851_v39 }
 0x170   : > { %v790_v42 = vpack.c.bf16 %v855_v40, %v855_v40  ;;  %v774_v43 = vpack.c.bf16 %v852_v41, %v852_v41 }
 0x171   : > { %v856_v44 = vpop.trf.xlu1 }
 0x172   : > { %567 = vst.msk [vmem:[%s1003_s10 + $0x50] sm:$0xf] %vm546_vm2, %v790_v42  ;;  %551 = vst.msk [vmem:[%s1003_s10 + $0x10] sm:$0xf] %vm546_vm2, %v774_v43  ;;  %v860_v45 = vunpack.i.h.bf16 %v856_v44  ;;  %v857_v46 = vunpack.i.l.bf16 %v856_v44 }
 0x174   : > { %v791_v47 = vpack.c.bf16 %v860_v45, %v860_v45  ;;  %v775_v48 = vpack.c.bf16 %v857_v46, %v857_v46 }
 0x175   : > { %v861_v49 = vpop.trf.xlu1 }
 0x176   : > { %568 = vst.msk [vmem:[%s1003_s10 + $0x54] sm:$0xf] %vm546_vm2, %v791_v47  ;;  %552 = vst.msk [vmem:[%s1003_s10 + $0x14] sm:$0xf] %vm546_vm2, %v775_v48  ;;  %v865_v50 = vunpack.i.h.bf16 %v861_v49  ;;  %v862_v51 = vunpack.i.l.bf16 %v861_v49 }
 0x178   : > { %v792_v52 = vpack.c.bf16 %v865_v50, %v865_v50  ;;  %v776_v53 = vpack.c.bf16 %v862_v51, %v862_v51 }
 0x179   : > { %v866_v54 = vpop.trf.xlu1 }
 0x17a   : > { %569 = vst.msk [vmem:[%s1003_s10 + $0x58] sm:$0xf] %vm546_vm2, %v792_v52  ;;  %553 = vst.msk [vmem:[%s1003_s10 + $0x18] sm:$0xf] %vm546_vm2, %v776_v53  ;;  %v870_v55 = vunpack.i.h.bf16 %v866_v54  ;;  %v867_v56 = vunpack.i.l.bf16 %v866_v54 }
 0x17c   : > { %v793_v57 = vpack.c.bf16 %v870_v55, %v870_v55  ;;  %v777_v58 = vpack.c.bf16 %v867_v56, %v867_v56 }
 0x17d   : > { %v871_v59 = vpop.trf.xlu1 }
 0x17e   : > { %570 = vst.msk [vmem:[%s1003_s10 + $0x5c] sm:$0xf] %vm546_vm2, %v793_v57  ;;  %554 = vst.msk [vmem:[%s1003_s10 + $0x1c] sm:$0xf] %vm546_vm2, %v777_v58  ;;  %v875_v60 = vunpack.i.h.bf16 %v871_v59  ;;  %v872_v61 = vunpack.i.l.bf16 %v871_v59 }
 0x180   : > { %v794_v62 = vpack.c.bf16 %v875_v60, %v875_v60  ;;  %v778_v63 = vpack.c.bf16 %v872_v61, %v872_v61 }
 0x181   : > { %v876_v0 = vpop.trf.xlu1 }
 0x182   : > { %571 = vst.msk [vmem:[%s1003_s10 + $0x60] sm:$0xf] %vm546_vm2, %v794_v62  ;;  %555 = vst.msk [vmem:[%s1003_s10 + $0x20] sm:$0xf] %vm546_vm2, %v778_v63  ;;  %v880_v1 = vunpack.i.h.bf16 %v876_v0  ;;  %v877_v2 = vunpack.i.l.bf16 %v876_v0 }
 0x184   : > { %v795_v3 = vpack.c.bf16 %v880_v1, %v880_v1  ;;  %v779_v4 = vpack.c.bf16 %v877_v2, %v877_v2 }
 0x185   : > { %v881_v5 = vpop.trf.xlu1 }
 0x186   : > { %572 = vst.msk [vmem:[%s1003_s10 + $0x64] sm:$0xf] %vm546_vm2, %v795_v3  ;;  %556 = vst.msk [vmem:[%s1003_s10 + $0x24] sm:$0xf] %vm546_vm2, %v779_v4  ;;  %v885_v6 = vunpack.i.h.bf16 %v881_v5  ;;  %v882_v7 = vunpack.i.l.bf16 %v881_v5 }
 0x188   : > { %v796_v8 = vpack.c.bf16 %v885_v6, %v885_v6  ;;  %v780_v9 = vpack.c.bf16 %v882_v7, %v882_v7 }
 0x189   : > { %v886_v10 = vpop.trf.xlu1 }
 0x18a   : > { %573 = vst.msk [vmem:[%s1003_s10 + $0x68] sm:$0xf] %vm546_vm2, %v796_v8  ;;  %557 = vst.msk [vmem:[%s1003_s10 + $0x28] sm:$0xf] %vm546_vm2, %v780_v9  ;;  %v890_v11 = vunpack.i.h.bf16 %v886_v10  ;;  %v887_v12 = vunpack.i.l.bf16 %v886_v10 }
 0x18c   : > { %v797_v13 = vpack.c.bf16 %v890_v11, %v890_v11  ;;  %v781_v14 = vpack.c.bf16 %v887_v12, %v887_v12 }
 0x18d   : > { %v891_v15 = vpop.trf.xlu1 }
 0x18e   : > { %574 = vst.msk [vmem:[%s1003_s10 + $0x6c] sm:$0xf] %vm546_vm2, %v797_v13  ;;  %558 = vst.msk [vmem:[%s1003_s10 + $0x2c] sm:$0xf] %vm546_vm2, %v781_v14  ;;  %v895_v16 = vunpack.i.h.bf16 %v891_v15  ;;  %v892_v17 = vunpack.i.l.bf16 %v891_v15 }
 0x190   : > { %v798_v18 = vpack.c.bf16 %v895_v16, %v895_v16  ;;  %v782_v19 = vpack.c.bf16 %v892_v17, %v892_v17 }
 0x191   : > { %v896_v20 = vpop.trf.xlu1 }
 0x192   : > { %575 = vst.msk [vmem:[%s1003_s10 + $0x70] sm:$0xf] %vm546_vm2, %v798_v18  ;;  %559 = vst.msk [vmem:[%s1003_s10 + $0x30] sm:$0xf] %vm546_vm2, %v782_v19  ;;  %v900_v21 = vunpack.i.h.bf16 %v896_v20  ;;  %v897_v22 = vunpack.i.l.bf16 %v896_v20 }
 0x194   : > { %v799_v23 = vpack.c.bf16 %v900_v21, %v900_v21  ;;  %v783_v24 = vpack.c.bf16 %v897_v22, %v897_v22 }
 0x195   : > { %v901_v25 = vpop.trf.xlu1 }
 0x196   : > { %576 = vst.msk [vmem:[%s1003_s10 + $0x74] sm:$0xf] %vm546_vm2, %v799_v23  ;;  %560 = vst.msk [vmem:[%s1003_s10 + $0x34] sm:$0xf] %vm546_vm2, %v783_v24  ;;  %v905_v26 = vunpack.i.h.bf16 %v901_v25  ;;  %v902_v27 = vunpack.i.l.bf16 %v901_v25 }
 0x198   : > { %v800_v28 = vpack.c.bf16 %v905_v26, %v905_v26  ;;  %v784_v29 = vpack.c.bf16 %v902_v27, %v902_v27 }
 0x199   : > { %v906_v30 = vpop.trf.xlu1 }
 0x19a   : > { %577 = vst.msk [vmem:[%s1003_s10 + $0x78] sm:$0xf] %vm546_vm2, %v800_v28  ;;  %561 = vst.msk [vmem:[%s1003_s10 + $0x38] sm:$0xf] %vm546_vm2, %v784_v29  ;;  %v910_v31 = vunpack.i.h.bf16 %v906_v30  ;;  %v907_v32 = vunpack.i.l.bf16 %v906_v30 }
 0x19c   : > { %v801_v33 = vpack.c.bf16 %v910_v31, %v910_v31  ;;  %v785_v34 = vpack.c.bf16 %v907_v32, %v907_v32 }
 0x19e   : > { %578 = vst.msk [vmem:[%s1003_s10 + $0x7c] sm:$0xf] %vm546_vm2, %v801_v33  ;;  %562 = vst.msk [vmem:[%s1003_s10 + $0x3c] sm:$0xf] %vm546_vm2, %v785_v34 }
 0x19f PF: > { %s15_s17 = sadd.s32 1, %s934_s17   ;;  %s1083_s15 = smov %s930_s16 }
 0x1a0   : > { %p12_p5 = scmp.ge.s32.totalorder %s15_s17, 4   ;;  %s1084_s16 = smov %s1086_s18 }
 0x1a2   :  { %14 = sbr.rel (!%p12_p5) target bundleno = 2 (0x2), region = 74 }

// kernel: wave_attention3_forward.8
= control target key start
LH: loop header
LB: loop body
LE: loop exit
PB: predicated region body
PF: predicated region fallthrough
CT: control target
= control target key end

     0   :  { %s1478_s18 = smov 0   ;;  %s1480_s19 = smov 0   ;;  %s1702_s0 = inlined_call_operand.vmem [shape: bf16[2,4,256], index: 0, kind: input, shape index: {}]   ;;  %s1703_s1 = inlined_call_operand.vmem [shape: bf16[8,4], index: 1, kind: input, shape index: {}]   ;;  %s1704_s2 = inlined_call_operand.vmem [shape: f32[8,1], index: 2, kind: input, shape index: {}]   ;;  %s1705_s3 = inlined_call_operand.vmem [shape: bf16[2,8,256], index: 3, kind: input, shape index: {}]   ;;  %s1706_s4 = inlined_call_operand.vmem [shape: bf16[2,256,8], index: 4, kind: input, shape index: {}]   ;;  %s1707_s5 = inlined_call_operand.vmem [shape: bf16[2,4,256], index: 5, kind: output, shape index: {}]  }
   0x1   :  { %s1482_s20 = smov 0   ;;  %s1484_s21 = smov 0  }
   0x2   :  { %s1486_s22 = smov 0  }
   0x3 LB: > { %s24_s23 = sadd.s32 1, %s1435_s20  ;;  %s27_s24 = sadd.s32 1, %s1439_s21  ;;  %s1443_s22 = sphi %s1486_s22, %s15_s22   ;;  %s1439_s21 = sphi %s1484_s21, %s1711_s21   ;;  %s1435_s20 = sphi %s1482_s20, %s1710_s20   ;;  %s1431_s19 = sphi %s1480_s19, %s1709_s19   ;;  %s1427_s18 = sphi %s1478_s18, %s1708_s18  }
   0x4   : > { %p25_p0 = scmp.ge.s32.totalorder %s24_s23, 2  ;;  %p1150_p1 = scmp.ge.s32.totalorder %s1443_s22, 1 }
   0x5   : > { %p226_p2 = scmp.lt.s32.totalorder %s1443_s22, 5 }
   0x6   : > { %s1713_s23 = smov (%p25_p0, %s24_s23), 0  ;;  %s1715_s24 = smov (!%p25_p0, %s27_s24), %s1439_s21 }
   0x7   : > { %p227_p3 = pnand %p1150_p1, %p226_p2  ;;  %p29_p4 = scmp.ge.s32.totalorder %s1715_s24, 2 }
   0x8   : > { %p270_p5 = scmp.lt.s32.totalorder (!%p227_p3), %s1431_s19, 1  ;;  %p272_p6 = scmp.lt.s32.totalorder (!%p227_p3), %s1427_s18, 1 }
   0x9   : > { %s1717_s24 = smov (%p29_p4, %s1715_s24), 0  ;;  %230 = sbr.rel (%p227_p3) target bundleno = 1009 (0x3f1), region = 40 }
   0xe   : > { %v1445_v0 = vmov 0.0   ;;  %vm1446_vm0 = vmmov 0   ;;  %v299_v1 = vld [vmem:[%s1704_s2] sm:$0xff]  ;;  %s1719_s19 = smov (!%p270_p5, %s1431_s19), 1  ;;  %v1447_v2 = vmov 0   ;;  %s1721_s18 = smov (!%p272_p6, %s1427_s18), 1 }
   0xf   : > { %1257 = vmatprep.subr.bf16.mxu0 %v1445_v0  ;;  %1259 = vmatprep.mubr.msk.bf16.mxu0 %vm1446_vm0, %v1445_v0  ;;  %s1151_s27 = sshll.u32 %s1719_s19, 1  ;;  %s1190_s28 = sshll.u32 %s1719_s19, 7  ;;  %vm309_vm1 = vcmask 1041408   ;;  %v298_v4 = vld [vmem:[%s1703_s1] sm:$0xf]  ;;  %vm305_vm2 = vcmask 31744  }
  0x10   : > { %1322 = vset.pattern.permute.xlu0 %v1447_v2  ;;  %440 = vmatprep.mubr.bf16.mxu1 %v1447_v2  ;;  %s1511_s29 = sadd.s32 %s1151_s27, %s1721_s18  ;;  %s1516_s7 = scalar_lea.vmem %s1706_s4, %s1190_s28  ;;  %vm401_vm3 = vcmask 1043456   ;;  %vm376_vm4 = vcmask 64512  }
  0x11   : > { %302 = vperm.xlu0 %1322, %v299_v1   ;;  %s1152_s8 = sshll.u32 %s1511_s29, 1  ;;  %s1189_s14 = sshll.u32 %s1719_s19, 3  ;;  %v1325_v25 = vld [vmem:[%s1516_s7 + $0x78] sm:$0xff]   ;;  %v1327_v27 = vld [vmem:[%s1516_s7 + $0x70] sm:$0xff]   ;;  %v1329_v41 = vld [vmem:[%s1516_s7 + $0x68] sm:$0xff]  }
  0x12   : > { %s277_s11 = scalar_lea.vmem %s1702_s0, %s1152_s8  ;;  %s282_s17 = scalar_lea.vmem %s1705_s3, %s1189_s14  ;;  %v1326_v26 = vld [vmem:[%s1516_s7 + $0x38] sm:$0xff]   ;;  %v1328_v28 = vld [vmem:[%s1516_s7 + $0x30] sm:$0xff]   ;;  %v1330_v42 = vld [vmem:[%s1516_s7 + $0x28] sm:$0xff]  }
  0x13   : > { %v297_v3 = vld [vmem:[%s277_s11] sm:$0x3]  ;;  %v1333_v52 = vld [vmem:[%s1516_s7 + $0x58] sm:$0xff]   ;;  %v1335_v57 = vld [vmem:[%s1516_s7 + $0x50] sm:$0xff]   ;;  %s295_s25 = scalar_lea.vmem %s1707_s5, %s1152_s8 }
  0x14   : > { %v311_v5 = vsel %vm309_vm1, %v297_v3, 0  ;;  %v353_v6 = vld [vmem:[%s282_s17] sm:$0xff]  ;;  %v1334_v53 = vld [vmem:[%s1516_s7 + $0x18] sm:$0xff]   ;;  %v1336_v58 = vld [vmem:[%s1516_s7 + $0x10] sm:$0xff]  }
  0x15   : > { %1258 = vmatpush3.bf16.msra.mxu0 %v311_v5  ;;  %v1161_v7 = vcombine.high %v353_v6, %v353_v6  ;;  %v1160_v8 = vcombine.low %v353_v6, %v353_v6  ;;  %v1331_v47 = vld [vmem:[%s1516_s7 + $0x60] sm:$0xff]   ;;  %v1337_v62 = vld [vmem:[%s1516_s7 + $0x48] sm:$0xff]  }
  0x16   : > { %1193 = vmatprep.subr.bf16.mxu0 %v1325_v25  ;;  %v1332_v48 = vld [vmem:[%s1516_s7 + $0x20] sm:$0xff]   ;;  %v1338_v63 = vld [vmem:[%s1516_s7 + $0x8] sm:$0xff]  }
  0x17   : > { %1162 = vmatprep.subr.msk.bf16.mxu1 %vm401_vm3, %v1161_v7  ;;  %v403_v9 = vsel %vm401_vm3, %v1160_v8, 0  ;;  %v1339_v3 = vld [vmem:[%s1516_s7 + $0x40] sm:$0xff]  }
  0x18   : > { %1260 = vmatmul.mubr.msk.bf16.vlgmr.msra.gmra.mxu0 %vm305_vm2, %v298_v4  ;;  %423 = vmatpush1.bf16.msra.mxu1 %v403_v9  ;;  %v1340_v4 = vld [vmem:[%s1516_s7] sm:$0xff]  }
  0x19   : > { %1263 = vmatprep.subr.bf16.mxu1 %v1325_v25  ;;  %1194 = vmatpush3.bf16.msra.mxu0 %v1326_v26 }
  0x1a   : > { %1195 = vmatprep.subr.bf16.mxu0 %v1327_v27 }
  0x1d   : > { %1196 = vmatpush3.bf16.msra.mxu0 %v1328_v28 }
  0x1e   : > { %1197 = vmatprep.subr.bf16.mxu0 %v1329_v41 }
  0x21   : > { %1198 = vmatpush3.bf16.msra.mxu0 %v1330_v42 }
  0x22   : > { %1199 = vmatprep.subr.bf16.mxu0 %v1331_v47 }
  0x25   : > { %1200 = vmatpush3.bf16.msra.mxu0 %v1332_v48 }
  0x26   : > { %1201 = vmatprep.subr.bf16.mxu0 %v1333_v52 }
  0x29   : > { %1202 = vmatpush3.bf16.msra.mxu0 %v1334_v53 }
  0x2a   : > { %1203 = vmatprep.subr.bf16.mxu0 %v1335_v57 }
  0x2d   : > { %1204 = vmatpush3.bf16.msra.mxu0 %v1336_v58 }
  0x2e   : > { %1205 = vmatprep.subr.bf16.mxu0 %v1337_v62 }
  0x31   : > { %1206 = vmatpush3.bf16.msra.mxu0 %v1338_v63 }
  0x32   : > { %1207 = vmatprep.subr.bf16.mxu0 %v1339_v3 }
  0x35   : > { %1208 = vmatpush3.bf16.msra.mxu0 %v1340_v4 }
  0x8c   : > { %v303_v10 = vpop.permute.xlu0 %302 }
  0xd8   : > { %v347_v11 = vpop.f32.mrf.mxu0 }
  0xd9   : > { %v348_v12 = vadd.f32 %v347_v11, %v303_v10 }
  0xda   : > { %v1261_v13 = vpop.f32.mrf.mxu0 }
  0xdb   : > { %v354_v14 = vpack.c.bf16 %v348_v12, %v348_v12 }
  0xdc   : > { %v350_v15 = vpop.f32.mrf.mxu0 }
  0xdd   : > { %355 = vxpose.xlu0.c.b16.start.end [1/1] (short) %v354_v14, 128 }
  0xde   : > { %v1262_v16 = vpop.f32.mrf.mxu0 }
 0x13f   : > { %v363_v17 = vpop.trf.xlu0 }
 0x140   : > { %1163 = vmatmul.mubr.msk.bf16.vlgmr.msra.gmra.mxu1 %vm376_vm4, %v363_v17 }
 0x141   : > { %450 = vmatprep.mubr.bf16.mxu1 %v1447_v2  ;;  %1271 = vmatpush3.bf16.msra.mxu1 %v1326_v26 }
 0x142   : > { %1264 = vmatprep.subr.bf16.mxu1 %v1327_v27 }
 0x143   : > { %v364_v18 = vpop.trf.xlu0 }
 0x145   : > { %1272 = vmatpush3.bf16.msra.mxu1 %v1328_v28 }
 0x146   : > { %1265 = vmatprep.subr.bf16.mxu1 %v1329_v41 }
 0x147   : > { %v365_v19 = vpop.trf.xlu0 }
 0x148   : > { %1164 = vmatmul.mubr.msk.bf16.gmra.mxu1 %vm376_vm4, %v364_v18 }
 0x149   : > { %460 = vmatprep.mubr.bf16.mxu1 %v1447_v2  ;;  %1273 = vmatpush3.bf16.msra.mxu1 %v1330_v42 }
 0x14a   : > { %1266 = vmatprep.subr.bf16.mxu1 %v1331_v47 }
 0x14b   : > { %v366_v20 = vpop.trf.xlu0 }
 0x14d   : > { %1274 = vmatpush3.bf16.msra.mxu1 %v1332_v48 }
 0x14e   : > { %1267 = vmatprep.subr.bf16.mxu1 %v1333_v52 }
 0x14f   : > { %v367_v21 = vpop.trf.xlu0 }
 0x150   : > { %1165 = vmatmul.mubr.msk.bf16.gmra.mxu1 %vm376_vm4, %v365_v19 }
 0x151   : > { %470 = vmatprep.mubr.bf16.mxu1 %v1447_v2  ;;  %1275 = vmatpush3.bf16.msra.mxu1 %v1334_v53 }
 0x152   : > { %1268 = vmatprep.subr.bf16.mxu1 %v1335_v57 }
 0x153   : > { %v368_v22 = vpop.trf.xlu0 }
 0x155   : > { %1276 = vmatpush3.bf16.msra.mxu1 %v1336_v58 }
 0x156   : > { %1269 = vmatprep.subr.bf16.mxu1 %v1337_v62 }
 0x157   : > { %v369_v23 = vpop.trf.xlu0 }
 0x158   : > { %1166 = vmatmul.mubr.msk.bf16.gmra.mxu1 %vm376_vm4, %v366_v20 }
 0x159   : > { %480 = vmatprep.mubr.bf16.mxu1 %v1447_v2  ;;  %1277 = vmatpush3.bf16.msra.mxu1 %v1338_v63 }
 0x15a   : > { %1270 = vmatprep.subr.bf16.mxu1 %v1339_v3 }
 0x15b   : > { %v370_v24 = vpop.trf.xlu0 }
 0x15d   : > { %1278 = vmatpush3.bf16.msra.mxu1 %v1340_v4 }
 0x160   : > { %1167 = vmatmul.mubr.msk.bf16.gmra.mxu1 %vm376_vm4, %v367_v21 }
 0x161   : > { %490 = vmatprep.mubr.bf16.mxu1 %v1447_v2 }
 0x168   : > { %1168 = vmatmul.mubr.msk.bf16.gmra.mxu1 %vm376_vm4, %v368_v22 }
 0x169   : > { %500 = vmatprep.mubr.bf16.mxu1 %v1447_v2 }
 0x170   : > { %1169 = vmatmul.mubr.msk.bf16.gmra.mxu1 %vm376_vm4, %v369_v23 }
 0x171   : > { %510 = vmatprep.mubr.bf16.mxu1 %v1447_v2 }
 0x178   : > { %1170 = vmatmul.mubr.msk.bf16.gmra.mxu1 %vm376_vm4, %v370_v24 }
 0x200   : > { %v1542_v29 = vpop.f32.mrf.mxu1 }
 0x202   : > { %v1544_v30 = vpop.f32.mrf.mxu1 }
 0x203   : > { %v521_v31 = vmax.f32 %v1542_v29, %v1544_v30 }
 0x204   : > { %v1548_v32 = vpop.f32.mrf.mxu1 }
 0x205   : > { %522 = vmax.xlane.f32.xlu1 %v521_v31 }
 0x206   : > { %v1550_v33 = vpop.f32.mrf.mxu1 }
 0x207   : > { %v524_v34 = vmax.f32 %v1548_v32, %v1550_v33 }
 0x208   : > { %v1554_v35 = vpop.f32.mrf.mxu1 }
 0x209   : > { %525 = vmax.xlane.f32.xlu1 %v524_v34 }
 0x20a   : > { %v1556_v36 = vpop.f32.mrf.mxu1 }
 0x20b   : > { %v527_v37 = vmax.f32 %v1554_v35, %v1556_v36 }
 0x20c   : > { %v1560_v38 = vpop.f32.mrf.mxu1 }
 0x20d   : > { %528 = vmax.xlane.f32.xlu1 %v527_v37 }
 0x20e   : > { %v1562_v39 = vpop.f32.mrf.mxu1 }
 0x20f   : > { %v530_v40 = vmax.f32 %v1560_v38, %v1562_v39 }
 0x210   : > { %v1568_v43 = vpop.f32.mrf.mxu1 }
 0x211   : > { %531 = vmax.xlane.f32.xlu1 %v530_v40 }
 0x212   : > { %v1570_v44 = vpop.f32.mrf.mxu1 }
 0x213   : > { %v533_v45 = vmax.f32 %v1568_v43, %v1570_v44 }
 0x214   : > { %v1574_v46 = vpop.f32.mrf.mxu1 }
 0x215   : > { %534 = vmax.xlane.f32.xlu1 %v533_v45 }
 0x216   : > { %v1578_v49 = vpop.f32.mrf.mxu1 }
 0x217   : > { %v536_v50 = vmax.f32 %v1574_v46, %v1578_v49 }
 0x218   : > { %v1582_v51 = vpop.f32.mrf.mxu1 }
 0x219   : > { %537 = vmax.xlane.f32.xlu1 %v536_v50 }
 0x21a   : > { %v1586_v54 = vpop.f32.mrf.mxu1 }
 0x21b   : > { %v539_v55 = vmax.f32 %v1582_v51, %v1586_v54 }
 0x21c   : > { %v1590_v56 = vpop.f32.mrf.mxu1 }
 0x21d   : > { %540 = vmax.xlane.f32.xlu1 %v539_v55 }
 0x21e   : > { %v1594_v59 = vpop.f32.mrf.mxu1 }
 0x21f   : > { %v542_v60 = vmax.f32 %v1590_v56, %v1594_v59 }
 0x220   : > { %v1598_v61 = vpop.f32.mrf.mxu1 }
 0x221   : > { %543 = vmax.xlane.f32.xlu1 %v542_v60 }
 0x222   : > { %v1602_v0 = vpop.f32.mrf.mxu1 }
 0x223   : > { %v545_v1 = vmax.f32 %v1598_v61, %v1602_v0 }
 0x224   : > { %v1606_v2 = vpop.f32.mrf.mxu1 }
 0x225   : > { %546 = vmax.xlane.f32.xlu1 %v545_v1 }
 0x226   : > { %v1610_v5 = vpop.f32.mrf.mxu1 }
 0x227   : > { %v548_v6 = vmax.f32 %v1606_v2, %v1610_v5 }
 0x228   : > { %v1614_v7 = vpop.f32.mrf.mxu1 }
 0x229   : > { %549 = vmax.xlane.f32.xlu0 %v548_v6 }
 0x22a   : > { %v1616_v8 = vpop.f32.mrf.mxu1 }
 0x22b   : > { %v551_v9 = vmax.f32 %v1614_v7, %v1616_v8 }
 0x22c   : > { %v1620_v10 = vpop.f32.mrf.mxu1 }
 0x22d   : > { %552 = vmax.xlane.f32.xlu1 %v551_v9 }
 0x22e   : > { %v1622_v11 = vpop.f32.mrf.mxu1 }
 0x22f   : > { %v554_v12 = vmax.f32 %v1620_v10, %v1622_v11 }
 0x230   : > { %v1626_v13 = vpop.f32.mrf.mxu1 }
 0x231   : > { %555 = vmax.xlane.f32.xlu1 %v554_v12 }
 0x232   : > { %v1628_v14 = vpop.f32.mrf.mxu1 }
 0x233   : > { %v557_v15 = vmax.f32 %v1626_v13, %v1628_v14 }
 0x234   : > { %v1632_v16 = vpop.f32.mrf.mxu1 }
 0x235   : > { %558 = vmax.xlane.f32.xlu1 %v557_v15 }
 0x236   : > { %v1634_v17 = vpop.f32.mrf.mxu1 }
 0x237   : > { %v560_v18 = vmax.f32 %v1632_v16, %v1634_v17 }
 0x238   : > { %v1638_v19 = vpop.f32.mrf.mxu1 }
 0x239   : > { %561 = vmax.xlane.f32.xlu1 %v560_v18 }
 0x23a   : > { %v1640_v20 = vpop.f32.mrf.mxu1 }
 0x23b   : > { %v563_v21 = vmax.f32 %v1638_v19, %v1640_v20 }
 0x23c   : > { %v1644_v22 = vpop.f32.mrf.mxu1 }
 0x23d   : > { %564 = vmax.xlane.f32.xlu1 %v563_v21 }
 0x23e   : > { %v1646_v23 = vpop.f32.mrf.mxu1 }
 0x23f   : > { %v566_v24 = vmax.f32 %v1644_v22, %v1646_v23 }
 0x241   : > { %567 = vmax.xlane.f32.xlu1 %v566_v24 }
 0x28e   : > { %v523_v25 = vpop.xlane.xlu1 %522 }
 0x28f   : > { %v569_v27 = vsub.f32 %v1542_v29, %v523_v25  ;;  %v570_v28 = vsub.f32 %v1544_v30, %v523_v25 }
 0x292   : > { %v526_v26 = vpop.xlane.xlu1 %525 }
 0x293   : > { %v571_v31 = vsub.f32 %v1548_v32, %v526_v26  ;;  %v572_v34 = vsub.f32 %v1550_v33, %v526_v26 }
 0x295   : > { %v601_v37 = vpack.c.bf16 %v571_v31, %v569_v27  ;;  %v602_v40 = vpack.c.bf16 %v572_v34, %v570_v28 }
 0x296   : > { %v529_v41 = vpop.xlane.xlu1 %528 }
 0x297   : > { %v618_v42 = vmul.bf16 1069105081, %v601_v37  ;;  %v621_v45 = vmul.bf16 1069105081, %v602_v40  ;;  %v573_v48 = vsub.f32 %v1554_v35, %v529_v41  ;;  %v574_v50 = vsub.f32 %v1556_v36, %v529_v41 }
 0x299   : > { %1341 = vpow.bf16 %v618_v42 }
 0x29a   : > { %1343 = vpow.bf16 %v621_v45  ;;  %v532_v47 = vpop.xlane.xlu1 %531 }
 0x29b   : > { %v575_v29 = vsub.f32 %v1560_v38, %v532_v47  ;;  %v576_v30 = vsub.f32 %v1562_v39, %v532_v47 }
 0x29d   : > { %v603_v52 = vpack.c.bf16 %v575_v29, %v573_v48  ;;  %v604_v32 = vpack.c.bf16 %v576_v30, %v574_v50 }
 0x29e   : > { %v535_v53 = vpop.xlane.xlu1 %534 }
 0x29f   : > { %v624_v33 = vmul.bf16 1069105081, %v603_v52  ;;  %v627_v55 = vmul.bf16 1069105081, %v604_v32  ;;  %v577_v58 = vsub.f32 %v1568_v43, %v535_v53  ;;  %v578_v60 = vsub.f32 %v1570_v44, %v535_v53 }
 0x2a1   : > { %1345 = vpow.bf16 %v624_v33 }
 0x2a2   : > { %1347 = vpow.bf16 %v627_v55  ;;  %v538_v57 = vpop.xlane.xlu1 %537 }
 0x2a3   : > { %v579_v35 = vsub.f32 %v1574_v46, %v538_v57  ;;  %v580_v36 = vsub.f32 %v1578_v49, %v538_v57 }
 0x2a5   : > { %v605_v62 = vpack.c.bf16 %v579_v35, %v577_v58  ;;  %v606_v38 = vpack.c.bf16 %v580_v36, %v578_v60 }
 0x2a6   : > { %v541_v63 = vpop.xlane.xlu1 %540 }
 0x2a7   : > { %v1342_v39 = vpop.eup %1341  ;;  %v630_v1 = vmul.bf16 1069105081, %v605_v62  ;;  %v633_v3 = vmul.bf16 1069105081, %v606_v38  ;;  %v581_v43 = vsub.f32 %v1582_v51, %v541_v63  ;;  %v582_v44 = vsub.f32 %v1586_v54, %v541_v63 }
 0x2a8   : > { %v1344_v4 = vpop.eup %1343  ;;  %v665_v6 = vunpack.c.l.bf16 %v1342_v39  ;;  %v667_v12 = vunpack.c.h.bf16 %v1342_v39 }
 0x2a9   : > { %1349 = vpow.bf16 %v630_v1  ;;  %905 = vmatprep.mubr.bf16.mxu0 %v1344_v4  ;;  %v666_v9 = vunpack.c.l.bf16 %v1344_v4  ;;  %v668_v21 = vunpack.c.h.bf16 %v1344_v4 }
 0x2aa   : > { %1351 = vpow.bf16 %v633_v3  ;;  %906 = vmatmul.mubr.bf16.vlgmr.msra.gmra.mxu0 %v1342_v39  ;;  %v544_v46 = vpop.xlane.xlu1 %543 }
 0x2ab   : > { %v583_v49 = vsub.f32 %v1590_v56, %v544_v46  ;;  %v584_v15 = vsub.f32 %v1594_v59, %v544_v46  ;;  %v697_v18 = vadd.f32 %v666_v9, %v665_v6  ;;  %v700_v34 = vadd.f32 %v668_v21, %v667_v12 }
 0x2ad   : > { %v607_v24 = vpack.c.bf16 %v583_v49, %v581_v43  ;;  %v608_v25 = vpack.c.bf16 %v584_v15, %v582_v44  ;;  %698 = vadd.xlane.f32.xlu1 %v697_v18 }
 0x2ae   : > { %v547_v31 = vpop.xlane.xlu1 %546 }
 0x2af   : > { %v1346_v26 = vpop.eup %1345  ;;  %v636_v27 = vmul.bf16 1069105081, %v607_v24  ;;  %v639_v28 = vmul.bf16 1069105081, %v608_v25  ;;  %v585_v56 = vsub.f32 %v1598_v61, %v547_v31  ;;  %v586_v59 = vsub.f32 %v1602_v0, %v547_v31 }
 0x2b0   : > { %v1348_v51 = vpop.eup %1347  ;;  %v669_v37 = vunpack.c.l.bf16 %v1346_v26  ;;  %v671_v41 = vunpack.c.h.bf16 %v1346_v26 }
 0x2b1   : > { %1353 = vpow.bf16 %v636_v27  ;;  %913 = vmatprep.mubr.bf16.mxu0 %v1348_v51  ;;  %701 = vadd.xlane.f32.xlu1 %v700_v34  ;;  %v670_v54 = vunpack.c.l.bf16 %v1348_v51  ;;  %v672_v48 = vunpack.c.h.bf16 %v1348_v51 }
 0x2b2   : > { %1355 = vpow.bf16 %v639_v28  ;;  %914 = vmatmul.mubr.bf16.gmra.mxu0 %v1346_v26  ;;  %v550_v40 = vpop.xlane.xlu0 %549 }
 0x2b3   : > { %v587_v42 = vsub.f32 %v1606_v2, %v550_v40  ;;  %v588_v45 = vsub.f32 %v1610_v5, %v550_v40  ;;  %v703_v47 = vadd.f32 %v670_v54, %v669_v37  ;;  %v706_v33 = vadd.f32 %v672_v48, %v671_v41 }
 0x2b5   : > { %v609_v50 = vpack.c.bf16 %v587_v42, %v585_v56  ;;  %v610_v29 = vpack.c.bf16 %v588_v45, %v586_v59  ;;  %704 = vadd.xlane.f32.xlu1 %v703_v47 }
 0x2b6   : > { %v553_v30 = vpop.xlane.xlu1 %552 }
 0x2b7   : > { %v1350_v52 = vpop.eup %1349  ;;  %v642_v32 = vmul.bf16 1069105081, %v609_v50  ;;  %v645_v53 = vmul.bf16 1069105081, %v610_v29  ;;  %v589_v5 = vsub.f32 %v1614_v7, %v553_v30  ;;  %v590_v58 = vsub.f32 %v1616_v8, %v553_v30 }
 0x2b8   : > { %v1352_v61 = vpop.eup %1351  ;;  %v673_v55 = vunpack.c.l.bf16 %v1350_v52  ;;  %v675_v0 = vunpack.c.h.bf16 %v1350_v52 }
 0x2b9   : > { %1357 = vpow.bf16 %v642_v32  ;;  %921 = vmatprep.mubr.bf16.mxu0 %v1352_v61  ;;  %707 = vadd.xlane.f32.xlu1 %v706_v33  ;;  %v674_v57 = vunpack.c.l.bf16 %v1352_v61  ;;  %v676_v2 = vunpack.c.h.bf16 %v1352_v61 }
 0x2ba   : > { %1359 = vpow.bf16 %v645_v53  ;;  %922 = vmatmul.mubr.bf16.gmra.mxu0 %v1350_v52  ;;  %v556_v60 = vpop.xlane.xlu1 %555 }
 0x2bb   : > { %v591_v35 = vsub.f32 %v1620_v10, %v556_v60  ;;  %v592_v36 = vsub.f32 %v1622_v11, %v556_v60  ;;  %v709_v62 = vadd.f32 %v674_v57, %v673_v55  ;;  %v712_v38 = vadd.f32 %v676_v2, %v675_v0 }
 0x2bd   : > { %v611_v63 = vpack.c.bf16 %v591_v35, %v589_v5  ;;  %v612_v39 = vpack.c.bf16 %v592_v36, %v590_v58  ;;  %710 = vadd.xlane.f32.xlu0 %v709_v62  ;;  %713 = vadd.xlane.f32.xlu1 %v712_v38 }
 0x2be   : > { %v559_v1 = vpop.xlane.xlu1 %558 }
 0x2bf   : > { %v1354_v3 = vpop.eup %1353  ;;  %v648_v4 = vmul.bf16 1069105081, %v611_v63  ;;  %v651_v6 = vmul.bf16 1069105081, %v612_v39  ;;  %v593_v10 = vsub.f32 %v1626_v13, %v559_v1  ;;  %v594_v11 = vsub.f32 %v1628_v14, %v559_v1 }
 0x2c0   : > { %v1356_v9 = vpop.eup %1355  ;;  %v677_v7 = vunpack.c.l.bf16 %v1354_v3  ;;  %v679_v43 = vunpack.c.h.bf16 %v1354_v3 }
 0x2c1   : > { %1361 = vpow.bf16 %v648_v4  ;;  %929 = vmatprep.mubr.bf16.mxu0 %v1356_v9  ;;  %v678_v8 = vunpack.c.l.bf16 %v1356_v9  ;;  %v680_v44 = vunpack.c.h.bf16 %v1356_v9 }
 0x2c2   : > { %1363 = vpow.bf16 %v651_v6  ;;  %930 = vmatmul.mubr.bf16.gmra.mxu0 %v1354_v3  ;;  %v562_v46 = vpop.xlane.xlu1 %561 }
 0x2c3   : > { %v595_v12 = vsub.f32 %v1632_v16, %v562_v46  ;;  %v596_v49 = vsub.f32 %v1634_v17, %v562_v46  ;;  %v715_v15 = vadd.f32 %v678_v8, %v677_v7  ;;  %v718_v18 = vadd.f32 %v680_v44, %v679_v43 }
 0x2c5   : > { %v613_v21 = vpack.c.bf16 %v595_v12, %v593_v10  ;;  %v614_v24 = vpack.c.bf16 %v596_v49, %v594_v11  ;;  %716 = vadd.xlane.f32.xlu0 %v715_v15  ;;  %719 = vadd.xlane.f32.xlu1 %v718_v18 }
 0x2c6   : > { %v565_v25 = vpop.xlane.xlu1 %564 }
 0x2c7   : > { %v1358_v26 = vpop.eup %1357  ;;  %v654_v27 = vmul.bf16 1069105081, %v613_v21  ;;  %v657_v28 = vmul.bf16 1069105081, %v614_v24  ;;  %v597_v16 = vsub.f32 %v1638_v19, %v565_v25  ;;  %v598_v17 = vsub.f32 %v1640_v20, %v565_v25 }
 0x2c8   : > { %v1360_v31 = vpop.eup %1359  ;;  %v683_v13 = vunpack.c.h.bf16 %v1358_v26  ;;  %v681_v34 = vunpack.c.l.bf16 %v1358_v26 }
 0x2c9   : > { %1365 = vpow.bf16 %v654_v27  ;;  %937 = vmatprep.mubr.bf16.mxu0 %v1360_v31  ;;  %v684_v14 = vunpack.c.h.bf16 %v1360_v31  ;;  %v682_v51 = vunpack.c.l.bf16 %v1360_v31 }
 0x2ca   : > { %1367 = vpow.bf16 %v657_v28  ;;  %938 = vmatmul.mubr.bf16.gmra.mxu0 %v1358_v26  ;;  %v568_v37 = vpop.xlane.xlu1 %567 }
 0x2cb   : > { %v599_v54 = vsub.f32 %v1644_v22, %v568_v37  ;;  %v600_v56 = vsub.f32 %v1646_v23, %v568_v37  ;;  %v724_v59 = vadd.f32 %v684_v14, %v683_v13  ;;  %v721_v40 = vadd.f32 %v682_v51, %v681_v34 }
 0x2cd   : > { %v615_v41 = vpack.c.bf16 %v599_v54, %v597_v16  ;;  %v616_v42 = vpack.c.bf16 %v600_v56, %v598_v17  ;;  %725 = vadd.xlane.f32.xlu1 %v724_v59  ;;  %722 = vadd.xlane.f32.xlu0 %v721_v40 }
 0x2cf   : > { %v1362_v45 = vpop.eup %1361  ;;  %v660_v47 = vmul.bf16 1069105081, %v615_v41  ;;  %v663_v48 = vmul.bf16 1069105081, %v616_v42 }
 0x2d0   : > { %v1364_v50 = vpop.eup %1363  ;;  %v687_v29 = vunpack.c.h.bf16 %v1362_v45  ;;  %v685_v19 = vunpack.c.l.bf16 %v1362_v45 }
 0x2d1   : > { %1369 = vpow.bf16 %v660_v47  ;;  %945 = vmatprep.mubr.bf16.mxu0 %v1364_v50  ;;  %v688_v20 = vunpack.c.h.bf16 %v1364_v50  ;;  %v686_v30 = vunpack.c.l.bf16 %v1364_v50 }
 0x2d2   : > { %1371 = vpow.bf16 %v663_v48  ;;  %946 = vmatmul.mubr.bf16.gmra.mxu0 %v1362_v45 }
 0x2d3   : > { %v730_v22 = vadd.f32 %v688_v20, %v687_v29  ;;  %v727_v23 = vadd.f32 %v686_v30, %v685_v19 }
 0x2d5   : > { %731 = vadd.xlane.f32.xlu1 %v730_v22  ;;  %728 = vadd.xlane.f32.xlu0 %v727_v23 }
 0x2d7   : > { %v1366_v52 = vpop.eup %1365 }
 0x2d8   : > { %v1368_v32 = vpop.eup %1367  ;;  %v691_v53 = vunpack.c.h.bf16 %v1366_v52  ;;  %v689_v33 = vunpack.c.l.bf16 %v1366_v52 }
 0x2d9   : > { %953 = vmatprep.mubr.bf16.mxu1 %v1368_v32  ;;  %v692_v61 = vunpack.c.h.bf16 %v1368_v32  ;;  %v690_v55 = vunpack.c.l.bf16 %v1368_v32 }
 0x2da   : > { %954 = vmatmul.mubr.bf16.vlgmr.msra.gmra.mxu1 %v1366_v52 }
 0x2db   : > { %v736_v0 = vadd.f32 %v692_v61, %v691_v53  ;;  %v733_v57 = vadd.f32 %v690_v55, %v689_v33 }
 0x2dd   : > { %737 = vadd.xlane.f32.xlu1 %v736_v0  ;;  %734 = vadd.xlane.f32.xlu0 %v733_v57 }
 0x2df   : > { %v1370_v2 = vpop.eup %1369 }
 0x2e0   : > { %v1372_v5 = vpop.eup %1371  ;;  %v695_v58 = vunpack.c.h.bf16 %v1370_v2  ;;  %v693_v60 = vunpack.c.l.bf16 %v1370_v2 }
 0x2e1   : > { %961 = vmatprep.mubr.bf16.mxu1 %v1372_v5  ;;  %v696_v35 = vunpack.c.h.bf16 %v1372_v5  ;;  %v694_v36 = vunpack.c.l.bf16 %v1372_v5 }
 0x2e2   : > { %962 = vmatmul.mubr.bf16.gmra.mxu1 %v1370_v2 }
 0x2e3   : > { %v742_v62 = vadd.f32 %v696_v35, %v695_v58  ;;  %v739_v38 = vadd.f32 %v694_v36, %v693_v60 }
 0x2e5   : > { %743 = vadd.xlane.f32.xlu1 %v742_v62  ;;  %740 = vadd.xlane.f32.xlu0 %v739_v38 }
 0x336   : > { %v699_v63 = vpop.xlane.xlu1 %698 }
 0x337   : > { %1373 = vrcp.f32 %v699_v63 }
 0x33a   : > { %v702_v39 = vpop.xlane.xlu1 %701 }
 0x33b   : > { %1375 = vrcp.f32 %v702_v39 }
 0x33e   : > { %v705_v1 = vpop.xlane.xlu1 %704 }
 0x33f   : > { %1377 = vrcp.f32 %v705_v1 }
 0x342   : > { %v708_v4 = vpop.xlane.xlu1 %707 }
 0x343   : > { %1379 = vrcp.f32 %v708_v4 }
 0x344   : > { %v1374_v7 = vpop.eup %1373 }
 0x346   : > { %v711_v43 = vpop.xlane.xlu0 %710  ;;  %v714_v12 = vpop.xlane.xlu1 %713 }
 0x347   : > { %1381 = vrcp.f32 %v711_v43 }
 0x348   : > { %v1376_v46 = vpop.eup %1375  ;;  %1383 = vrcp.f32 %v714_v12 }
 0x34c   : > { %v1378_v24 = vpop.eup %1377 }
 0x34e   : > { %v717_v25 = vpop.xlane.xlu0 %716  ;;  %v720_v34 = vpop.xlane.xlu1 %719 }
 0x34f   : > { %1385 = vrcp.f32 %v717_v25 }
 0x350   : > { %v1380_v13 = vpop.eup %1379  ;;  %1387 = vrcp.f32 %v720_v34 }
 0x354   : > { %v1382_v37 = vpop.eup %1381 }
 0x355   : > { %v1384_v42 = vpop.eup %1383 }
 0x356   : > { %v723_v54 = vpop.xlane.xlu0 %722  ;;  %v726_v45 = vpop.xlane.xlu1 %725 }
 0x357   : > { %1389 = vrcp.f32 %v723_v54 }
 0x358   : > { %1391 = vrcp.f32 %v726_v45 }
 0x35c   : > { %v1386_v19 = vpop.eup %1385 }
 0x35d   : > { %v1388_v32 = vpop.eup %1387 }
 0x35e   : > { %v729_v20 = vpop.xlane.xlu0 %728  ;;  %v732_v53 = vpop.xlane.xlu1 %731 }
 0x35f   : > { %1393 = vrcp.f32 %v729_v20 }
 0x360   : > { %1395 = vrcp.f32 %v732_v53 }
 0x364   : > { %v1390_v2 = vpop.eup %1389 }
 0x365   : > { %v1392_v62 = vpop.eup %1391 }
 0x366   : > { %v735_v0 = vpop.xlane.xlu0 %734  ;;  %v738_v35 = vpop.xlane.xlu1 %737 }
 0x367   : > { %1397 = vrcp.f32 %v735_v0 }
 0x368   : > { %1399 = vrcp.f32 %v738_v35 }
 0x36a   : > { %v1209_v3 = vpop.f32.mrf.mxu0 }
 0x36c   : > { %v1210_v6 = vpop.f32.mrf.mxu0  ;;  %v1394_v4 = vpop.eup %1393 }
 0x36d   : > { %v1211_v9 = vadd.f32 %v1210_v6, %v1209_v3 }
 0x36e   : > { %v1212_v44 = vpop.f32.mrf.mxu0  ;;  %v741_v1 = vpop.xlane.xlu0 %740 }
 0x36f   : > { %v986_v8 = vmul.f32 %v1374_v7, %v1211_v9  ;;  %1401 = vrcp.f32 %v741_v1  ;;  %v744_v43 = vpop.xlane.xlu1 %743 }
 0x370   : > { %v1213_v10 = vpop.f32.mrf.mxu0  ;;  %1403 = vrcp.f32 %v744_v43 }
 0x371   : > { %1002 = vxpose.xlu0.b32.start [1/16] (narrow) %v986_v8, 8  ;;  %v1214_v11 = vadd.f32 %v1213_v10, %v1212_v44  ;;  %v1396_v10 = vpop.eup %1395 }
 0x372   : > { %v1215_v49 = vpop.f32.mrf.mxu0 }
 0x373   : > { %v987_v15 = vmul.f32 %v1376_v46, %v1214_v11 }
 0x374   : > { %v1216_v18 = vpop.f32.mrf.mxu0 }
 0x375   : > { %v1217_v21 = vadd.f32 %v1216_v18, %v1215_v49  ;;  %1003 = vxpose.xlu0.b32.cont [2/16] (narrow) %v987_v15, 8  ;;  %v1398_v49 = vpop.eup %1397 }
 0x376   : > { %v1218_v26 = vpop.f32.mrf.mxu0  ;;  %v1400_v25 = vpop.eup %1399 }
 0x377   : > { %v988_v27 = vmul.f32 %v1378_v24, %v1217_v21 }
 0x378   : > { %v1219_v28 = vpop.f32.mrf.mxu0 }
 0x379   : > { %v1220_v31 = vadd.f32 %v1219_v28, %v1218_v26  ;;  %1004 = vxpose.xlu0.b32.cont [3/16] (narrow) %v988_v27, 8 }
 0x37a   : > { %v1221_v14 = vpop.f32.mrf.mxu0 }
 0x37b   : > { %v989_v51 = vmul.f32 %v1380_v13, %v1220_v31 }
 0x37c   : > { %v1222_v16 = vpop.f32.mrf.mxu0  ;;  %v1402_v13 = vpop.eup %1401 }
 0x37d   : > { %v1223_v17 = vadd.f32 %v1222_v16, %v1221_v14  ;;  %1005 = vxpose.xlu0.b32.cont [4/16] (narrow) %v989_v51, 8 }
 0x37e   : > { %v1224_v56 = vpop.f32.mrf.mxu0 }
 0x37f   : > { %v990_v59 = vmul.f32 %v1382_v37, %v1223_v17  ;;  %v1404_v17 = vpop.eup %1403 }
 0x380   : > { %v1225_v40 = vpop.f32.mrf.mxu0 }
 0x381   : > { %v1226_v41 = vadd.f32 %v1225_v40, %v1224_v56  ;;  %1006 = vxpose.xlu0.b32.cont [5/16] (narrow) %v990_v59, 8 }
 0x382   : > { %v1227_v47 = vpop.f32.mrf.mxu0 }
 0x383   : > { %v991_v48 = vmul.f32 %v1384_v42, %v1226_v41 }
 0x384   : > { %v1228_v50 = vpop.f32.mrf.mxu0 }
 0x385   : > { %v1229_v29 = vadd.f32 %v1228_v50, %v1227_v47  ;;  %1007 = vxpose.xlu0.b32.cont [6/16] (narrow) %v991_v48, 8 }
 0x386   : > { %v1230_v30 = vpop.f32.mrf.mxu0 }
 0x387   : > { %v992_v22 = vmul.f32 %v1386_v19, %v1229_v29 }
 0x388   : > { %v1231_v23 = vpop.f32.mrf.mxu0 }
 0x389   : > { %v1232_v52 = vadd.f32 %v1231_v23, %v1230_v30  ;;  %1008 = vxpose.xlu0.b32.cont [7/16] (narrow) %v992_v22, 8 }
 0x38a   : > { %v1233_v33 = vpop.f32.mrf.mxu0 }
 0x38b   : > { %v993_v61 = vmul.f32 %v1388_v32, %v1232_v52 }
 0x38c   : > { %v1234_v55 = vpop.f32.mrf.mxu0 }
 0x38d   : > { %v1235_v57 = vadd.f32 %v1234_v55, %v1233_v33  ;;  %1009 = vxpose.xlu0.b32.cont [8/16] (narrow) %v993_v61, 8 }
 0x38e   : > { %v1236_v5 = vpop.f32.mrf.mxu0 }
 0x38f   : > { %v994_v58 = vmul.f32 %v1390_v2, %v1235_v57 }
 0x390   : > { %v1237_v60 = vpop.f32.mrf.mxu0 }
 0x391   : > { %v1238_v36 = vadd.f32 %v1237_v60, %v1236_v5  ;;  %1010 = vxpose.xlu0.b32.cont [9/16] (narrow) %v994_v58, 8 }
 0x392   : > { %v1239_v38 = vpop.f32.mrf.mxu0 }
 0x393   : > { %v995_v63 = vmul.f32 %v1392_v62, %v1238_v36 }
 0x394   : > { %v1240_v39 = vpop.f32.mrf.mxu0 }
 0x395   : > { %v1241_v3 = vadd.f32 %v1240_v39, %v1239_v38  ;;  %1011 = vxpose.xlu0.b32.cont [10/16] (narrow) %v995_v63, 8 }
 0x396   : > { %v1242_v6 = vpop.f32.mrf.mxu0 }
 0x397   : > { %v996_v9 = vmul.f32 %v1394_v4, %v1241_v3 }
 0x398   : > { %v1243_v7 = vpop.f32.mrf.mxu0 }
 0x399   : > { %v1244_v8 = vadd.f32 %v1243_v7, %v1242_v6  ;;  %1012 = vxpose.xlu0.b32.cont [11/16] (narrow) %v996_v9, 8 }
 0x39a   : > { %v1245_v44 = vpop.f32.mrf.mxu1 }
 0x39b   : > { %v997_v11 = vmul.f32 %v1396_v10, %v1244_v8 }
 0x39c   : > { %v1246_v46 = vpop.f32.mrf.mxu1 }
 0x39d   : > { %v1247_v12 = vadd.f32 %v1246_v46, %v1245_v44  ;;  %1013 = vxpose.xlu0.b32.cont [12/16] (narrow) %v997_v11, 8 }
 0x39e   : > { %v1248_v15 = vpop.f32.mrf.mxu1 }
 0x39f   : > { %v998_v18 = vmul.f32 %v1398_v49, %v1247_v12 }
 0x3a0   : > { %v1249_v21 = vpop.f32.mrf.mxu1 }
 0x3a1   : > { %v1250_v24 = vadd.f32 %v1249_v21, %v1248_v15  ;;  %1014 = vxpose.xlu0.b32.cont [13/16] (narrow) %v998_v18, 8 }
 0x3a2   : > { %v1251_v26 = vpop.f32.mrf.mxu1 }
 0x3a3   : > { %v999_v27 = vmul.f32 %v1400_v25, %v1250_v24 }
 0x3a4   : > { %v1252_v28 = vpop.f32.mrf.mxu1 }
 0x3a5   : > { %v1253_v31 = vadd.f32 %v1252_v28, %v1251_v26  ;;  %1015 = vxpose.xlu0.b32.cont [14/16] (narrow) %v999_v27, 8 }
 0x3a6   : > { %v1254_v34 = vpop.f32.mrf.mxu1 }
 0x3a7   : > { %v1000_v14 = vmul.f32 %v1402_v13, %v1253_v31 }
 0x3a8   : > { %v1255_v51 = vpop.f32.mrf.mxu1 }
 0x3a9   : > { %v1256_v16 = vadd.f32 %v1255_v51, %v1254_v34  ;;  %1016 = vxpose.xlu0.b32.cont [15/16] (narrow) %v1000_v14, 8 }
 0x3ab   : > { %v1001_v37 = vmul.f32 %v1404_v17, %v1256_v16 }
 0x3ad   : > { %1017 = vxpose.xlu0.b32.end [16/16] (narrow) %v1001_v37, 8 }
 0x3ed   : > { %v1018_v54 = vpop.trf.xlu0 }
 0x3ee   : > { %v1034_v56 = vpack.c.bf16 %v1018_v54, %v1018_v54 }
 0x3f0   : > { %1035 = vst [vmem:[%s295_s25] sm:$0x3] %v1034_v56 }
 0x3f1 PF: > { %s15_s22 = sadd.s32 1, %s1443_s22   ;;  %s1708_s18 = smov %s1435_s20 }
 0x3f2   : > { %p12_p7 = scmp.ge.s32.totalorder %s15_s22, 6   ;;  %s1709_s19 = smov %s1439_s21 }
 0x3f3   : > { %s1710_s20 = smov %s1713_s23  ;;  %s1711_s21 = smov %s1717_s24 }
 0x3f4   :  { %14 = sbr.rel (!%p12_p7) target bundleno = 3 (0x3), region = 76 }

// kernel: wave_attention3_forward.9
= control target key start
LH: loop header
LB: loop body
LE: loop exit
PB: predicated region body
PF: predicated region fallthrough
CT: control target
= control target key end

     0   :  { %s1317_s15 = smov 0   ;;  %s1319_s16 = smov 0   ;;  %s1487_s0 = inlined_call_operand.vmem [shape: bf16[2,8,320], index: 0, kind: input, shape index: {}]   ;;  %s1488_s1 = inlined_call_operand.vmem [shape: bf16[9,4,8], index: 1, kind: input, shape index: {}]   ;;  %s1489_s2 = inlined_call_operand.vmem [shape: f32[4,1], index: 2, kind: input, shape index: {}]   ;;  %s1490_s3 = inlined_call_operand.vmem [shape: f32[4,1], index: 3, kind: input, shape index: {}]   ;;  %s1491_s4 = inlined_call_operand.vmem [shape: f32[2,4,256], index: 4, kind: output, shape index: {}]  }
   0x1   :  { %s1321_s17 = smov 0  }
   0x2 LB: > { %s26_s18 = sadd.s32 1, %s1270_s16  ;;  %p1152_p0 = scmp.ge.s32.totalorder %s1274_s17, 1  ;;  %s1274_s17 = sphi %s1321_s17, %s14_s17   ;;  %s1270_s16 = sphi %s1319_s16, %s1493_s16   ;;  %s1266_s15 = sphi %s1317_s15, %s1492_s15  }
   0x3   : > { %p28_p1 = scmp.ge.s32.totalorder %s26_s18, 2  ;;  %p203_p2 = scmp.lt.s32.totalorder %s1274_s17, 3 }
   0x5   : > { %s1495_s18 = smov (%p28_p1, %s26_s18), 0  ;;  %p204_p3 = pnand %p1152_p0, %p203_p2 }
   0x6   : > { %p245_p4 = scmp.lt.s32.totalorder (!%p204_p3), %s1266_s15, 1  ;;  %s1277_s20 = smov (!%p204_p3), 15  }
   0x7   : > { %207 = sbr.rel (%p204_p3) target bundleno = 511 (0x1ff), region = 36  ;;  %s1278_s21 = smov (!%p204_p3), 31  }
   0x8   : > { %s1279_s25 = smov (!%p204_p3), 17   ;;  %s1280_s26 = smov (!%p204_p3), 33  }
   0x9   : > { %s1281_s27 = smov (!%p204_p3), 47   ;;  %s1282_s28 = smov (!%p204_p3), 49  }
   0xa   : > { %s1283_s29 = smov (!%p204_p3), 112   ;;  %s1284_s30 = smov (!%p204_p3), 96  }
   0xb   : > { %s1285_s5 = smov (!%p204_p3), 113   ;;  %s1286_s6 = smov (!%p204_p3), 111  }
   0xc   : > { %v276_v0 = vlaneseq  ;;  %v1276_v1 = vmov 0   ;;  %s1497_s15 = smov (!%p245_p4, %s1266_s15), 1  ;;  %vm316_vm8 = vcmask 121856   ;;  %vm470_vm11 = vcmask 138240   ;;  %s1287_s7 = smov 97  }
   0xd   : > { %385 = vmatprep.mubr.bf16.mxu0 %v1276_v1  ;;  %452 = vmatprep.mubr.bf16.mxu1 %v1276_v1  ;;  %s1206_s19 = smul.u32 12, %s1497_s15  ;;  %vm339_vm14 = vcmask 916480   ;;  %vm550_vm15 = vcmask 252928   ;;  %s1288_s8 = smov 81   ;;  %v1156_v47 = vld [vmem:[%s1488_s1 + $0x2] sm:$0x3] }
   0xe   : > { %v277_v2 = vand.u32 127, %v276_v0  ;;  %1247 = vset.pattern.permute.xlu1 %v1276_v1  ;;  %1248 = vset.pattern.permute.xlu0 %v1276_v1  ;;  %s1289_s9 = smov 95   ;;  %s1290_s12 = smov 80  }
   0xf   : > { %s249_s24 = scalar_lea.vmem %s1487_s0, %s1206_s19  ;;  %s1291_s13 = smov 79  }
  0x10   : > { %v278_v3 = vadd.s32 128, %v277_v2  ;;  %v283_v4 = vand.u32 15, %v277_v2  ;;  %v1347_v8 = vld [vmem:[%s249_s24] sm:$0xff]  ;;  %v1357_v11 = vld [vmem:[%s249_s24 + $0x8] sm:$0xf] }
  0x11   : > { %v1351_v9 = vcombine.low %v1347_v8, %v1347_v8  ;;  %v1355_v10 = vcombine.high %v1347_v8, %v1347_v8  ;;  %v1363_v12 = vcombine.low %v1357_v11, %v1357_v11 }
  0x12   : > { %v290_v5 = vand.u32 15, %v278_v3  ;;  %vm303_vm0 = vcmp.ne.s32.totalorder %v283_v4, 0  ;;  %vm305_vm1 = vcmp.ne.s32.totalorder %v283_v4, 15 }
  0x14   : > { %vm304_vm2 = vcmp.ne.s32.totalorder %v290_v5, 0  ;;  %vm306_vm3 = vcmp.ne.s32.totalorder %v290_v5, 15  ;;  %v1001_v5 = vld [vmem:[%s1490_s3] sm:$0xf] }
  0x15   : > { %vm311_vm4 = vmpackc.low %vm304_vm2, %vm303_vm0  ;;  %vm346_vm0 = vcmask 1043456  }
  0x16   : > { %v312_v6 = vsel %vm311_vm4, 65537, %v1276_v1  ;;  %vm465_vm5 = vmpackc.low %vm306_vm3, %vm305_vm1  ;;  %vm342_vm3 = vcmask 64512   ;;  %vm693_vm4 = vcmask 269312  }
  0x17   : > { %313 = vrot.lane.b32.xlu0 %v312_v6, %s1277_s20  ;;  %547 = vrot.lane.b32.xlu1 %v312_v6, %s1278_s21  ;;  %v466_v7 = vsel %vm465_vm5, 65537, %v1276_v1  ;;  %vm773_vm5 = vcmask 384000  }
  0x1b   : > { %467 = vrot.lane.b32.xlu0 %v466_v7, %s1279_s25  ;;  %690 = vrot.lane.b32.xlu1 %v466_v7, %s1280_s26 }
  0x1f   : > { %770 = vrot.lane.b32.xlu0 %v312_v6, %s1281_s27  ;;  %913 = vrot.lane.b32.xlu1 %v466_v7, %s1282_s28  ;;  %v993_v6 = vld [vmem:[%s1489_s2] sm:$0xf] }
  0x23   : > { %333 = vrot.lane.b32.xlu0 %v1351_v9, %s1283_s29  ;;  %335 = vrot.lane.b32.xlu1 %v1355_v10, %s1283_s29 }
  0x27   : > { %337 = vrot.lane.b32.xlu0 %v1363_v12, %s1283_s29  ;;  %631 = vrot.lane.b32.xlu1 %v1355_v10, %s1284_s30 }
  0x2b   : > { %629 = vrot.lane.b32.xlu0 %v1351_v9, %s1284_s30 }
  0x2f   : > { %633 = vrot.lane.b32.xlu0 %v1363_v12, %s1284_s30 }
  0x89   : > { %v314_v13 = vpop.permute.xlu0 %313  ;;  %v548_v14 = vpop.permute.xlu1 %547 }
  0x8a   : > { %v315_v15 = vrot.slane %v314_v13, 4  ;;  %v549_v16 = vrot.slane %v548_v14, 4 }
  0x8c   : > { %vm319_vm6 = vcmp.ne.s16.totalorder %v315_v15, 0  ;;  %vm553_vm7 = vcmp.ne.s16.totalorder %v549_v16, 0  ;;  %v317_v24 = vsel %vm316_vm8, %v315_v15, %v314_v13  ;;  %v551_v40 = vsel %vm550_vm15, %v549_v16, %v548_v14 }
  0x8d   : > { %v468_v17 = vpop.permute.xlu0 %467  ;;  %v1369_v18 = vpop.permute.xlu1 %690  ;;  %v321_v19 = vsel %vm319_vm6, %v1357_v11, 0  ;;  %v555_v22 = vsel %vm553_vm7, %v1357_v11, 0  ;;  %vm318_vm12 = vcmp.ne.s16.totalorder %v317_v24, 0  ;;  %vm552_vm2 = vcmp.ne.s16.totalorder %v551_v40, 0 }
  0x8e   : > { %v469_v20 = vrot.slane %v468_v17, 4  ;;  %v692_v21 = vrot.slane %v1369_v18, 4  ;;  %v1164_v23 = vcombine.low %v321_v19, %v321_v19  ;;  %v1176_v26 = vcombine.low %v555_v22, %v555_v22 }
  0x8f   : > { %v320_v38 = vsel %vm318_vm12, %v1347_v8, 0  ;;  %v554_v49 = vsel %vm552_vm2, %v1347_v8, 0  ;;  %vm916_vm7 = vcmask 400384   ;;  %vm492_vm12 = vcmask 908288  }
  0x90   : > { %vm473_vm9 = vcmp.ne.s16.totalorder %v469_v20, 0  ;;  %vm696_vm10 = vcmp.ne.s16.totalorder %v692_v21, 0  ;;  %406 = vrot.lane.b32.xlu1 %v1164_v23, %s1285_s5  ;;  %v471_v32 = vsel %vm470_vm11, %v469_v20, %v468_v17  ;;  %v1163_v43 = vcombine.high %v320_v38, %v320_v38 }
  0x91   : > { %v771_v25 = vpop.permute.xlu0 %770  ;;  %v475_v27 = vsel %vm473_vm9, %v1357_v11, 0  ;;  %v1376_v28 = vpop.permute.xlu1 %913  ;;  %v698_v31 = vsel %vm696_vm10, %v1357_v11, 0  ;;  %vm472_vm1 = vcmp.ne.s16.totalorder %v471_v32, 0  ;;  %v1162_v46 = vcombine.low %v320_v38, %v320_v38 }
  0x92   : > { %v772_v29 = vrot.slane %v771_v25, 4  ;;  %v1170_v30 = vcombine.low %v475_v27, %v475_v27  ;;  %v1185_v33 = vcombine.low %v698_v31, %v698_v31  ;;  %v474_v45 = vsel %vm472_vm1, %v1347_v8, 0 }
  0x93   : > { %v1168_v48 = vcombine.low %v474_v45, %v474_v45  ;;  %v1169_v50 = vcombine.high %v474_v45, %v474_v45  ;;  %v694_v51 = vsel %vm693_vm4, %v692_v21, %v1369_v18  ;;  %v1175_v52 = vcombine.high %v554_v49, %v554_v49  ;;  %v322_v21 = vld [vmem:[%s1488_s1] sm:$0x3]  ;;  %v1182_v45 = vld [vmem:[%s1488_s1 + $0xa] sm:$0x3] }
  0x94   : > { %vm776_vm13 = vcmp.ne.s16.totalorder %v772_v29, 0  ;;  %490 = vrot.lane.b32.xlu0 %v1170_v30, %s1286_s6  ;;  %570 = vrot.lane.b32.xlu1 %v1176_v26, %s1287_s7  ;;  %v1174_v53 = vcombine.low %v554_v49, %v554_v49  ;;  %vm695_vm6 = vcmp.ne.s16.totalorder %v694_v51, 0  ;;  %v774_v54 = vsel %vm773_vm5, %v772_v29, %v771_v25  ;;  %v1167_v29 = vld [vmem:[%s1488_s1 + $0x4] sm:$0x3] }
  0x95   : > { %v778_v34 = vsel %vm776_vm13, %v1357_v11, 0  ;;  %v334_v35 = vpop.permute.xlu0 %333  ;;  %v336_v36 = vpop.permute.xlu1 %335  ;;  %v915_v55 = vrot.slane %v1376_v28, 4  ;;  %v697_v56 = vsel %vm695_vm6, %v1347_v8, 0  ;;  %vm775_vm8 = vcmp.ne.s16.totalorder %v774_v54, 0 }
  0x96   : > { %v1191_v37 = vcombine.low %v778_v34, %v778_v34  ;;  %v340_v39 = vsel %vm339_vm14, %v334_v35, %v336_v36  ;;  %v1184_v58 = vcombine.high %v697_v56, %v697_v56  ;;  %v777_v59 = vsel %vm775_vm8, %v1347_v8, 0 }
  0x97   : > { %v348_v42 = vsel %vm346_vm0, %v340_v39, 0  ;;  %v917_v57 = vsel %vm916_vm7, %v915_v55, %v1376_v28  ;;  %v1183_v60 = vcombine.low %v697_v56, %v697_v56  ;;  %v1189_v61 = vcombine.low %v777_v59, %v777_v59  ;;  %v1179_v39 = vld [vmem:[%s1488_s1 + $0x8] sm:$0x3] }
  0x98   : > { %793 = vrot.lane.b32.xlu0 %v1191_v37, %s1288_s8  ;;  %713 = vrot.lane.b32.xlu1 %v1185_v33, %s1289_s9  ;;  %vm918_vm9 = vcmp.ne.s16.totalorder %v917_v57, 0  ;;  %v1190_v63 = vcombine.high %v777_v59, %v777_v59  ;;  %vm919_vm10 = vcmp.ne.s16.totalorder %v915_v55, 0  ;;  %vm408_vm11 = vcmask 924672   ;;  %v1194_v57 = vld [vmem:[%s1488_s1 + $0xe] sm:$0x3] }
  0x99   : > { %v338_v41 = vpop.permute.xlu0 %337  ;;  %v920_v62 = vsel %vm918_vm9, %v1347_v8, 0  ;;  %v921_v2 = vsel %vm919_vm10, %v1357_v11, 0  ;;  %v632_v8 = vpop.permute.xlu1 %631  ;;  %vm635_vm13 = vcmask 785408   ;;  %vm715_vm15 = vcmask 777216  }
  0x9a   : > { %v341_v44 = vsel %vm339_vm14, %v336_v36, %v338_v41  ;;  %v1198_v0 = vcombine.low %v920_v62, %v920_v62  ;;  %v1200_v3 = vcombine.low %v921_v2, %v921_v2  ;;  %v1199_v4 = vcombine.high %v920_v62, %v920_v62  ;;  %v1173_v36 = vld [vmem:[%s1488_s1 + $0x6] sm:$0x3]  ;;  %v1197_v62 = vld [vmem:[%s1488_s1 + $0x10] sm:$0x3] }
  0x9b   : > { %1160 = vmatprep.subr.msk.bf16.mxu0 %vm346_vm0, %v341_v44  ;;  %vm572_vm14 = vcmask 793600   ;;  %vm795_vm1 = vcmask 662528   ;;  %vm858_vm2 = vcmask 654336   ;;  %vm938_vm4 = vcmask 646144  }
  0x9c   : > { %404 = vrot.lane.b32.xlu0 %v1163_v43, %s1285_s5  ;;  %368 = vmatpush1.bf16.msra.mxu0 %v348_v42 }
  0x9d   : > { %402 = vrot.lane.b32.xlu1 %v1162_v46, %s1285_s5  ;;  %v630_v7 = vpop.permute.xlu0 %629 }
  0x9e   : > { %v636_v26 = vsel %vm635_vm13, %v630_v7, %v632_v8 }
  0x9f   : > { %1161 = vmatmul.mubr.msk.bf16.vlgmr.msra.gmra.mxu0 %vm342_vm3, %v1156_v47  ;;  %v642_v33 = vsel %vm346_vm0, %v636_v26, 0 }
  0xa0   : > { %486 = vrot.lane.b32.xlu0 %v1168_v48, %s1286_s6  ;;  %536 = vmatprep.mubr.bf16.mxu0 %v1276_v1 }
  0xa1   : > { %488 = vrot.lane.b32.xlu1 %v1169_v50, %s1286_s6 }
  0xa4   : > { %568 = vrot.lane.b32.xlu0 %v1175_v52, %s1287_s7  ;;  %v1188_v52 = vld [vmem:[%s1488_s1 + $0xc] sm:$0x3] }
  0xa5   : > { %566 = vrot.lane.b32.xlu1 %v1174_v53, %s1287_s7 }
  0xa8   : > { %854 = vrot.lane.b32.xlu0 %v1355_v10, %s1290_s12 }
  0xa9   : > { %852 = vrot.lane.b32.xlu1 %v1351_v9, %s1290_s12  ;;  %v634_v9 = vpop.permute.xlu0 %633 }
  0xaa   : > { %v637_v27 = vsel %vm635_vm13, %v632_v8, %v634_v9 }
  0xac   : > { %711 = vrot.lane.b32.xlu0 %v1184_v58, %s1289_s9 }
  0xad   : > { %709 = vrot.lane.b32.xlu1 %v1183_v60, %s1289_s9 }
  0xb0   : > { %789 = vrot.lane.b32.xlu0 %v1189_v61, %s1288_s8 }
  0xb1   : > { %791 = vrot.lane.b32.xlu1 %v1190_v63, %s1288_s8 }
  0xb4   : > { %932 = vrot.lane.b32.xlu0 %v1198_v0, %s1291_s13 }
  0xb5   : > { %856 = vrot.lane.b32.xlu1 %v1363_v12, %s1290_s12  ;;  %s1205_s12 = sshll.u32 %s1497_s15, 3 }
  0xb6   : > { %s270_s19 = scalar_lea.vmem %s1491_s4, %s1205_s12 }
  0xb8   : > { %936 = vrot.lane.b32.xlu0 %v1200_v3, %s1291_s13 }
  0xb9   : > { %934 = vrot.lane.b32.xlu1 %v1199_v4, %s1291_s13 }
  0xbc   : > { %1004 = vperm.xlu0 %1248, %v1001_v5  }
  0xbd   : > { %996 = vperm.xlu1 %1247, %v993_v6  }
 0x102   : > { %v407_v10 = vpop.permute.xlu1 %406 }
 0x106   : > { %v491_v11 = vpop.permute.xlu0 %490  ;;  %v571_v12 = vpop.permute.xlu1 %570 }
 0x10a   : > { %v794_v13 = vpop.permute.xlu0 %793  ;;  %v714_v14 = vpop.permute.xlu1 %713 }
 0x10e   : > { %v405_v15 = vpop.permute.xlu0 %404 }
 0x10f   : > { %v403_v16 = vpop.permute.xlu1 %402  ;;  %v410_v17 = vsel %vm408_vm11, %v405_v15, %v407_v10 }
 0x110   : > { %1165 = vmatprep.subr.msk.bf16.mxu1 %vm346_vm0, %v410_v17  ;;  %v409_v18 = vsel %vm408_vm11, %v403_v16, %v405_v15 }
 0x111   : > { %v415_v19 = vsel %vm346_vm0, %v409_v18, 0 }
 0x112   : > { %435 = vmatpush1.bf16.msra.mxu1 %v415_v19  ;;  %v487_v20 = vpop.permute.xlu0 %486 }
 0x113   : > { %v489_v22 = vpop.permute.xlu1 %488 }
 0x114   : > { %v493_v23 = vsel %vm492_vm12, %v487_v20, %v489_v22  ;;  %v494_v24 = vsel %vm492_vm12, %v489_v22, %v491_v11 }
 0x115   : > { %v499_v25 = vsel %vm346_vm0, %v493_v23, 0  ;;  %1166 = vmatmul.mubr.msk.bf16.vlgmr.msra.gmra.mxu1 %vm342_vm3, %v322_v21  ;;  %1171 = vmatprep.subr.msk.bf16.mxu0 %vm346_vm0, %v494_v24 }
 0x116   : > { %519 = vmatpush1.bf16.msra.mxu0 %v499_v25  ;;  %v569_v28 = vpop.permute.xlu0 %568  ;;  %616 = vmatprep.mubr.bf16.mxu1 %v1276_v1 }
 0x117   : > { %v574_v30 = vsel %vm572_vm14, %v569_v28, %v571_v12  ;;  %1180 = vmatprep.subr.msk.bf16.mxu0 %vm346_vm0, %v637_v27  ;;  %v567_v31 = vpop.permute.xlu1 %566 }
 0x118   : > { %v573_v32 = vsel %vm572_vm14, %v567_v31, %v569_v28  ;;  %1177 = vmatprep.subr.msk.bf16.mxu1 %vm346_vm0, %v574_v30 }
 0x119   : > { %v579_v34 = vsel %vm346_vm0, %v573_v32, 0  ;;  %1172 = vmatmul.mubr.msk.bf16.vlgmr.msra.gmra.mxu0 %vm342_vm3, %v1167_v29 }
 0x11a   : > { %599 = vmatpush1.bf16.msra.mxu1 %v579_v34  ;;  %662 = vmatpush1.bf16.msra.mxu0 %v642_v33  ;;  %v855_v35 = vpop.permute.xlu0 %854 }
 0x11b   : > { %v853_v37 = vpop.permute.xlu1 %852  ;;  %679 = vmatprep.mubr.bf16.mxu0 %v1276_v1 }
 0x11c   : > { %v859_v50 = vsel %vm858_vm2, %v853_v37, %v855_v35 }
 0x11d   : > { %1178 = vmatmul.mubr.msk.bf16.vlgmr.msra.gmra.mxu1 %vm342_vm3, %v1173_v36  ;;  %v865_v55 = vsel %vm346_vm0, %v859_v50, 0 }
 0x11e   : > { %v712_v38 = vpop.permute.xlu0 %711  ;;  %759 = vmatprep.mubr.bf16.mxu1 %v1276_v1 }
 0x11f   : > { %v717_v40 = vsel %vm715_vm15, %v712_v38, %v714_v14  ;;  %v710_v41 = vpop.permute.xlu1 %709 }
 0x120   : > { %v716_v42 = vsel %vm715_vm15, %v710_v41, %v712_v38  ;;  %1186 = vmatprep.subr.msk.bf16.mxu1 %vm346_vm0, %v717_v40 }
 0x121   : > { %v722_v43 = vsel %vm346_vm0, %v716_v42, 0  ;;  %1181 = vmatmul.mubr.msk.bf16.vlgmr.msra.gmra.mxu0 %vm342_vm3, %v1179_v39 }
 0x122   : > { %742 = vmatpush1.bf16.msra.mxu1 %v722_v43  ;;  %v790_v44 = vpop.permute.xlu0 %789  ;;  %839 = vmatprep.mubr.bf16.mxu0 %v1276_v1 }
 0x123   : > { %v792_v46 = vpop.permute.xlu1 %791 }
 0x124   : > { %v796_v47 = vsel %vm795_vm1, %v790_v44, %v792_v46  ;;  %v797_v48 = vsel %vm795_vm1, %v792_v46, %v794_v13 }
 0x125   : > { %v802_v49 = vsel %vm346_vm0, %v796_v47, 0  ;;  %1187 = vmatmul.mubr.msk.bf16.vlgmr.msra.gmra.mxu1 %vm342_vm3, %v1182_v45  ;;  %1192 = vmatprep.subr.msk.bf16.mxu0 %vm346_vm0, %v797_v48 }
 0x126   : > { %822 = vmatpush1.bf16.msra.mxu0 %v802_v49  ;;  %v933_v51 = vpop.permute.xlu0 %932  ;;  %902 = vmatprep.mubr.bf16.mxu1 %v1276_v1 }
 0x127   : > { %v857_v53 = vpop.permute.xlu1 %856 }
 0x128   : > { %v860_v54 = vsel %vm858_vm2, %v855_v35, %v857_v53 }
 0x129   : > { %1193 = vmatmul.mubr.msk.bf16.vlgmr.msra.gmra.mxu0 %vm342_vm3, %v1188_v52  ;;  %1195 = vmatprep.subr.msk.bf16.mxu1 %vm346_vm0, %v860_v54 }
 0x12a   : > { %885 = vmatpush1.bf16.msra.mxu1 %v865_v55  ;;  %v937_v56 = vpop.permute.xlu0 %936  ;;  %982 = vmatprep.mubr.bf16.mxu0 %v1276_v1 }
 0x12b   : > { %v935_v58 = vpop.permute.xlu1 %934 }
 0x12c   : > { %v939_v59 = vsel %vm938_vm4, %v933_v51, %v935_v58  ;;  %v940_v60 = vsel %vm938_vm4, %v935_v58, %v937_v56 }
 0x12d   : > { %v945_v61 = vsel %vm346_vm0, %v939_v59, 0  ;;  %1196 = vmatmul.mubr.msk.bf16.vlgmr.msra.gmra.mxu1 %vm342_vm3, %v1194_v57  ;;  %1201 = vmatprep.subr.msk.bf16.mxu0 %vm346_vm0, %v940_v60 }
 0x12e   : > { %965 = vmatpush1.bf16.msra.mxu0 %v945_v61 }
 0x131   : > { %1202 = vmatmul.mubr.msk.bf16.vlgmr.msra.gmra.mxu0 %vm342_vm3, %v1197_v62 }
 0x137   : > { %v1005_v47 = vpop.permute.xlu0 %1004 }
 0x138   : > { %v997_v42 = vpop.permute.xlu1 %996 }
 0x15f   : > { %v387_v63 = vpop.f32.mrf.mxu0 }
 0x161   : > { %v389_v0 = vpop.f32.mrf.mxu0 }
 0x163   : > { %v391_v2 = vpop.f32.mrf.mxu0 }
 0x165   : > { %v392_v1 = vpop.f32.mrf.mxu0 }
 0x1d5   : > { %v454_v3 = vpop.f32.mrf.mxu1 }
 0x1d6   : > { %v455_v17 = vadd.f32 %v454_v3, %v387_v63 }
 0x1d7   : > { %v456_v4 = vpop.f32.mrf.mxu1 }
 0x1d8   : > { %v457_v20 = vadd.f32 %v456_v4, %v389_v0 }
 0x1d9   : > { %v458_v5 = vpop.f32.mrf.mxu1  ;;  %v538_v6 = vpop.f32.mrf.mxu0 }
 0x1da   : > { %v545_v21 = vadd.f32 %v538_v6, %v455_v17 }
 0x1db   : > { %v459_v7 = vpop.f32.mrf.mxu1  ;;  %v540_v8 = vpop.f32.mrf.mxu0 }
 0x1dc   : > { %v546_v24 = vadd.f32 %v540_v8, %v457_v20 }
 0x1dd   : > { %v542_v9 = vpop.f32.mrf.mxu0  ;;  %v618_v10 = vpop.f32.mrf.mxu1 }
 0x1de   : > { %v625_v25 = vadd.f32 %v618_v10, %v545_v21 }
 0x1df   : > { %v543_v11 = vpop.f32.mrf.mxu0  ;;  %v620_v12 = vpop.f32.mrf.mxu1 }
 0x1e0   : > { %v626_v28 = vadd.f32 %v620_v12, %v546_v24 }
 0x1e1   : > { %v622_v13 = vpop.f32.mrf.mxu1  ;;  %v681_v14 = vpop.f32.mrf.mxu0 }
 0x1e2   : > { %v688_v29 = vadd.f32 %v681_v14, %v625_v25 }
 0x1e3   : > { %v623_v15 = vpop.f32.mrf.mxu1  ;;  %v683_v16 = vpop.f32.mrf.mxu0 }
 0x1e4   : > { %v689_v32 = vadd.f32 %v683_v16, %v626_v28 }
 0x1e5   : > { %v685_v18 = vpop.f32.mrf.mxu0  ;;  %v761_v19 = vpop.f32.mrf.mxu1 }
 0x1e6   : > { %v768_v33 = vadd.f32 %v761_v19, %v688_v29 }
 0x1e7   : > { %v686_v22 = vpop.f32.mrf.mxu0  ;;  %v763_v23 = vpop.f32.mrf.mxu1 }
 0x1e8   : > { %v769_v36 = vadd.f32 %v763_v23, %v689_v32 }
 0x1e9   : > { %v765_v26 = vpop.f32.mrf.mxu1  ;;  %v841_v27 = vpop.f32.mrf.mxu0 }
 0x1ea   : > { %v848_v37 = vadd.f32 %v841_v27, %v768_v33 }
 0x1eb   : > { %v766_v30 = vpop.f32.mrf.mxu1  ;;  %v843_v31 = vpop.f32.mrf.mxu0 }
 0x1ec   : > { %v849_v40 = vadd.f32 %v843_v31, %v769_v36 }
 0x1ed   : > { %v845_v34 = vpop.f32.mrf.mxu0  ;;  %v904_v35 = vpop.f32.mrf.mxu1 }
 0x1ee   : > { %v911_v41 = vadd.f32 %v904_v35, %v848_v37 }
 0x1ef   : > { %v846_v38 = vpop.f32.mrf.mxu0  ;;  %v906_v39 = vpop.f32.mrf.mxu1 }
 0x1f0   : > { %v912_v45 = vadd.f32 %v906_v39, %v849_v40 }
 0x1f1   : > { %v984_v43 = vpop.f32.mrf.mxu0  ;;  %v908_v44 = vpop.f32.mrf.mxu1 }
 0x1f2   : > { %v991_v46 = vadd.f32 %v984_v43, %v911_v41 }
 0x1f3   : > { %v986_v48 = vpop.f32.mrf.mxu0  ;;  %v909_v49 = vpop.f32.mrf.mxu1 }
 0x1f4   : > { %v992_v50 = vadd.f32 %v986_v48, %v912_v45  ;;  %v999_v51 = vmul.f32 %v997_v42, %v991_v46 }
 0x1f5   : > { %v988_v52 = vpop.f32.mrf.mxu0 }
 0x1f6   : > { %v1000_v53 = vmul.f32 %v997_v42, %v992_v50  ;;  %v1007_v54 = vadd.f32 %v1005_v47, %v999_v51 }
 0x1f7   : > { %v989_v55 = vpop.f32.mrf.mxu0 }
 0x1f8   : > { %v1008_v56 = vadd.f32 %v1005_v47, %v1000_v53  ;;  %v1009_v57 = vmax.f32 %v1007_v54, 0.0 }
 0x1fa   : > { %v1010_v58 = vmax.f32 %v1008_v56, 0.0 }
 0x1fc   : > { %v1013_v59 = vcombine.low %v1009_v57, %v1010_v58 }
 0x1fe   : > { %1015 = vst [vmem:[%s270_s19] sm:$0xff] %v1013_v59 }
 0x1ff PF: > { %s14_s17 = sadd.s32 1, %s1274_s17   ;;  %s1492_s15 = smov %s1270_s16 }
 0x200   : > { %p11_p5 = scmp.ge.s32.totalorder %s14_s17, 4   ;;  %s1493_s16 = smov %s1495_s18 }
 0x202   :  { %13 = sbr.rel (!%p11_p5) target bundleno = 2 (0x2), region = 83 }

</bundles_post_ra>
